<compile_context>
chip_gen: v7x
topology: tpu7x:2x2x1
jax: 0.10.0
libtpu: 0.0.40
codegen_flags: <defaults>
</compile_context>

<pallas_src>
import math
import numpy as np
import jax
import jax.numpy as jnp
from jax import lax
from jax.experimental import pallas as pl
from jax.experimental.pallas import tpu as pltpu


# ----------------------------------------------------------------------------
# PyTorch make_kernel equivalent (numpy, deterministic)
# ----------------------------------------------------------------------------
def make_kernel(k):
    k = np.asarray(k, dtype=np.float32)
    if k.ndim == 1:
        k = k[None, :] * k[:, None]
    k = k / k.sum()
    return k


def _pick_channel_tile(c, hp, wp, itemsize, budget_bytes=2 * 2**20):
    """Largest legal channel tile (multiple of 128 dividing C, or full C) whose
    padded f32 slab fits the per-block VMEM budget."""
    cands = [c]
    t = 128
    while t < c:
        if c % t == 0:
            cands.append(t)
        t += 128
    fitting = [t for t in cands if hp * wp * t * itemsize <= budget_bytes]
    return max(fitting) if fitting else min(cands)


# ----------------------------------------------------------------------------
# Fused Pallas kernel: upfirdn2d blur (up=down=1) + bias + leaky-ReLU epilogue
# Input layout: NHWC (channels on lanes).
# ----------------------------------------------------------------------------
def fused_blur_bias_act(x_nhwc, bias, taps_h, taps_w, pad, *,
                        negative_slope=0.2, act_gain=math.sqrt(2.0),
                        apply_act=True):
    B, Hs, Ws, C = x_nhwc.shape
    taps_h = [float(t) for t in taps_h]
    taps_w = [float(t) for t in taps_w]
    kh, kw = len(taps_h), len(taps_w)
    pad0, pad1 = int(pad[0]), int(pad[1])

    Hp, Wp = Hs + pad0 + pad1, Ws + pad0 + pad1
    Ho, Wo = Hp - kh + 1, Wp - kw + 1
    assert Ho > 0 and Wo > 0, "output spatial size must be positive"

    # Interior placement of the (possibly cropped) input in the padded scratch.
    # All static Python arithmetic -> static ref slices inside the kernel.
    dst_h0, src_h0 = max(pad0, 0), max(-pad0, 0)
    dst_w0, src_w0 = max(pad0, 0), max(-pad0, 0)
    h_len = Hs - src_h0 - max(-pad1, 0)
    w_len = Ws - src_w0 - max(-pad1, 0)

    itemsize = jnp.dtype(x_nhwc.dtype).itemsize
    tc = _pick_channel_tile(C, Hp, Wp, max(itemsize, 4))
    n_ct = C // tc
    ns, gain = float(negative_slope), float(act_gain)

    def kernel(x_ref, b_ref, o_ref, pad_ref, row_ref):
        # Zero-fill padded VMEM scratch, copy input slab into its interior
        # (one cast of the whole block).
        pad_ref[...] = jnp.zeros_like(pad_ref)
        pad_ref[:, dst_h0:dst_h0 + h_len, dst_w0:dst_w0 + w_len, :] = (
            x_ref[:, src_h0:src_h0 + h_len, src_w0:src_w0 + w_len, :]
            .astype(jnp.float32))

        # Separable blur, pass 1 along W (sublane axis): (1,Hp,Wp,tc)->(1,Hp,Wo,tc)
        acc = taps_w[0] * pad_ref[:, :, 0:Wo, :]
        for j in range(1, kw):
            acc = acc + taps_w[j] * pad_ref[:, :, j:j + Wo, :]
        row_ref[...] = acc

        # Pass 2 along H (outer axis): (1,Hp,Wo,tc) -> (1,Ho,Wo,tc)
        out = taps_h[0] * row_ref[:, 0:Ho, :, :]
        for i in range(1, kh):
            out = out + taps_h[i] * row_ref[:, i:i + Ho, :, :]

        # Fused FusedLeakyReLU: + per-channel bias, leaky relu, * sqrt(2)
        out = out + b_ref[...].astype(jnp.float32).reshape(1, 1, 1, tc)
        if apply_act:
            out = jnp.where(out >= 0.0, out, ns * out) * gain
        o_ref[...] = out.astype(o_ref.dtype)

    bias2d = jnp.asarray(bias, jnp.float32).reshape(1, C)

    # VMEM estimate: double-buffered in/out blocks + two f32 scratches.
    est = (2 * Hs * Ws * tc * itemsize + 2 * Ho * Wo * tc * itemsize
           + 4 * (Hp * Wp * tc + Hp * Wo * tc) + (2 << 20))
    vmem_limit = int(min(est * 3 // 2, 96 * 2**20)) if est > 12 * 2**20 else None

    out = pl.pallas_call(
        kernel,
        out_shape=jax.ShapeDtypeStruct((B, Ho, Wo, C), x_nhwc.dtype),
        grid=(B, n_ct),
        in_specs=[
            pl.BlockSpec((1, Hs, Ws, tc), lambda b, c: (b, 0, 0, c)),
            pl.BlockSpec((1, tc), lambda b, c: (0, c)),
        ],
        out_specs=pl.BlockSpec((1, Ho, Wo, tc), lambda b, c: (b, 0, 0, c)),
        scratch_shapes=[
            pltpu.VMEM((1, Hp, Wp, tc), jnp.float32),   # padded input slab
            pltpu.VMEM((1, Hp, Wo, tc), jnp.float32),   # row-filtered slab
        ],
        compiler_params=pltpu.CompilerParams(
            dimension_semantics=("parallel", "parallel"),
            vmem_limit_bytes=vmem_limit),
    )(x_nhwc, bias2d)
    return out


# ----------------------------------------------------------------------------
# UpBlock (ModulatedConv2d(upsample) -> Blur -> FusedLeakyReLU)
# ----------------------------------------------------------------------------
class UpBlockPallas:
    def __init__(self, in_channel, out_channel, kernel_size=3, style_dim=512,
                 upsample=True, blur_kernel=(1, 3, 3, 1), demodulate=True,
                 *, key):
        k_conv, k_mod = jax.random.split(key)
        self.in_channel = int(in_channel)
        self.out_channel = int(out_channel)
        self.kernel_size = int(kernel_size)
        self.upsample = bool(upsample)
        self.demodulate = bool(demodulate)
        self.eps = 1e-8

        # ModulatedConv2d.weight ~ randn(1, out, in, k, k)
        self.conv_weight = jax.random.normal(
            k_conv, (1, out_channel, in_channel, kernel_size, kernel_size),
            jnp.float32)
        self.conv_scale = 1.0 / math.sqrt(in_channel * kernel_size ** 2)
        self.padding = kernel_size // 2

        # modulation = EqualLinear(style_dim, in_channel, bias_init=1), lr_mul=1
        self.mod_weight = jax.random.normal(
            k_mod, (in_channel, style_dim), jnp.float32)
        self.mod_bias = jnp.ones((in_channel,), jnp.float32)
        self.mod_scale = 1.0 / math.sqrt(style_dim)

        if upsample:
            p = len(blur_kernel) - 2 - (kernel_size - 1)
            self.blur_pad = ((p + 1) // 2 + 2 - 1, p // 2 + 1)
            k1 = np.asarray(blur_kernel, np.float32)
            k1 = k1 / k1.sum()
            u2 = 2.0 ** 2                       # upsample_factor ** 2
            # upfirdn2d convolves with the *flipped* kernel; separable factors.
            self.taps_h = (k1[::-1] * u2).tolist()
            self.taps_w = k1[::-1].tolist()
            self.blur_kernel2d = make_kernel(list(blur_kernel)) * u2  # for ref

        # FusedLeakyReLU(out_channel): bias zeros, slope 0.2, gain sqrt(2)
        self.act_bias = jnp.zeros((out_channel,), jnp.float32)
        self.negative_slope = 0.2
        self.act_gain = math.sqrt(2.0)

    # --- plain-JAX glue ------------------------------------------------------
    def modulated_weight(self, style):
        # EqualLinear (no activation): style @ (W*scale).T + bias
        s = style @ (self.mod_weight * self.mod_scale).T + self.mod_bias
        w = self.conv_scale * self.conv_weight * s[:, None, :, None, None]
        if self.demodulate:
            demod = lax.rsqrt(jnp.sum(w * w, axis=(2, 3, 4)) + self.eps)
            w = w * demod[:, :, None, None, None]
        return w  # (B, Cout, Cin, K, K)

    def grouped_conv(self, x, w):
        # TODO(synk): the per-sample grouped (transposed) convolution and the
        # tiny style matmul stay on XLA; only the blur+bias+leakyReLU epilogue
        # is the hand-written Pallas kernel.
        B, Cin, H, W = x.shape
        K, Cout = self.kernel_size, self.out_channel
        xg = x.reshape(1, B * Cin, H, W)
        if self.upsample:
            # conv_transpose2d(stride=2, pad=0, groups=B) ==
            # conv(dilate_2(x), flip(w), pad=K-1) with per-sample weights.
            rhs = jnp.flip(w, axis=(-2, -1)).reshape(B * Cout, Cin, K, K)
            y = lax.conv_general_dilated(
                xg, rhs, window_strides=(1, 1),
                padding=((K - 1, K - 1), (K - 1, K - 1)),
                lhs_dilation=(2, 2),
                dimension_numbers=("NCHW", "OIHW", "NCHW"),
                feature_group_count=B,
                precision=lax.Precision.HIGHEST)
        else:
            rhs = w.reshape(B * Cout, Cin, K, K)
            y = lax.conv_general_dilated(
                xg, rhs, window_strides=(1, 1),
                padding=((self.padding, self.padding),) * 2,
                dimension_numbers=("NCHW", "OIHW", "NCHW"),
                feature_group_count=B,
                precision=lax.Precision.HIGHEST)
        return y.reshape(B, Cout, y.shape[2], y.shape[3])

    # --- forward --------------------------------------------------------------
    def __call__(self, x, style):
        w = self.modulated_weight(style)
        y = self.grouped_conv(x, w)               # (B, Cout, Hs, Ws)
        y_nhwc = jnp.transpose(y, (0, 2, 3, 1))   # channels -> lane axis
        if self.upsample:
            out_nhwc = fused_blur_bias_act(
                y_nhwc, self.act_bias, self.taps_h, self.taps_w, self.blur_pad,
                negative_slope=self.negative_slope, act_gain=self.act_gain)
        else:
            # no blur: identity 1-tap filter, still fuses bias + leaky ReLU
            out_nhwc = fused_blur_bias_act(
                y_nhwc, self.act_bias, [1.0], [1.0], (0, 0),
                negative_slope=self.negative_slope, act_gain=self.act_gain)
        return jnp.transpose(out_nhwc, (0, 3, 1, 2))   # back to NCHW


# ----------------------------------------------------------------------------
# Pure-JAX reference (no Pallas) for correctness checking
# ----------------------------------------------------------------------------
def _blur_reference_nchw(x, kernel2d, pad):
    N, C, H, W = x.shape
    kh, kw = kernel2d.shape
    pad0, pad1 = int(pad[0]), int(pad[1])
    xp = jnp.pad(x, ((0, 0), (0, 0),
                     (max(pad0, 0), max(pad1, 0)),
                     (max(pad0, 0), max(pad1, 0))))
    Hf, Wf = xp.shape[2], xp.shape[3]
    xp = xp[:, :, max(-pad0, 0):Hf - max(-pad1, 0),
            max(-pad0, 0):Wf - max(-pad1, 0)]
    Hp, Wp = xp.shape[2], xp.shape[3]
    Ho, Wo = Hp - kh + 1, Wp - kw + 1
    kflip = np.asarray(kernel2d, np.float32)[::-1, ::-1]
    out = jnp.zeros((N, C, Ho, Wo), jnp.float32)
    for i in range(kh):
        for j in range(kw):
            out = out + float(kflip[i, j]) * xp[:, :, i:i + Ho, j:j + Wo]
    return out


def upblock_reference(block, x, style):
    w = block.modulated_weight(style)
    y = block.grouped_conv(x, w)
    if block.upsample:
        y = _blur_reference_nchw(y, block.blur_kernel2d, block.blur_pad)
    v = y + block.act_bias.reshape(1, -1, 1, 1)
    return (jnp.where(v >= 0.0, v, block.negative_slope * v)
            * block.act_gain).astype(x.dtype)


if __name__ == "__main__":
    B, Cin, Cout, H, W, style_dim = 2, 4, 8, 16, 16, 32
    root = jax.random.PRNGKey(0)
    k_param, k_x, k_s = jax.random.split(root, 3)

    block = UpBlockPallas(Cin, Cout, kernel_size=3, style_dim=style_dim,
                          upsample=True, blur_kernel=(1, 3, 3, 1),
                          demodulate=True, key=k_param)

    x = jax.random.normal(k_x, (B, Cin, H, W), jnp.float32)
    style = jax.random.normal(k_s, (B, style_dim), jnp.float32)

    y = jax.block_until_ready(block(x, style))
    assert y.shape == (B, Cout, 2 * H, 2 * W), y.shape

    y_ref = jax.block_until_ready(upblock_reference(block, x, style))
    np.testing.assert_allclose(np.asarray(y), np.asarray(y_ref),
                               rtol=1e-4, atol=1e-4)

    print("KERNEL_OK")
</pallas_src>

<mosaic_0001>
module attributes {stable_mosaic.version = 11 : i64} {
  func.func @kernel(%arg0: i32, %arg1: i32, %arg2: memref<1x33x33x8xf32, #tpu.memory_space<vmem>>, %arg3: memref<1x8xf32, #tpu.memory_space<vmem>>, %arg4: memref<1x32x32x8xf32, #tpu.memory_space<vmem>>, %arg5: memref<1x35x35x8xf32, #tpu.memory_space<vmem>>, %arg6: memref<1x35x32x8xf32, #tpu.memory_space<vmem>>) attributes {dimension_semantics = [#tpu.dimension_semantics<parallel>, #tpu.dimension_semantics<parallel>], iteration_bounds = array<i64: 2, 1>, scalar_prefetch = 0 : i64, scratch_operands = 2 : i64, tpu.core_type = #tpu.core_type<tc>, window_params = [{transform_indices = @transform_0, window_bounds = array<i64: 1, 33, 33, 8>}, {transform_indices = @transform_1, window_bounds = array<i64: 1, 8>}, {transform_indices = @transform_2, window_bounds = array<i64: 1, 32, 32, 8>}]} {
    %cst = arith.constant 0.000000e+00 : f32
    %0 = vector.broadcast %cst : f32 to vector<1x35x35x8xf32>
    %c0 = arith.constant 0 : index
    %c0_0 = arith.constant 0 : index
    %c0_1 = arith.constant 0 : index
    %c0_2 = arith.constant 0 : index
    %1 = vector.load %arg5[%c0, %c0_0, %c0_1, %c0_2] : memref<1x35x35x8xf32, #tpu.memory_space<vmem>>, vector<1x35x35x8xf32>
    tpu.vector_store %arg5[%c0, %c0_0, %c0_1, %c0_2], %0 {strides = array<i32>} : memref<1x35x35x8xf32, #tpu.memory_space<vmem>>, vector<1x35x35x8xf32>,
    %c0_3 = arith.constant 0 : index
    %c0_4 = arith.constant 0 : index
    %c0_5 = arith.constant 0 : index
    %c0_6 = arith.constant 0 : index
    %2 = vector.load %arg2[%c0_3, %c0_4, %c0_5, %c0_6] : memref<1x33x33x8xf32, #tpu.memory_space<vmem>>, vector<1x33x33x8xf32>
    %c0_7 = arith.constant 0 : index
    %c1 = arith.constant 1 : index
    %c1_8 = arith.constant 1 : index
    %c0_9 = arith.constant 0 : index
    %3 = vector.load %arg5[%c0_7, %c1, %c1_8, %c0_9] : memref<1x35x35x8xf32, #tpu.memory_space<vmem>>, vector<1x33x33x8xf32>
    tpu.vector_store %arg5[%c0_7, %c1, %c1_8, %c0_9], %2 {strides = array<i32>} : memref<1x35x35x8xf32, #tpu.memory_space<vmem>>, vector<1x33x33x8xf32>,
    %c0_10 = arith.constant 0 : index
    %c0_11 = arith.constant 0 : index
    %c0_12 = arith.constant 0 : index
    %c0_13 = arith.constant 0 : index
    %4 = vector.load %arg5[%c0_10, %c0_11, %c0_12, %c0_13] : memref<1x35x35x8xf32, #tpu.memory_space<vmem>>, vector<1x35x32x8xf32>
    %cst_14 = arith.constant 1.250000e-01 : f32
    %5 = vector.broadcast %cst_14 : f32 to vector<1x35x32x8xf32>
    %6 = arith.mulf %5, %4 : vector<1x35x32x8xf32>
    %c0_15 = arith.constant 0 : index
    %c0_16 = arith.constant 0 : index
    %c1_17 = arith.constant 1 : index
    %c0_18 = arith.constant 0 : index
    %7 = vector.load %arg5[%c0_15, %c0_16, %c1_17, %c0_18] : memref<1x35x35x8xf32, #tpu.memory_space<vmem>>, vector<1x35x32x8xf32>
    %cst_19 = arith.constant 3.750000e-01 : f32
    %8 = vector.broadcast %cst_19 : f32 to vector<1x35x32x8xf32>
    %9 = arith.mulf %8, %7 : vector<1x35x32x8xf32>
    %10 = arith.addf %6, %9 : vector<1x35x32x8xf32>
    %c0_20 = arith.constant 0 : index
    %c0_21 = arith.constant 0 : index
    %c2 = arith.constant 2 : index
    %c0_22 = arith.constant 0 : index
    %11 = vector.load %arg5[%c0_20, %c0_21, %c2, %c0_22] : memref<1x35x35x8xf32, #tpu.memory_space<vmem>>, vector<1x35x32x8xf32>
    %cst_23 = arith.constant 3.750000e-01 : f32
    %12 = vector.broadcast %cst_23 : f32 to vector<1x35x32x8xf32>
    %13 = arith.mulf %12, %11 : vector<1x35x32x8xf32>
    %14 = arith.addf %10, %13 : vector<1x35x32x8xf32>
    %c0_24 = arith.constant 0 : index
    %c0_25 = arith.constant 0 : index
    %c3 = arith.constant 3 : index
    %c0_26 = arith.constant 0 : index
    %15 = vector.load %arg5[%c0_24, %c0_25, %c3, %c0_26] : memref<1x35x35x8xf32, #tpu.memory_space<vmem>>, vector<1x35x32x8xf32>
    %cst_27 = arith.constant 1.250000e-01 : f32
    %16 = vector.broadcast %cst_27 : f32 to vector<1x35x32x8xf32>
    %17 = arith.mulf %16, %15 : vector<1x35x32x8xf32>
    %18 = arith.addf %14, %17 : vector<1x35x32x8xf32>
    %c0_28 = arith.constant 0 : index
    %c0_29 = arith.constant 0 : index
    %c0_30 = arith.constant 0 : index
    %c0_31 = arith.constant 0 : index
    %19 = vector.load %arg6[%c0_28, %c0_29, %c0_30, %c0_31] : memref<1x35x32x8xf32, #tpu.memory_space<vmem>>, vector<1x35x32x8xf32>
    tpu.vector_store %arg6[%c0_28, %c0_29, %c0_30, %c0_31], %18 {strides = array<i32>} : memref<1x35x32x8xf32, #tpu.memory_space<vmem>>, vector<1x35x32x8xf32>,
    %c0_32 = arith.constant 0 : index
    %c0_33 = arith.constant 0 : index
    %c0_34 = arith.constant 0 : index
    %c0_35 = arith.constant 0 : index
    %20 = vector.load %arg6[%c0_32, %c0_33, %c0_34, %c0_35] : memref<1x35x32x8xf32, #tpu.memory_space<vmem>>, vector<1x32x32x8xf32>
    %cst_36 = arith.constant 5.000000e-01 : f32
    %21 = vector.broadcast %cst_36 : f32 to vector<1x32x32x8xf32>
    %22 = arith.mulf %21, %20 : vector<1x32x32x8xf32>
    %c0_37 = arith.constant 0 : index
    %c1_38 = arith.constant 1 : index
    %c0_39 = arith.constant 0 : index
    %c0_40 = arith.constant 0 : index
    %23 = vector.load %arg6[%c0_37, %c1_38, %c0_39, %c0_40] : memref<1x35x32x8xf32, #tpu.memory_space<vmem>>, vector<1x32x32x8xf32>
    %cst_41 = arith.constant 1.500000e+00 : f32
    %24 = vector.broadcast %cst_41 : f32 to vector<1x32x32x8xf32>
    %25 = arith.mulf %24, %23 : vector<1x32x32x8xf32>
    %26 = arith.addf %22, %25 : vector<1x32x32x8xf32>
    %c0_42 = arith.constant 0 : index
    %c2_43 = arith.constant 2 : index
    %c0_44 = arith.constant 0 : index
    %c0_45 = arith.constant 0 : index
    %27 = vector.load %arg6[%c0_42, %c2_43, %c0_44, %c0_45] : memref<1x35x32x8xf32, #tpu.memory_space<vmem>>, vector<1x32x32x8xf32>
    %cst_46 = arith.constant 1.500000e+00 : f32
    %28 = vector.broadcast %cst_46 : f32 to vector<1x32x32x8xf32>
    %29 = arith.mulf %28, %27 : vector<1x32x32x8xf32>
    %30 = arith.addf %26, %29 : vector<1x32x32x8xf32>
    %c0_47 = arith.constant 0 : index
    %c3_48 = arith.constant 3 : index
    %c0_49 = arith.constant 0 : index
    %c0_50 = arith.constant 0 : index
    %31 = vector.load %arg6[%c0_47, %c3_48, %c0_49, %c0_50] : memref<1x35x32x8xf32, #tpu.memory_space<vmem>>, vector<1x32x32x8xf32>
    %cst_51 = arith.constant 5.000000e-01 : f32
    %32 = vector.broadcast %cst_51 : f32 to vector<1x32x32x8xf32>
    %33 = arith.mulf %32, %31 : vector<1x32x32x8xf32>
    %34 = arith.addf %30, %33 : vector<1x32x32x8xf32>
    %c0_52 = arith.constant 0 : index
    %c0_53 = arith.constant 0 : index
    %35 = vector.load %arg3[%c0_52, %c0_53] : memref<1x8xf32, #tpu.memory_space<vmem>>, vector<1x8xf32>
    %36 = vector.shape_cast %35 : vector<1x8xf32> to vector<1x1x1x8xf32>
    %37 = vector.broadcast %36 : vector<1x1x1x8xf32> to vector<1x32x32x8xf32>
    %38 = arith.addf %34, %37 : vector<1x32x32x8xf32>
    %cst_54 = arith.constant 0.000000e+00 : f32
    %39 = vector.broadcast %cst_54 : f32 to vector<1x32x32x8xf32>
    %40 = arith.cmpf oge, %38, %39 : vector<1x32x32x8xf32>
    %cst_55 = arith.constant 2.000000e-01 : f32
    %41 = vector.broadcast %cst_55 : f32 to vector<1x32x32x8xf32>
    %42 = arith.mulf %41, %38 : vector<1x32x32x8xf32>
    %43 = arith.select %40, %38, %42 : vector<1x32x32x8xi1>, vector<1x32x32x8xf32>
    %cst_56 = arith.constant 1.41421354 : f32
    %44 = vector.broadcast %cst_56 : f32 to vector<1x32x32x8xf32>
    %45 = arith.mulf %43, %44 : vector<1x32x32x8xf32>
    %c0_57 = arith.constant 0 : index
    %c0_58 = arith.constant 0 : index
    %c0_59 = arith.constant 0 : index
    %c0_60 = arith.constant 0 : index
    %46 = vector.load %arg4[%c0_57, %c0_58, %c0_59, %c0_60] : memref<1x32x32x8xf32, #tpu.memory_space<vmem>>, vector<1x32x32x8xf32>
    tpu.vector_store %arg4[%c0_57, %c0_58, %c0_59, %c0_60], %45 {strides = array<i32>} : memref<1x32x32x8xf32, #tpu.memory_space<vmem>>, vector<1x32x32x8xf32>,
    return
  }
  func.func @transform_0(%arg0: i32, %arg1: i32) -> (i32, i32, i32, i32) {
    %c0_i32 = arith.constant 0 : i32
    %c0_i32_0 = arith.constant 0 : i32
    %c0_i32_1 = arith.constant 0 : i32
    return %arg0, %c0_i32, %c0_i32_0, %arg1 : i32, i32, i32, i32
  }
  func.func @transform_1(%arg0: i32, %arg1: i32) -> (i32, i32) {
    %c0_i32 = arith.constant 0 : i32
    %c0_i32_0 = arith.constant 0 : i32
    return %c0_i32, %arg1 : i32, i32
  }
  func.func @transform_2(%arg0: i32, %arg1: i32) -> (i32, i32, i32, i32) {
    %c0_i32 = arith.constant 0 : i32
    %c0_i32_0 = arith.constant 0 : i32
    %c0_i32_1 = arith.constant 0 : i32
    return %arg0, %c0_i32, %c0_i32_0, %arg1 : i32, i32, i32, i32
  }
}

</mosaic_0001>

<bundles_post_ra>
// kernel: tpu_custom_call.1
= control target key start
LH: loop header
LB: loop body
LE: loop exit
PB: predicated region body
PF: predicated region fallthrough
CT: control target
= control target key end

     0   :  { %s4741_s9 = smov 0   ;;  %s4743_s10 = smov 0   ;;  %s6519_s0 = inlined_call_operand.vmem [shape: f32[2,33,33,8], index: 0, kind: input, shape index: {}]   ;;  %s6520_s1 = inlined_call_operand.vmem [shape: f32[1,8], index: 1, kind: input, shape index: {}]   ;;  %s6521_s2 = inlined_call_operand.vmem [shape: f32[2,32,32,8], index: 2, kind: output, shape index: {}]  }
   0x1   :  { %s4745_s11 = smov 0  }
   0x2 LB: > { %s24_s12 = sadd.s32 1, %s4719_s10  ;;  %p4665_p0 = scmp.ge.s32.totalorder %s4723_s11, 1  ;;  %s4723_s11 = sphi %s4745_s11, %s12_s11   ;;  %s4719_s10 = sphi %s4743_s10, %s6523_s10   ;;  %s4715_s9 = sphi %s4741_s9, %s6522_s9  }
   0x3   : > { %p26_p1 = scmp.ge.s32.totalorder %s24_s12, 2  ;;  %p139_p2 = scmp.lt.s32.totalorder %s4723_s11, 3 }
   0x5   : > { %s6525_s12 = smov (%p26_p1, %s24_s12), 0  ;;  %p140_p3 = pnand %p4665_p0, %p139_p2 }
   0x6   : > { %vm189_vm0 = vcmask (!%p140_p3), 64512   ;;  %vm194_vm1 = vcmask (!%p140_p3), 59392   ;;  %p170_p4 = scmp.lt.s32.totalorder (!%p140_p3), %s4715_s9, 1  ;;  %v4725_v0 = vmov (!%p140_p3), 0.0   ;;  %vm536_vm2 = vcmask (!%p140_p3), 57344  }
   0x7   : > { %143 = sbr.rel (%p140_p3) target bundleno = 740 (0x2e4), region = 28  ;;  %190 = vst.msk [vmem:[#allocation2] sm:$0xff] (!%p140_p3), %vm189_vm0, %v4725_v0  ;;  %191 = vst.msk [vmem:[#allocation2 + $0x8] sm:$0xff] (!%p140_p3), %vm189_vm0, %v4725_v0 }
   0x8   : > { %192 = vst.msk [vmem:[#allocation2 + $0x10] sm:$0xff] (!%p140_p3), %vm189_vm0, %v4725_v0  ;;  %193 = vst.msk [vmem:[#allocation2 + $0x18] sm:$0xff] (!%p140_p3), %vm189_vm0, %v4725_v0 }
   0x9   : > { %196 = vst.msk [vmem:[#allocation2 + $0x28] sm:$0xff] (!%p140_p3), %vm189_vm0, %v4725_v0  ;;  %197 = vst.msk [vmem:[#allocation2 + $0x30] sm:$0xff] (!%p140_p3), %vm189_vm0, %v4725_v0 }
   0xa   : > { %198 = vst.msk [vmem:[#allocation2 + $0x38] sm:$0xff] (!%p140_p3), %vm189_vm0, %v4725_v0  ;;  %199 = vst.msk [vmem:[#allocation2 + $0x40] sm:$0xff] (!%p140_p3), %vm189_vm0, %v4725_v0 }
   0xb   : > { %201 = vst.msk [vmem:[#allocation2 + $0x50] sm:$0xff] (!%p140_p3), %vm189_vm0, %v4725_v0  ;;  %202 = vst.msk [vmem:[#allocation2 + $0x58] sm:$0xff] (!%p140_p3), %vm189_vm0, %v4725_v0 }
   0xc   : > { %203 = vst.msk [vmem:[#allocation2 + $0x60] sm:$0xff] (!%p140_p3), %vm189_vm0, %v4725_v0  ;;  %204 = vst.msk [vmem:[#allocation2 + $0x68] sm:$0xff] (!%p140_p3), %vm189_vm0, %v4725_v0 }
   0xd   : > { %206 = vst.msk [vmem:[#allocation2 + $0x78] sm:$0xff] (!%p140_p3), %vm189_vm0, %v4725_v0  ;;  %207 = vst.msk [vmem:[#allocation2 + $0x80] sm:$0xff] (!%p140_p3), %vm189_vm0, %v4725_v0 }
   0xe   : > { %208 = vst.msk [vmem:[#allocation2 + $0x88] sm:$0xff] %vm189_vm0, %v4725_v0  ;;  %209 = vst.msk [vmem:[#allocation2 + $0x90] sm:$0xff] %vm189_vm0, %v4725_v0  ;;  %s6527_s9 = smov (!%p170_p4, %s4715_s9), 1 }
   0xf   : > { %211 = vst.msk [vmem:[#allocation2 + $0xa0] sm:$0xff] %vm189_vm0, %v4725_v0  ;;  %212 = vst.msk [vmem:[#allocation2 + $0xa8] sm:$0xff] %vm189_vm0, %v4725_v0  ;;  %s4673_s13 = smul.u32 1320, %s6527_s9  ;;  %s4672_s19 = sshll.u32 %s6527_s9, 10 }
  0x10   : > { %213 = vst.msk [vmem:[#allocation2 + $0xb0] sm:$0xff] %vm189_vm0, %v4725_v0  ;;  %214 = vst.msk [vmem:[#allocation2 + $0xb8] sm:$0xff] %vm189_vm0, %v4725_v0  ;;  %s5656_s22 = scalar_lea.vmem %s6521_s2, %s4672_s19 }
  0x11   : > { %216 = vst.msk [vmem:[#allocation2 + $0xc8] sm:$0xff] %vm189_vm0, %v4725_v0  ;;  %217 = vst.msk [vmem:[#allocation2 + $0xd0] sm:$0xff] %vm189_vm0, %v4725_v0  ;;  %s5121_s16 = scalar_lea.vmem %s6519_s0, %s4673_s13 }
  0x12   : > { %218 = vst.msk [vmem:[#allocation2 + $0xd8] sm:$0xff] %vm189_vm0, %v4725_v0  ;;  %219 = vst.msk [vmem:[#allocation2 + $0xe0] sm:$0xff] %vm189_vm0, %v4725_v0  ;;  %v366_v1 = vld [vmem:[%s5121_s16] sm:$0xff]  ;;  %v367_v2 = vld [vmem:[%s5121_s16 + $0x8] sm:$0xff] }
  0x13   : > { %221 = vst.msk [vmem:[#allocation2 + $0xf0] sm:$0xff] %vm189_vm0, %v4725_v0  ;;  %222 = vst.msk [vmem:[#allocation2 + $0xf8] sm:$0xff] %vm189_vm0, %v4725_v0  ;;  %v368_v3 = vld [vmem:[%s5121_s16 + $0x10] sm:$0xff]  ;;  %v369_v4 = vld [vmem:[%s5121_s16 + $0x18] sm:$0xff] }
  0x14   : > { %223 = vst.msk [vmem:[#allocation2 + $0x100] sm:$0xff] %vm189_vm0, %v4725_v0  ;;  %224 = vst.msk [vmem:[#allocation2 + $0x108] sm:$0xff] %vm189_vm0, %v4725_v0  ;;  %v370_v5 = vld [vmem:[%s5121_s16 + $0x20] sm:$0x1]  ;;  %v371_v6 = vld [vmem:[%s5121_s16 + $0x28] sm:$0xff] }
  0x15   : > { %226 = vst.msk [vmem:[#allocation2 + $0x118] sm:$0xff] %vm189_vm0, %v4725_v0  ;;  %227 = vst.msk [vmem:[#allocation2 + $0x120] sm:$0xff] %vm189_vm0, %v4725_v0  ;;  %v372_v7 = vld [vmem:[%s5121_s16 + $0x30] sm:$0xff]  ;;  %v373_v8 = vld [vmem:[%s5121_s16 + $0x38] sm:$0xff] }
  0x16   : > { %228 = vst.msk [vmem:[#allocation2 + $0x128] sm:$0xff] %vm189_vm0, %v4725_v0  ;;  %229 = vst.msk [vmem:[#allocation2 + $0x130] sm:$0xff] %vm189_vm0, %v4725_v0  ;;  %v374_v9 = vld [vmem:[%s5121_s16 + $0x40] sm:$0xff]  ;;  %v375_v10 = vld [vmem:[%s5121_s16 + $0x48] sm:$0x1] }
  0x17   : > { %231 = vst.msk [vmem:[#allocation2 + $0x140] sm:$0xff] %vm189_vm0, %v4725_v0  ;;  %232 = vst.msk [vmem:[#allocation2 + $0x148] sm:$0xff] %vm189_vm0, %v4725_v0  ;;  %v376_v11 = vld [vmem:[%s5121_s16 + $0x50] sm:$0xff]  ;;  %v377_v12 = vld [vmem:[%s5121_s16 + $0x58] sm:$0xff] }
  0x18   : > { %233 = vst.msk [vmem:[#allocation2 + $0x150] sm:$0xff] %vm189_vm0, %v4725_v0  ;;  %234 = vst.msk [vmem:[#allocation2 + $0x158] sm:$0xff] %vm189_vm0, %v4725_v0  ;;  %v378_v13 = vld [vmem:[%s5121_s16 + $0x60] sm:$0xff]  ;;  %v379_v14 = vld [vmem:[%s5121_s16 + $0x68] sm:$0xff] }
  0x19   : > { %236 = vst.msk [vmem:[#allocation2 + $0x168] sm:$0xff] %vm189_vm0, %v4725_v0  ;;  %237 = vst.msk [vmem:[#allocation2 + $0x170] sm:$0xff] %vm189_vm0, %v4725_v0  ;;  %v380_v15 = vld [vmem:[%s5121_s16 + $0x70] sm:$0x1]  ;;  %v381_v16 = vld [vmem:[%s5121_s16 + $0x78] sm:$0xff] }
  0x1a   : > { %238 = vst.msk [vmem:[#allocation2 + $0x178] sm:$0xff] %vm189_vm0, %v4725_v0  ;;  %239 = vst.msk [vmem:[#allocation2 + $0x180] sm:$0xff] %vm189_vm0, %v4725_v0  ;;  %v382_v17 = vld [vmem:[%s5121_s16 + $0x80] sm:$0xff]  ;;  %v383_v18 = vld [vmem:[%s5121_s16 + $0x88] sm:$0xff] }
  0x1b   : > { %241 = vst.msk [vmem:[#allocation2 + $0x190] sm:$0xff] %vm189_vm0, %v4725_v0  ;;  %242 = vst.msk [vmem:[#allocation2 + $0x198] sm:$0xff] %vm189_vm0, %v4725_v0  ;;  %v384_v19 = vld [vmem:[%s5121_s16 + $0x90] sm:$0xff]  ;;  %v385_v20 = vld [vmem:[%s5121_s16 + $0x98] sm:$0x1] }
  0x1c   : > { %243 = vst.msk [vmem:[#allocation2 + $0x1a0] sm:$0xff] %vm189_vm0, %v4725_v0  ;;  %244 = vst.msk [vmem:[#allocation2 + $0x1a8] sm:$0xff] %vm189_vm0, %v4725_v0  ;;  %v386_v21 = vld [vmem:[%s5121_s16 + $0xa0] sm:$0xff]  ;;  %v387_v22 = vld [vmem:[%s5121_s16 + $0xa8] sm:$0xff] }
  0x1d   : > { %246 = vst.msk [vmem:[#allocation2 + $0x1b8] sm:$0xff] %vm189_vm0, %v4725_v0  ;;  %247 = vst.msk [vmem:[#allocation2 + $0x1c0] sm:$0xff] %vm189_vm0, %v4725_v0  ;;  %v388_v23 = vld [vmem:[%s5121_s16 + $0xb0] sm:$0xff]  ;;  %v389_v24 = vld [vmem:[%s5121_s16 + $0xb8] sm:$0xff] }
  0x1e   : > { %248 = vst.msk [vmem:[#allocation2 + $0x1c8] sm:$0xff] %vm189_vm0, %v4725_v0  ;;  %249 = vst.msk [vmem:[#allocation2 + $0x1d0] sm:$0xff] %vm189_vm0, %v4725_v0  ;;  %v390_v25 = vld [vmem:[%s5121_s16 + $0xc0] sm:$0x1]  ;;  %v391_v26 = vld [vmem:[%s5121_s16 + $0xc8] sm:$0xff] }
  0x1f   : > { %251 = vst.msk [vmem:[#allocation2 + $0x1e0] sm:$0xff] %vm189_vm0, %v4725_v0  ;;  %252 = vst.msk [vmem:[#allocation2 + $0x1e8] sm:$0xff] %vm189_vm0, %v4725_v0  ;;  %v392_v27 = vld [vmem:[%s5121_s16 + $0xd0] sm:$0xff]  ;;  %v393_v28 = vld [vmem:[%s5121_s16 + $0xd8] sm:$0xff] }
  0x20   : > { %253 = vst.msk [vmem:[#allocation2 + $0x1f0] sm:$0xff] %vm189_vm0, %v4725_v0  ;;  %254 = vst.msk [vmem:[#allocation2 + $0x1f8] sm:$0xff] %vm189_vm0, %v4725_v0  ;;  %v394_v29 = vld [vmem:[%s5121_s16 + $0xe0] sm:$0xff]  ;;  %v395_v30 = vld [vmem:[%s5121_s16 + $0xe8] sm:$0x1] }
  0x21   : > { %256 = vst.msk [vmem:[#allocation2 + $0x208] sm:$0xff] %vm189_vm0, %v4725_v0  ;;  %257 = vst.msk [vmem:[#allocation2 + $0x210] sm:$0xff] %vm189_vm0, %v4725_v0  ;;  %v396_v31 = vld [vmem:[%s5121_s16 + $0xf0] sm:$0xff]  ;;  %v397_v32 = vld [vmem:[%s5121_s16 + $0xf8] sm:$0xff] }
  0x22   : > { %258 = vst.msk [vmem:[#allocation2 + $0x218] sm:$0xff] %vm189_vm0, %v4725_v0  ;;  %259 = vst.msk [vmem:[#allocation2 + $0x220] sm:$0xff] %vm189_vm0, %v4725_v0  ;;  %v398_v33 = vld [vmem:[%s5121_s16 + $0x100] sm:$0xff]  ;;  %v399_v34 = vld [vmem:[%s5121_s16 + $0x108] sm:$0xff] }
  0x23   : > { %261 = vst.msk [vmem:[#allocation2 + $0x230] sm:$0xff] %vm189_vm0, %v4725_v0  ;;  %262 = vst.msk [vmem:[#allocation2 + $0x238] sm:$0xff] %vm189_vm0, %v4725_v0  ;;  %v400_v35 = vld [vmem:[%s5121_s16 + $0x110] sm:$0x1]  ;;  %v401_v36 = vld [vmem:[%s5121_s16 + $0x118] sm:$0xff] }
  0x24   : > { %263 = vst.msk [vmem:[#allocation2 + $0x240] sm:$0xff] %vm189_vm0, %v4725_v0  ;;  %264 = vst.msk [vmem:[#allocation2 + $0x248] sm:$0xff] %vm189_vm0, %v4725_v0  ;;  %v402_v37 = vld [vmem:[%s5121_s16 + $0x120] sm:$0xff]  ;;  %v403_v38 = vld [vmem:[%s5121_s16 + $0x128] sm:$0xff] }
  0x25   : > { %266 = vst.msk [vmem:[#allocation2 + $0x258] sm:$0xff] %vm189_vm0, %v4725_v0  ;;  %267 = vst.msk [vmem:[#allocation2 + $0x260] sm:$0xff] %vm189_vm0, %v4725_v0  ;;  %v404_v39 = vld [vmem:[%s5121_s16 + $0x130] sm:$0xff]  ;;  %v405_v40 = vld [vmem:[%s5121_s16 + $0x138] sm:$0x1] }
  0x26   : > { %268 = vst.msk [vmem:[#allocation2 + $0x268] sm:$0xff] %vm189_vm0, %v4725_v0  ;;  %269 = vst.msk [vmem:[#allocation2 + $0x270] sm:$0xff] %vm189_vm0, %v4725_v0  ;;  %v406_v41 = vld [vmem:[%s5121_s16 + $0x140] sm:$0xff]  ;;  %v407_v42 = vld [vmem:[%s5121_s16 + $0x148] sm:$0xff] }
  0x27   : > { %271 = vst.msk [vmem:[#allocation2 + $0x280] sm:$0xff] %vm189_vm0, %v4725_v0  ;;  %272 = vst.msk [vmem:[#allocation2 + $0x288] sm:$0xff] %vm189_vm0, %v4725_v0  ;;  %v408_v43 = vld [vmem:[%s5121_s16 + $0x150] sm:$0xff]  ;;  %v409_v44 = vld [vmem:[%s5121_s16 + $0x158] sm:$0xff] }
  0x28   : > { %273 = vst.msk [vmem:[#allocation2 + $0x290] sm:$0xff] %vm189_vm0, %v4725_v0  ;;  %274 = vst.msk [vmem:[#allocation2 + $0x298] sm:$0xff] %vm189_vm0, %v4725_v0  ;;  %v410_v45 = vld [vmem:[%s5121_s16 + $0x160] sm:$0x1]  ;;  %v411_v46 = vld [vmem:[%s5121_s16 + $0x168] sm:$0xff] }
  0x29   : > { %276 = vst.msk [vmem:[#allocation2 + $0x2a8] sm:$0xff] %vm189_vm0, %v4725_v0  ;;  %277 = vst.msk [vmem:[#allocation2 + $0x2b0] sm:$0xff] %vm189_vm0, %v4725_v0  ;;  %v412_v47 = vld [vmem:[%s5121_s16 + $0x170] sm:$0xff]  ;;  %v413_v48 = vld [vmem:[%s5121_s16 + $0x178] sm:$0xff] }
  0x2a   : > { %278 = vst.msk [vmem:[#allocation2 + $0x2b8] sm:$0xff] %vm189_vm0, %v4725_v0  ;;  %279 = vst.msk [vmem:[#allocation2 + $0x2c0] sm:$0xff] %vm189_vm0, %v4725_v0  ;;  %v414_v49 = vld [vmem:[%s5121_s16 + $0x180] sm:$0xff]  ;;  %v415_v50 = vld [vmem:[%s5121_s16 + $0x188] sm:$0x1] }
  0x2b   : > { %281 = vst.msk [vmem:[#allocation2 + $0x2d0] sm:$0xff] %vm189_vm0, %v4725_v0  ;;  %282 = vst.msk [vmem:[#allocation2 + $0x2d8] sm:$0xff] %vm189_vm0, %v4725_v0  ;;  %v416_v51 = vld [vmem:[%s5121_s16 + $0x190] sm:$0xff]  ;;  %v417_v52 = vld [vmem:[%s5121_s16 + $0x198] sm:$0xff] }
  0x2c   : > { %283 = vst.msk [vmem:[#allocation2 + $0x2e0] sm:$0xff] %vm189_vm0, %v4725_v0  ;;  %284 = vst.msk [vmem:[#allocation2 + $0x2e8] sm:$0xff] %vm189_vm0, %v4725_v0  ;;  %v418_v53 = vld [vmem:[%s5121_s16 + $0x1a0] sm:$0xff]  ;;  %v419_v54 = vld [vmem:[%s5121_s16 + $0x1a8] sm:$0xff] }
  0x2d   : > { %286 = vst.msk [vmem:[#allocation2 + $0x2f8] sm:$0xff] %vm189_vm0, %v4725_v0  ;;  %287 = vst.msk [vmem:[#allocation2 + $0x300] sm:$0xff] %vm189_vm0, %v4725_v0  ;;  %v420_v55 = vld [vmem:[%s5121_s16 + $0x1b0] sm:$0x1]  ;;  %v421_v56 = vld [vmem:[%s5121_s16 + $0x1b8] sm:$0xff] }
  0x2e   : > { %288 = vst.msk [vmem:[#allocation2 + $0x308] sm:$0xff] %vm189_vm0, %v4725_v0  ;;  %289 = vst.msk [vmem:[#allocation2 + $0x310] sm:$0xff] %vm189_vm0, %v4725_v0  ;;  %v422_v57 = vld [vmem:[%s5121_s16 + $0x1c0] sm:$0xff]  ;;  %v423_v58 = vld [vmem:[%s5121_s16 + $0x1c8] sm:$0xff] }
  0x2f   : > { %291 = vst.msk [vmem:[#allocation2 + $0x320] sm:$0xff] %vm189_vm0, %v4725_v0  ;;  %292 = vst.msk [vmem:[#allocation2 + $0x328] sm:$0xff] %vm189_vm0, %v4725_v0  ;;  %v424_v59 = vld [vmem:[%s5121_s16 + $0x1d0] sm:$0xff]  ;;  %v425_v60 = vld [vmem:[%s5121_s16 + $0x1d8] sm:$0x1] }
  0x30   : > { %293 = vst.msk [vmem:[#allocation2 + $0x330] sm:$0xff] %vm189_vm0, %v4725_v0  ;;  %294 = vst.msk [vmem:[#allocation2 + $0x338] sm:$0xff] %vm189_vm0, %v4725_v0  ;;  %v426_v61 = vld [vmem:[%s5121_s16 + $0x1e0] sm:$0xff]  ;;  %v427_v62 = vld [vmem:[%s5121_s16 + $0x1e8] sm:$0xff] }
  0x31   : > { %296 = vst.msk [vmem:[#allocation2 + $0x348] sm:$0xff] %vm189_vm0, %v4725_v0  ;;  %297 = vst.msk [vmem:[#allocation2 + $0x350] sm:$0xff] %vm189_vm0, %v4725_v0  ;;  %v428_v63 = vld [vmem:[%s5121_s16 + $0x1f0] sm:$0xff] }
  0x32   : > { %298 = vst.msk [vmem:[#allocation2 + $0x358] sm:$0xff] %vm189_vm0, %v4725_v0  ;;  %299 = vst.msk [vmem:[#allocation2 + $0x360] sm:$0xff] %vm189_vm0, %v4725_v0 }
  0x33   : > { %301 = vst.msk [vmem:[#allocation2 + $0x370] sm:$0xff] %vm189_vm0, %v4725_v0  ;;  %302 = vst.msk [vmem:[#allocation2 + $0x378] sm:$0xff] %vm189_vm0, %v4725_v0 }
  0x34   : > { %303 = vst.msk [vmem:[#allocation2 + $0x380] sm:$0xff] %vm189_vm0, %v4725_v0  ;;  %304 = vst.msk [vmem:[#allocation2 + $0x388] sm:$0xff] %vm189_vm0, %v4725_v0 }
  0x35   : > { %306 = vst.msk [vmem:[#allocation2 + $0x398] sm:$0xff] %vm189_vm0, %v4725_v0  ;;  %307 = vst.msk [vmem:[#allocation2 + $0x3a0] sm:$0xff] %vm189_vm0, %v4725_v0 }
  0x36   : > { %308 = vst.msk [vmem:[#allocation2 + $0x3a8] sm:$0xff] %vm189_vm0, %v4725_v0  ;;  %309 = vst.msk [vmem:[#allocation2 + $0x3b0] sm:$0xff] %vm189_vm0, %v4725_v0 }
  0x37   : > { %311 = vst.msk [vmem:[#allocation2 + $0x3c0] sm:$0xff] %vm189_vm0, %v4725_v0  ;;  %312 = vst.msk [vmem:[#allocation2 + $0x3c8] sm:$0xff] %vm189_vm0, %v4725_v0 }
  0x38   : > { %313 = vst.msk [vmem:[#allocation2 + $0x3d0] sm:$0xff] %vm189_vm0, %v4725_v0  ;;  %314 = vst.msk [vmem:[#allocation2 + $0x3d8] sm:$0xff] %vm189_vm0, %v4725_v0 }
  0x39   : > { %316 = vst.msk [vmem:[#allocation2 + $0x3e8] sm:$0xff] %vm189_vm0, %v4725_v0  ;;  %317 = vst.msk [vmem:[#allocation2 + $0x3f0] sm:$0xff] %vm189_vm0, %v4725_v0 }
  0x3a   : > { %318 = vst.msk [vmem:[#allocation2 + $0x3f8] sm:$0xff] %vm189_vm0, %v4725_v0  ;;  %319 = vst.msk [vmem:[#allocation2 + $0x400] sm:$0xff] %vm189_vm0, %v4725_v0 }
  0x3b   : > { %321 = vst.msk [vmem:[#allocation2 + $0x410] sm:$0xff] %vm189_vm0, %v4725_v0  ;;  %322 = vst.msk [vmem:[#allocation2 + $0x418] sm:$0xff] %vm189_vm0, %v4725_v0 }
  0x3c   : > { %323 = vst.msk [vmem:[#allocation2 + $0x420] sm:$0xff] %vm189_vm0, %v4725_v0  ;;  %324 = vst.msk [vmem:[#allocation2 + $0x428] sm:$0xff] %vm189_vm0, %v4725_v0 }
  0x3d   : > { %326 = vst.msk [vmem:[#allocation2 + $0x438] sm:$0xff] %vm189_vm0, %v4725_v0  ;;  %327 = vst.msk [vmem:[#allocation2 + $0x440] sm:$0xff] %vm189_vm0, %v4725_v0 }
  0x3e   : > { %328 = vst.msk [vmem:[#allocation2 + $0x448] sm:$0xff] %vm189_vm0, %v4725_v0  ;;  %329 = vst.msk [vmem:[#allocation2 + $0x450] sm:$0xff] %vm189_vm0, %v4725_v0 }
  0x3f   : > { %331 = vst.msk [vmem:[#allocation2 + $0x460] sm:$0xff] %vm189_vm0, %v4725_v0  ;;  %332 = vst.msk [vmem:[#allocation2 + $0x468] sm:$0xff] %vm189_vm0, %v4725_v0 }
  0x40   : > { %333 = vst.msk [vmem:[#allocation2 + $0x470] sm:$0xff] %vm189_vm0, %v4725_v0  ;;  %334 = vst.msk [vmem:[#allocation2 + $0x478] sm:$0xff] %vm189_vm0, %v4725_v0 }
  0x41   : > { %336 = vst.msk [vmem:[#allocation2 + $0x488] sm:$0xff] %vm189_vm0, %v4725_v0  ;;  %337 = vst.msk [vmem:[#allocation2 + $0x490] sm:$0xff] %vm189_vm0, %v4725_v0 }
  0x42   : > { %338 = vst.msk [vmem:[#allocation2 + $0x498] sm:$0xff] %vm189_vm0, %v4725_v0  ;;  %339 = vst.msk [vmem:[#allocation2 + $0x4a0] sm:$0xff] %vm189_vm0, %v4725_v0 }
  0x43   : > { %341 = vst.msk [vmem:[#allocation2 + $0x4b0] sm:$0xff] %vm189_vm0, %v4725_v0  ;;  %342 = vst.msk [vmem:[#allocation2 + $0x4b8] sm:$0xff] %vm189_vm0, %v4725_v0 }
  0x44   : > { %343 = vst.msk [vmem:[#allocation2 + $0x4c0] sm:$0xff] %vm189_vm0, %v4725_v0  ;;  %344 = vst.msk [vmem:[#allocation2 + $0x4c8] sm:$0xff] %vm189_vm0, %v4725_v0 }
  0x45   : > { %346 = vst.msk [vmem:[#allocation2 + $0x4d8] sm:$0xff] %vm189_vm0, %v4725_v0  ;;  %347 = vst.msk [vmem:[#allocation2 + $0x4e0] sm:$0xff] %vm189_vm0, %v4725_v0 }
  0x46   : > { %348 = vst.msk [vmem:[#allocation2 + $0x4e8] sm:$0xff] %vm189_vm0, %v4725_v0  ;;  %349 = vst.msk [vmem:[#allocation2 + $0x4f0] sm:$0xff] %vm189_vm0, %v4725_v0 }
  0x47   : > { %351 = vst.msk [vmem:[#allocation2 + $0x500] sm:$0xff] %vm189_vm0, %v4725_v0  ;;  %352 = vst.msk [vmem:[#allocation2 + $0x508] sm:$0xff] %vm189_vm0, %v4725_v0 }
  0x48   : > { %353 = vst.msk [vmem:[#allocation2 + $0x510] sm:$0xff] %vm189_vm0, %v4725_v0  ;;  %354 = vst.msk [vmem:[#allocation2 + $0x518] sm:$0xff] %vm189_vm0, %v4725_v0 }
  0x49   : > { %356 = vst.msk [vmem:[#allocation2 + $0x528] sm:$0xff] %vm189_vm0, %v4725_v0  ;;  %357 = vst.msk [vmem:[#allocation2 + $0x530] sm:$0xff] %vm189_vm0, %v4725_v0 }
  0x4a   : > { %358 = vst.msk [vmem:[#allocation2 + $0x538] sm:$0xff] %vm189_vm0, %v4725_v0  ;;  %359 = vst.msk [vmem:[#allocation2 + $0x540] sm:$0xff] %vm189_vm0, %v4725_v0 }
  0x4b   : > { %361 = vst.msk [vmem:[#allocation2 + $0x550] sm:$0xff] %vm189_vm0, %v4725_v0  ;;  %362 = vst.msk [vmem:[#allocation2 + $0x558] sm:$0xff] %vm189_vm0, %v4725_v0 }
  0x4c   : > { %363 = vst.msk [vmem:[#allocation2 + $0x560] sm:$0xff] %vm189_vm0, %v4725_v0  ;;  %364 = vst.msk [vmem:[#allocation2 + $0x568] sm:$0xff] %vm189_vm0, %v4725_v0 }
  0x4d   : > { %195 = vst.msk [vmem:[#allocation2 + $0x20] sm:$0x7] %vm194_vm1, %v4725_v0  ;;  %200 = vst.msk [vmem:[#allocation2 + $0x48] sm:$0x7] %vm194_vm1, %v4725_v0 }
  0x4e   : > { %205 = vst.msk [vmem:[#allocation2 + $0x70] sm:$0x7] %vm194_vm1, %v4725_v0  ;;  %210 = vst.msk [vmem:[#allocation2 + $0x98] sm:$0x7] %vm194_vm1, %v4725_v0 }
  0x4f   : > { %215 = vst.msk [vmem:[#allocation2 + $0xc0] sm:$0x7] %vm194_vm1, %v4725_v0  ;;  %220 = vst.msk [vmem:[#allocation2 + $0xe8] sm:$0x7] %vm194_vm1, %v4725_v0 }
  0x50   : > { %225 = vst.msk [vmem:[#allocation2 + $0x110] sm:$0x7] %vm194_vm1, %v4725_v0  ;;  %230 = vst.msk [vmem:[#allocation2 + $0x138] sm:$0x7] %vm194_vm1, %v4725_v0 }
  0x51   : > { %235 = vst.msk [vmem:[#allocation2 + $0x160] sm:$0x7] %vm194_vm1, %v4725_v0  ;;  %240 = vst.msk [vmem:[#allocation2 + $0x188] sm:$0x7] %vm194_vm1, %v4725_v0 }
  0x52   : > { %245 = vst.msk [vmem:[#allocation2 + $0x1b0] sm:$0x7] %vm194_vm1, %v4725_v0  ;;  %250 = vst.msk [vmem:[#allocation2 + $0x1d8] sm:$0x7] %vm194_vm1, %v4725_v0 }
  0x53   : > { %255 = vst.msk [vmem:[#allocation2 + $0x200] sm:$0x7] %vm194_vm1, %v4725_v0  ;;  %260 = vst.msk [vmem:[#allocation2 + $0x228] sm:$0x7] %vm194_vm1, %v4725_v0 }
  0x54   : > { %265 = vst.msk [vmem:[#allocation2 + $0x250] sm:$0x7] %vm194_vm1, %v4725_v0  ;;  %270 = vst.msk [vmem:[#allocation2 + $0x278] sm:$0x7] %vm194_vm1, %v4725_v0 }
  0x55   : > { %275 = vst.msk [vmem:[#allocation2 + $0x2a0] sm:$0x7] %vm194_vm1, %v4725_v0  ;;  %280 = vst.msk [vmem:[#allocation2 + $0x2c8] sm:$0x7] %vm194_vm1, %v4725_v0 }
  0x56   : > { %285 = vst.msk [vmem:[#allocation2 + $0x2f0] sm:$0x7] %vm194_vm1, %v4725_v0  ;;  %290 = vst.msk [vmem:[#allocation2 + $0x318] sm:$0x7] %vm194_vm1, %v4725_v0 }
  0x57   : > { %295 = vst.msk [vmem:[#allocation2 + $0x340] sm:$0x7] %vm194_vm1, %v4725_v0  ;;  %300 = vst.msk [vmem:[#allocation2 + $0x368] sm:$0x7] %vm194_vm1, %v4725_v0 }
  0x58   : > { %305 = vst.msk [vmem:[#allocation2 + $0x390] sm:$0x7] %vm194_vm1, %v4725_v0  ;;  %310 = vst.msk [vmem:[#allocation2 + $0x3b8] sm:$0x7] %vm194_vm1, %v4725_v0 }
  0x59   : > { %315 = vst.msk [vmem:[#allocation2 + $0x3e0] sm:$0x7] %vm194_vm1, %v4725_v0  ;;  %320 = vst.msk [vmem:[#allocation2 + $0x408] sm:$0x7] %vm194_vm1, %v4725_v0 }
  0x5a   : > { %325 = vst.msk [vmem:[#allocation2 + $0x430] sm:$0x7] %vm194_vm1, %v4725_v0  ;;  %330 = vst.msk [vmem:[#allocation2 + $0x458] sm:$0x7] %vm194_vm1, %v4725_v0 }
  0x5b   : > { %335 = vst.msk [vmem:[#allocation2 + $0x480] sm:$0x7] %vm194_vm1, %v4725_v0  ;;  %340 = vst.msk [vmem:[#allocation2 + $0x4a8] sm:$0x7] %vm194_vm1, %v4725_v0 }
  0x5c   : > { %345 = vst.msk [vmem:[#allocation2 + $0x4d0] sm:$0x7] %vm194_vm1, %v4725_v0  ;;  %350 = vst.msk [vmem:[#allocation2 + $0x4f8] sm:$0x7] %vm194_vm1, %v4725_v0 }
  0x5d   : > { %355 = vst.msk [vmem:[#allocation2 + $0x520] sm:$0x7] %vm194_vm1, %v4725_v0  ;;  %360 = vst.msk [vmem:[#allocation2 + $0x548] sm:$0x7] %vm194_vm1, %v4725_v0 }
  0x5e   : > { %365 = vst.msk [vmem:[#allocation2 + $0x570] sm:$0x7] %vm194_vm1, %v4725_v0  ;;  %v429_v0 = vld [vmem:[%s5121_s16 + $0x1f8] sm:$0xff] }
  0x5f   : > { %532 = vst.msk [vmem:[#allocation2 + $0x29] sm:$0xff] %vm189_vm0, %v366_v1  ;;  %533 = vst.msk [vmem:[#allocation2 + $0x31] sm:$0xff] %vm189_vm0, %v367_v2  ;;  %v430_v1 = vld [vmem:[%s5121_s16 + $0x200] sm:$0x1]  ;;  %v431_v2 = vld [vmem:[%s5121_s16 + $0x208] sm:$0xff] }
  0x60   : > { %534 = vst.msk [vmem:[#allocation2 + $0x39] sm:$0xff] %vm189_vm0, %v368_v3  ;;  %535 = vst.msk [vmem:[#allocation2 + $0x41] sm:$0xff] %vm189_vm0, %v369_v4  ;;  %v432_v3 = vld [vmem:[%s5121_s16 + $0x210] sm:$0xff]  ;;  %v433_v4 = vld [vmem:[%s5121_s16 + $0x218] sm:$0xff] }
  0x61   : > { %537 = vst.msk [vmem:[#allocation2 + $0x49] sm:$0x1] %vm536_vm2, %v370_v5  ;;  %542 = vst.msk [vmem:[#allocation2 + $0x71] sm:$0x1] %vm536_vm2, %v375_v10  ;;  %v434_v5 = vld [vmem:[%s5121_s16 + $0x220] sm:$0xff]  ;;  %v439_v10 = vld [vmem:[%s5121_s16 + $0x248] sm:$0xff] }
  0x62   : > { %538 = vst.msk [vmem:[#allocation2 + $0x51] sm:$0xff] %vm189_vm0, %v371_v6  ;;  %539 = vst.msk [vmem:[#allocation2 + $0x59] sm:$0xff] %vm189_vm0, %v372_v7  ;;  %v435_v6 = vld [vmem:[%s5121_s16 + $0x228] sm:$0x1]  ;;  %v436_v7 = vld [vmem:[%s5121_s16 + $0x230] sm:$0xff] }
  0x63   : > { %540 = vst.msk [vmem:[#allocation2 + $0x61] sm:$0xff] %vm189_vm0, %v373_v8  ;;  %541 = vst.msk [vmem:[#allocation2 + $0x69] sm:$0xff] %vm189_vm0, %v374_v9  ;;  %v437_v8 = vld [vmem:[%s5121_s16 + $0x238] sm:$0xff]  ;;  %v438_v9 = vld [vmem:[%s5121_s16 + $0x240] sm:$0xff] }
  0x64   : > { %543 = vst.msk [vmem:[#allocation2 + $0x79] sm:$0xff] %vm189_vm0, %v376_v11  ;;  %544 = vst.msk [vmem:[#allocation2 + $0x81] sm:$0xff] %vm189_vm0, %v377_v12  ;;  %v440_v11 = vld [vmem:[%s5121_s16 + $0x250] sm:$0x1]  ;;  %v441_v12 = vld [vmem:[%s5121_s16 + $0x258] sm:$0xff] }
  0x65   : > { %545 = vst.msk [vmem:[#allocation2 + $0x89] sm:$0xff] %vm189_vm0, %v378_v13  ;;  %546 = vst.msk [vmem:[#allocation2 + $0x91] sm:$0xff] %vm189_vm0, %v379_v14  ;;  %v442_v13 = vld [vmem:[%s5121_s16 + $0x260] sm:$0xff]  ;;  %v443_v14 = vld [vmem:[%s5121_s16 + $0x268] sm:$0xff] }
  0x66   : > { %547 = vst.msk [vmem:[#allocation2 + $0x99] sm:$0x1] %vm536_vm2, %v380_v15  ;;  %552 = vst.msk [vmem:[#allocation2 + $0xc1] sm:$0x1] %vm536_vm2, %v385_v20  ;;  %v444_v15 = vld [vmem:[%s5121_s16 + $0x270] sm:$0xff]  ;;  %v449_v20 = vld [vmem:[%s5121_s16 + $0x298] sm:$0xff] }
  0x67   : > { %548 = vst.msk [vmem:[#allocation2 + $0xa1] sm:$0xff] %vm189_vm0, %v381_v16  ;;  %549 = vst.msk [vmem:[#allocation2 + $0xa9] sm:$0xff] %vm189_vm0, %v382_v17  ;;  %v445_v16 = vld [vmem:[%s5121_s16 + $0x278] sm:$0x1]  ;;  %v446_v17 = vld [vmem:[%s5121_s16 + $0x280] sm:$0xff] }
  0x68   : > { %550 = vst.msk [vmem:[#allocation2 + $0xb1] sm:$0xff] %vm189_vm0, %v383_v18  ;;  %551 = vst.msk [vmem:[#allocation2 + $0xb9] sm:$0xff] %vm189_vm0, %v384_v19  ;;  %v447_v18 = vld [vmem:[%s5121_s16 + $0x288] sm:$0xff]  ;;  %v448_v19 = vld [vmem:[%s5121_s16 + $0x290] sm:$0xff] }
  0x69   : > { %553 = vst.msk [vmem:[#allocation2 + $0xc9] sm:$0xff] %vm189_vm0, %v386_v21  ;;  %554 = vst.msk [vmem:[#allocation2 + $0xd1] sm:$0xff] %vm189_vm0, %v387_v22  ;;  %v450_v21 = vld [vmem:[%s5121_s16 + $0x2a0] sm:$0x1]  ;;  %v451_v22 = vld [vmem:[%s5121_s16 + $0x2a8] sm:$0xff] }
  0x6a   : > { %555 = vst.msk [vmem:[#allocation2 + $0xd9] sm:$0xff] %vm189_vm0, %v388_v23  ;;  %556 = vst.msk [vmem:[#allocation2 + $0xe1] sm:$0xff] %vm189_vm0, %v389_v24  ;;  %v452_v23 = vld [vmem:[%s5121_s16 + $0x2b0] sm:$0xff]  ;;  %v453_v24 = vld [vmem:[%s5121_s16 + $0x2b8] sm:$0xff] }
  0x6b   : > { %557 = vst.msk [vmem:[#allocation2 + $0xe9] sm:$0x1] %vm536_vm2, %v390_v25  ;;  %562 = vst.msk [vmem:[#allocation2 + $0x111] sm:$0x1] %vm536_vm2, %v395_v30  ;;  %v454_v25 = vld [vmem:[%s5121_s16 + $0x2c0] sm:$0xff]  ;;  %v459_v30 = vld [vmem:[%s5121_s16 + $0x2e8] sm:$0xff] }
  0x6c   : > { %558 = vst.msk [vmem:[#allocation2 + $0xf1] sm:$0xff] %vm189_vm0, %v391_v26  ;;  %559 = vst.msk [vmem:[#allocation2 + $0xf9] sm:$0xff] %vm189_vm0, %v392_v27  ;;  %v455_v26 = vld [vmem:[%s5121_s16 + $0x2c8] sm:$0x1]  ;;  %v456_v27 = vld [vmem:[%s5121_s16 + $0x2d0] sm:$0xff] }
  0x6d   : > { %560 = vst.msk [vmem:[#allocation2 + $0x101] sm:$0xff] %vm189_vm0, %v393_v28  ;;  %561 = vst.msk [vmem:[#allocation2 + $0x109] sm:$0xff] %vm189_vm0, %v394_v29  ;;  %v457_v28 = vld [vmem:[%s5121_s16 + $0x2d8] sm:$0xff]  ;;  %v458_v29 = vld [vmem:[%s5121_s16 + $0x2e0] sm:$0xff] }
  0x6e   : > { %563 = vst.msk [vmem:[#allocation2 + $0x119] sm:$0xff] %vm189_vm0, %v396_v31  ;;  %564 = vst.msk [vmem:[#allocation2 + $0x121] sm:$0xff] %vm189_vm0, %v397_v32  ;;  %v460_v31 = vld [vmem:[%s5121_s16 + $0x2f0] sm:$0x1]  ;;  %v461_v32 = vld [vmem:[%s5121_s16 + $0x2f8] sm:$0xff] }
  0x6f   : > { %565 = vst.msk [vmem:[#allocation2 + $0x129] sm:$0xff] %vm189_vm0, %v398_v33  ;;  %566 = vst.msk [vmem:[#allocation2 + $0x131] sm:$0xff] %vm189_vm0, %v399_v34  ;;  %v462_v33 = vld [vmem:[%s5121_s16 + $0x300] sm:$0xff]  ;;  %v463_v34 = vld [vmem:[%s5121_s16 + $0x308] sm:$0xff] }
  0x70   : > { %567 = vst.msk [vmem:[#allocation2 + $0x139] sm:$0x1] %vm536_vm2, %v400_v35  ;;  %572 = vst.msk [vmem:[#allocation2 + $0x161] sm:$0x1] %vm536_vm2, %v405_v40  ;;  %v464_v35 = vld [vmem:[%s5121_s16 + $0x310] sm:$0xff]  ;;  %v469_v40 = vld [vmem:[%s5121_s16 + $0x338] sm:$0xff] }
  0x71   : > { %568 = vst.msk [vmem:[#allocation2 + $0x141] sm:$0xff] %vm189_vm0, %v401_v36  ;;  %569 = vst.msk [vmem:[#allocation2 + $0x149] sm:$0xff] %vm189_vm0, %v402_v37  ;;  %v465_v36 = vld [vmem:[%s5121_s16 + $0x318] sm:$0x1]  ;;  %v466_v37 = vld [vmem:[%s5121_s16 + $0x320] sm:$0xff] }
  0x72   : > { %570 = vst.msk [vmem:[#allocation2 + $0x151] sm:$0xff] %vm189_vm0, %v403_v38  ;;  %571 = vst.msk [vmem:[#allocation2 + $0x159] sm:$0xff] %vm189_vm0, %v404_v39  ;;  %v467_v38 = vld [vmem:[%s5121_s16 + $0x328] sm:$0xff]  ;;  %v468_v39 = vld [vmem:[%s5121_s16 + $0x330] sm:$0xff] }
  0x73   : > { %573 = vst.msk [vmem:[#allocation2 + $0x169] sm:$0xff] %vm189_vm0, %v406_v41  ;;  %574 = vst.msk [vmem:[#allocation2 + $0x171] sm:$0xff] %vm189_vm0, %v407_v42  ;;  %v470_v41 = vld [vmem:[%s5121_s16 + $0x340] sm:$0x1]  ;;  %v471_v42 = vld [vmem:[%s5121_s16 + $0x348] sm:$0xff] }
  0x74   : > { %575 = vst.msk [vmem:[#allocation2 + $0x179] sm:$0xff] %vm189_vm0, %v408_v43  ;;  %576 = vst.msk [vmem:[#allocation2 + $0x181] sm:$0xff] %vm189_vm0, %v409_v44  ;;  %v472_v43 = vld [vmem:[%s5121_s16 + $0x350] sm:$0xff]  ;;  %v473_v44 = vld [vmem:[%s5121_s16 + $0x358] sm:$0xff] }
  0x75   : > { %577 = vst.msk [vmem:[#allocation2 + $0x189] sm:$0x1] %vm536_vm2, %v410_v45  ;;  %582 = vst.msk [vmem:[#allocation2 + $0x1b1] sm:$0x1] %vm536_vm2, %v415_v50  ;;  %v474_v45 = vld [vmem:[%s5121_s16 + $0x360] sm:$0xff]  ;;  %v479_v50 = vld [vmem:[%s5121_s16 + $0x388] sm:$0xff] }
  0x76   : > { %578 = vst.msk [vmem:[#allocation2 + $0x191] sm:$0xff] %vm189_vm0, %v411_v46  ;;  %579 = vst.msk [vmem:[#allocation2 + $0x199] sm:$0xff] %vm189_vm0, %v412_v47  ;;  %v475_v46 = vld [vmem:[%s5121_s16 + $0x368] sm:$0x1]  ;;  %v476_v47 = vld [vmem:[%s5121_s16 + $0x370] sm:$0xff] }
  0x77   : > { %580 = vst.msk [vmem:[#allocation2 + $0x1a1] sm:$0xff] %vm189_vm0, %v413_v48  ;;  %581 = vst.msk [vmem:[#allocation2 + $0x1a9] sm:$0xff] %vm189_vm0, %v414_v49  ;;  %v477_v48 = vld [vmem:[%s5121_s16 + $0x378] sm:$0xff]  ;;  %v478_v49 = vld [vmem:[%s5121_s16 + $0x380] sm:$0xff] }
  0x78   : > { %583 = vst.msk [vmem:[#allocation2 + $0x1b9] sm:$0xff] %vm189_vm0, %v416_v51  ;;  %584 = vst.msk [vmem:[#allocation2 + $0x1c1] sm:$0xff] %vm189_vm0, %v417_v52  ;;  %v480_v51 = vld [vmem:[%s5121_s16 + $0x390] sm:$0x1]  ;;  %v481_v52 = vld [vmem:[%s5121_s16 + $0x398] sm:$0xff] }
  0x79   : > { %585 = vst.msk [vmem:[#allocation2 + $0x1c9] sm:$0xff] %vm189_vm0, %v418_v53  ;;  %586 = vst.msk [vmem:[#allocation2 + $0x1d1] sm:$0xff] %vm189_vm0, %v419_v54  ;;  %v482_v53 = vld [vmem:[%s5121_s16 + $0x3a0] sm:$0xff]  ;;  %v483_v54 = vld [vmem:[%s5121_s16 + $0x3a8] sm:$0xff] }
  0x7a   : > { %587 = vst.msk [vmem:[#allocation2 + $0x1d9] sm:$0x1] %vm536_vm2, %v420_v55  ;;  %592 = vst.msk [vmem:[#allocation2 + $0x201] sm:$0x1] %vm536_vm2, %v425_v60  ;;  %v484_v55 = vld [vmem:[%s5121_s16 + $0x3b0] sm:$0xff]  ;;  %v489_v60 = vld [vmem:[%s5121_s16 + $0x3d8] sm:$0xff] }
  0x7b   : > { %588 = vst.msk [vmem:[#allocation2 + $0x1e1] sm:$0xff] %vm189_vm0, %v421_v56  ;;  %589 = vst.msk [vmem:[#allocation2 + $0x1e9] sm:$0xff] %vm189_vm0, %v422_v57  ;;  %v485_v56 = vld [vmem:[%s5121_s16 + $0x3b8] sm:$0x1]  ;;  %v486_v57 = vld [vmem:[%s5121_s16 + $0x3c0] sm:$0xff] }
  0x7c   : > { %590 = vst.msk [vmem:[#allocation2 + $0x1f1] sm:$0xff] %vm189_vm0, %v423_v58  ;;  %591 = vst.msk [vmem:[#allocation2 + $0x1f9] sm:$0xff] %vm189_vm0, %v424_v59  ;;  %v487_v58 = vld [vmem:[%s5121_s16 + $0x3c8] sm:$0xff]  ;;  %v488_v59 = vld [vmem:[%s5121_s16 + $0x3d0] sm:$0xff] }
  0x7d   : > { %593 = vst.msk [vmem:[#allocation2 + $0x209] sm:$0xff] %vm189_vm0, %v426_v61  ;;  %594 = vst.msk [vmem:[#allocation2 + $0x211] sm:$0xff] %vm189_vm0, %v427_v62  ;;  %v490_v61 = vld [vmem:[%s5121_s16 + $0x3e0] sm:$0x1]  ;;  %v491_v62 = vld [vmem:[%s5121_s16 + $0x3e8] sm:$0xff] }
  0x7e   : > { %595 = vst.msk [vmem:[#allocation2 + $0x219] sm:$0xff] %vm189_vm0, %v428_v63  ;;  %596 = vst.msk [vmem:[#allocation2 + $0x221] sm:$0xff] %vm189_vm0, %v429_v0  ;;  %v492_v63 = vld [vmem:[%s5121_s16 + $0x3f0] sm:$0xff]  ;;  %v493_v0 = vld [vmem:[%s5121_s16 + $0x3f8] sm:$0xff] }
  0x7f   : > { %597 = vst.msk [vmem:[#allocation2 + $0x229] sm:$0x1] %vm536_vm2, %v430_v1  ;;  %602 = vst.msk [vmem:[#allocation2 + $0x251] sm:$0x1] %vm536_vm2, %v435_v6  ;;  %v494_v1 = vld [vmem:[%s5121_s16 + $0x400] sm:$0xff]  ;;  %v499_v6 = vld [vmem:[%s5121_s16 + $0x428] sm:$0xff] }
  0x80   : > { %598 = vst.msk [vmem:[#allocation2 + $0x231] sm:$0xff] %vm189_vm0, %v431_v2  ;;  %599 = vst.msk [vmem:[#allocation2 + $0x239] sm:$0xff] %vm189_vm0, %v432_v3  ;;  %v495_v2 = vld [vmem:[%s5121_s16 + $0x408] sm:$0x1]  ;;  %v496_v3 = vld [vmem:[%s5121_s16 + $0x410] sm:$0xff] }
  0x81   : > { %600 = vst.msk [vmem:[#allocation2 + $0x241] sm:$0xff] %vm189_vm0, %v433_v4  ;;  %601 = vst.msk [vmem:[#allocation2 + $0x249] sm:$0xff] %vm189_vm0, %v434_v5  ;;  %v497_v4 = vld [vmem:[%s5121_s16 + $0x418] sm:$0xff]  ;;  %v498_v5 = vld [vmem:[%s5121_s16 + $0x420] sm:$0xff] }
  0x82   : > { %603 = vst.msk [vmem:[#allocation2 + $0x259] sm:$0xff] %vm189_vm0, %v436_v7  ;;  %604 = vst.msk [vmem:[#allocation2 + $0x261] sm:$0xff] %vm189_vm0, %v437_v8  ;;  %v500_v7 = vld [vmem:[%s5121_s16 + $0x430] sm:$0x1]  ;;  %v501_v8 = vld [vmem:[%s5121_s16 + $0x438] sm:$0xff] }
  0x83   : > { %605 = vst.msk [vmem:[#allocation2 + $0x269] sm:$0xff] %vm189_vm0, %v438_v9  ;;  %606 = vst.msk [vmem:[#allocation2 + $0x271] sm:$0xff] %vm189_vm0, %v439_v10  ;;  %v502_v9 = vld [vmem:[%s5121_s16 + $0x440] sm:$0xff]  ;;  %v503_v10 = vld [vmem:[%s5121_s16 + $0x448] sm:$0xff] }
  0x84   : > { %607 = vst.msk [vmem:[#allocation2 + $0x279] sm:$0x1] %vm536_vm2, %v440_v11  ;;  %612 = vst.msk [vmem:[#allocation2 + $0x2a1] sm:$0x1] %vm536_vm2, %v445_v16  ;;  %v504_v11 = vld [vmem:[%s5121_s16 + $0x450] sm:$0xff]  ;;  %v509_v16 = vld [vmem:[%s5121_s16 + $0x478] sm:$0xff] }
  0x85   : > { %608 = vst.msk [vmem:[#allocation2 + $0x281] sm:$0xff] %vm189_vm0, %v441_v12  ;;  %609 = vst.msk [vmem:[#allocation2 + $0x289] sm:$0xff] %vm189_vm0, %v442_v13  ;;  %v505_v12 = vld [vmem:[%s5121_s16 + $0x458] sm:$0x1]  ;;  %v506_v13 = vld [vmem:[%s5121_s16 + $0x460] sm:$0xff] }
  0x86   : > { %610 = vst.msk [vmem:[#allocation2 + $0x291] sm:$0xff] %vm189_vm0, %v443_v14  ;;  %611 = vst.msk [vmem:[#allocation2 + $0x299] sm:$0xff] %vm189_vm0, %v444_v15  ;;  %v507_v14 = vld [vmem:[%s5121_s16 + $0x468] sm:$0xff]  ;;  %v508_v15 = vld [vmem:[%s5121_s16 + $0x470] sm:$0xff] }
  0x87   : > { %613 = vst.msk [vmem:[#allocation2 + $0x2a9] sm:$0xff] %vm189_vm0, %v446_v17  ;;  %614 = vst.msk [vmem:[#allocation2 + $0x2b1] sm:$0xff] %vm189_vm0, %v447_v18  ;;  %v510_v17 = vld [vmem:[%s5121_s16 + $0x480] sm:$0x1]  ;;  %v511_v18 = vld [vmem:[%s5121_s16 + $0x488] sm:$0xff] }
  0x88   : > { %615 = vst.msk [vmem:[#allocation2 + $0x2b9] sm:$0xff] %vm189_vm0, %v448_v19  ;;  %616 = vst.msk [vmem:[#allocation2 + $0x2c1] sm:$0xff] %vm189_vm0, %v449_v20  ;;  %v512_v19 = vld [vmem:[%s5121_s16 + $0x490] sm:$0xff]  ;;  %v513_v20 = vld [vmem:[%s5121_s16 + $0x498] sm:$0xff] }
  0x89   : > { %617 = vst.msk [vmem:[#allocation2 + $0x2c9] sm:$0x1] %vm536_vm2, %v450_v21  ;;  %622 = vst.msk [vmem:[#allocation2 + $0x2f1] sm:$0x1] %vm536_vm2, %v455_v26  ;;  %v514_v21 = vld [vmem:[%s5121_s16 + $0x4a0] sm:$0xff]  ;;  %v519_v26 = vld [vmem:[%s5121_s16 + $0x4c8] sm:$0xff] }
  0x8a   : > { %618 = vst.msk [vmem:[#allocation2 + $0x2d1] sm:$0xff] %vm189_vm0, %v451_v22  ;;  %619 = vst.msk [vmem:[#allocation2 + $0x2d9] sm:$0xff] %vm189_vm0, %v452_v23  ;;  %v515_v22 = vld [vmem:[%s5121_s16 + $0x4a8] sm:$0x1]  ;;  %v516_v23 = vld [vmem:[%s5121_s16 + $0x4b0] sm:$0xff] }
  0x8b   : > { %620 = vst.msk [vmem:[#allocation2 + $0x2e1] sm:$0xff] %vm189_vm0, %v453_v24  ;;  %621 = vst.msk [vmem:[#allocation2 + $0x2e9] sm:$0xff] %vm189_vm0, %v454_v25  ;;  %v517_v24 = vld [vmem:[%s5121_s16 + $0x4b8] sm:$0xff]  ;;  %v518_v25 = vld [vmem:[%s5121_s16 + $0x4c0] sm:$0xff] }
  0x8c   : > { %623 = vst.msk [vmem:[#allocation2 + $0x2f9] sm:$0xff] %vm189_vm0, %v456_v27  ;;  %624 = vst.msk [vmem:[#allocation2 + $0x301] sm:$0xff] %vm189_vm0, %v457_v28  ;;  %v520_v27 = vld [vmem:[%s5121_s16 + $0x4d0] sm:$0x1]  ;;  %v521_v28 = vld [vmem:[%s5121_s16 + $0x4d8] sm:$0xff] }
  0x8d   : > { %625 = vst.msk [vmem:[#allocation2 + $0x309] sm:$0xff] %vm189_vm0, %v458_v29  ;;  %626 = vst.msk [vmem:[#allocation2 + $0x311] sm:$0xff] %vm189_vm0, %v459_v30  ;;  %v522_v29 = vld [vmem:[%s5121_s16 + $0x4e0] sm:$0xff]  ;;  %v523_v30 = vld [vmem:[%s5121_s16 + $0x4e8] sm:$0xff] }
  0x8e   : > { %627 = vst.msk [vmem:[#allocation2 + $0x319] sm:$0x1] %vm536_vm2, %v460_v31  ;;  %632 = vst.msk [vmem:[#allocation2 + $0x341] sm:$0x1] %vm536_vm2, %v465_v36  ;;  %v524_v31 = vld [vmem:[%s5121_s16 + $0x4f0] sm:$0xff]  ;;  %v529_v36 = vld [vmem:[%s5121_s16 + $0x518] sm:$0xff] }
  0x8f   : > { %628 = vst.msk [vmem:[#allocation2 + $0x321] sm:$0xff] %vm189_vm0, %v461_v32  ;;  %629 = vst.msk [vmem:[#allocation2 + $0x329] sm:$0xff] %vm189_vm0, %v462_v33  ;;  %v525_v32 = vld [vmem:[%s5121_s16 + $0x4f8] sm:$0x1]  ;;  %v526_v33 = vld [vmem:[%s5121_s16 + $0x500] sm:$0xff] }
  0x90   : > { %630 = vst.msk [vmem:[#allocation2 + $0x331] sm:$0xff] %vm189_vm0, %v463_v34  ;;  %631 = vst.msk [vmem:[#allocation2 + $0x339] sm:$0xff] %vm189_vm0, %v464_v35  ;;  %v527_v34 = vld [vmem:[%s5121_s16 + $0x508] sm:$0xff]  ;;  %v528_v35 = vld [vmem:[%s5121_s16 + $0x510] sm:$0xff] }
  0x91   : > { %633 = vst.msk [vmem:[#allocation2 + $0x349] sm:$0xff] %vm189_vm0, %v466_v37  ;;  %634 = vst.msk [vmem:[#allocation2 + $0x351] sm:$0xff] %vm189_vm0, %v467_v38  ;;  %v530_v37 = vld [vmem:[%s5121_s16 + $0x520] sm:$0x1] }
  0x92   : > { %635 = vst.msk [vmem:[#allocation2 + $0x359] sm:$0xff] %vm189_vm0, %v468_v39  ;;  %636 = vst.msk [vmem:[#allocation2 + $0x361] sm:$0xff] %vm189_vm0, %v469_v40  ;;  %v698_v38 = vld [vmem:[#allocation2] sm:$0xff] }
  0x93   : > { %637 = vst.msk [vmem:[#allocation2 + $0x369] sm:$0x1] %vm536_vm2, %v470_v41  ;;  %642 = vst.msk [vmem:[#allocation2 + $0x391] sm:$0x1] %vm536_vm2, %v475_v46  ;;  %v978_v39 = vld [vmem:[#allocation2 + $0x1] sm:$0xff]  ;;  %v838_v41 = vmul.f32 0.125, %v698_v38 }
  0x94   : > { %638 = vst.msk [vmem:[#allocation2 + $0x371] sm:$0xff] %vm189_vm0, %v471_v42  ;;  %639 = vst.msk [vmem:[#allocation2 + $0x379] sm:$0xff] %vm189_vm0, %v472_v43  ;;  %v1398_v40 = vld [vmem:[#allocation2 + $0x2] sm:$0xff]  ;;  %v1118_v42 = vmul.f32 0.375, %v978_v39 }
  0x95   : > { %640 = vst.msk [vmem:[#allocation2 + $0x381] sm:$0xff] %vm189_vm0, %v473_v44  ;;  %641 = vst.msk [vmem:[#allocation2 + $0x389] sm:$0xff] %vm189_vm0, %v474_v45  ;;  %v1538_v43 = vmul.f32 0.375, %v1398_v40  ;;  %v1818_v44 = vld [vmem:[#allocation2 + $0x3] sm:$0xff] }
  0x96   : > { %643 = vst.msk [vmem:[#allocation2 + $0x399] sm:$0xff] %vm189_vm0, %v476_v47  ;;  %644 = vst.msk [vmem:[#allocation2 + $0x3a1] sm:$0xff] %vm189_vm0, %v477_v48  ;;  %v699_v45 = vld [vmem:[#allocation2 + $0x8] sm:$0xff]  ;;  %v1958_v47 = vmul.f32 0.125, %v1818_v44 }
  0x97   : > { %645 = vst.msk [vmem:[#allocation2 + $0x3a9] sm:$0xff] %vm189_vm0, %v478_v49  ;;  %646 = vst.msk [vmem:[#allocation2 + $0x3b1] sm:$0xff] %vm189_vm0, %v479_v50  ;;  %v979_v46 = vld [vmem:[#allocation2 + $0x9] sm:$0xff]  ;;  %v839_v48 = vmul.f32 0.125, %v699_v45 }
  0x98   : > { %647 = vst.msk [vmem:[#allocation2 + $0x3b9] sm:$0x1] %vm536_vm2, %v480_v51  ;;  %652 = vst.msk [vmem:[#allocation2 + $0x3e1] sm:$0x1] %vm536_vm2, %v485_v56  ;;  %v1119_v49 = vmul.f32 0.375, %v979_v46  ;;  %v1399_v50 = vld [vmem:[#allocation2 + $0xa] sm:$0xff] }
  0x99   : > { %648 = vst.msk [vmem:[#allocation2 + $0x3c1] sm:$0xff] %vm189_vm0, %v481_v52  ;;  %649 = vst.msk [vmem:[#allocation2 + $0x3c9] sm:$0xff] %vm189_vm0, %v482_v53  ;;  %v1819_v51 = vld [vmem:[#allocation2 + $0xb] sm:$0xff]  ;;  %v1258_v53 = vadd.f32 %v1118_v42, %v838_v41  ;;  %v1405_v42 = vld [vmem:[#allocation2 + $0x42] sm:$0xff] }
  0x9a   : > { %650 = vst.msk [vmem:[#allocation2 + $0x3d1] sm:$0xff] %vm189_vm0, %v483_v54  ;;  %651 = vst.msk [vmem:[#allocation2 + $0x3d9] sm:$0xff] %vm189_vm0, %v484_v55  ;;  %v700_v52 = vld [vmem:[#allocation2 + $0x10] sm:$0xff]  ;;  %v1539_v54 = vmul.f32 0.375, %v1399_v50  ;;  %v1959_v55 = vmul.f32 0.125, %v1819_v51 }
  0x9b   : > { %653 = vst.msk [vmem:[#allocation2 + $0x3e9] sm:$0xff] %vm189_vm0, %v486_v57  ;;  %654 = vst.msk [vmem:[#allocation2 + $0x3f1] sm:$0xff] %vm189_vm0, %v487_v58  ;;  %v840_v56 = vmul.f32 0.125, %v700_v52  ;;  %v980_v57 = vld [vmem:[#allocation2 + $0x11] sm:$0xff] }
  0x9c   : > { %655 = vst.msk [vmem:[#allocation2 + $0x3f9] sm:$0xff] %vm189_vm0, %v488_v59  ;;  %656 = vst.msk [vmem:[#allocation2 + $0x401] sm:$0xff] %vm189_vm0, %v489_v60  ;;  %v1400_v58 = vld [vmem:[#allocation2 + $0x12] sm:$0xff]  ;;  %v1259_v60 = vadd.f32 %v1119_v49, %v839_v48 }
  0x9d   : > { %657 = vst.msk [vmem:[#allocation2 + $0x409] sm:$0x1] %vm536_vm2, %v490_v61  ;;  %662 = vst.msk [vmem:[#allocation2 + $0x431] sm:$0x1] %vm536_vm2, %v495_v2  ;;  %v1820_v59 = vld [vmem:[#allocation2 + $0x13] sm:$0xff]  ;;  %v1120_v61 = vmul.f32 0.375, %v980_v57 }
  0x9e   : > { %658 = vst.msk [vmem:[#allocation2 + $0x411] sm:$0xff] %vm189_vm0, %v491_v62  ;;  %659 = vst.msk [vmem:[#allocation2 + $0x419] sm:$0xff] %vm189_vm0, %v492_v63  ;;  %v1540_v62 = vmul.f32 0.375, %v1400_v58  ;;  %v1960_v63 = vmul.f32 0.125, %v1820_v59  ;;  %v1401_v2 = vld [vmem:[#allocation2 + $0x1a] sm:$0xff]  ;;  %v706_v48 = vld [vmem:[#allocation2 + $0x50] sm:$0xff] }
  0x9f   : > { %660 = vst.msk [vmem:[#allocation2 + $0x421] sm:$0xff] %vm189_vm0, %v493_v0  ;;  %661 = vst.msk [vmem:[#allocation2 + $0x429] sm:$0xff] %vm189_vm0, %v494_v1  ;;  %v701_v0 = vld [vmem:[#allocation2 + $0x18] sm:$0xff]  ;;  %v1545_v59 = vmul.f32 0.375, %v1405_v42  ;;  %v1411_v42 = vld [vmem:[#allocation2 + $0x82] sm:$0xff] }
  0xa0   : > { %663 = vst.msk [vmem:[#allocation2 + $0x439] sm:$0xff] %vm189_vm0, %v496_v3  ;;  %664 = vst.msk [vmem:[#allocation2 + $0x441] sm:$0xff] %vm189_vm0, %v497_v4  ;;  %v981_v1 = vld [vmem:[#allocation2 + $0x19] sm:$0xff]  ;;  %v1678_v3 = vadd.f32 %v1538_v43, %v1258_v53  ;;  %v841_v4 = vmul.f32 0.125, %v701_v0  ;;  %v1825_v43 = vld [vmem:[#allocation2 + $0x43] sm:$0xff] }
  0xa1   : > { %665 = vst.msk [vmem:[#allocation2 + $0x449] sm:$0xff] %vm189_vm0, %v498_v5  ;;  %666 = vst.msk [vmem:[#allocation2 + $0x451] sm:$0xff] %vm189_vm0, %v499_v6  ;;  %v1121_v5 = vmul.f32 0.375, %v981_v1  ;;  %v1541_v6 = vmul.f32 0.375, %v1401_v2  ;;  %v986_v49 = vld [vmem:[#allocation2 + $0x51] sm:$0xff]  ;;  %v846_v1 = vmul.f32 0.125, %v706_v48 }
  0xa2   : > { %667 = vst.msk [vmem:[#allocation2 + $0x459] sm:$0x1] %vm536_vm2, %v500_v7  ;;  %672 = vst.msk [vmem:[#allocation2 + $0x481] sm:$0x1] %vm536_vm2, %v505_v12  ;;  %v1821_v7 = vld [vmem:[#allocation2 + $0x1b] sm:$0xff]  ;;  %v1126_v2 = vmul.f32 0.375, %v986_v49 }
  0xa3   : > { %668 = vst.msk [vmem:[#allocation2 + $0x461] sm:$0xff] %vm189_vm0, %v501_v8  ;;  %669 = vst.msk [vmem:[#allocation2 + $0x469] sm:$0xff] %vm189_vm0, %v502_v9  ;;  %v702_v8 = vld [vmem:[#allocation2 + $0x28] sm:$0xff]  ;;  %v1961_v12 = vmul.f32 0.125, %v1821_v7 }
  0xa4   : > { %670 = vst.msk [vmem:[#allocation2 + $0x471] sm:$0xff] %vm189_vm0, %v503_v10  ;;  %671 = vst.msk [vmem:[#allocation2 + $0x479] sm:$0xff] %vm189_vm0, %v504_v11  ;;  %v982_v9 = vld [vmem:[#allocation2 + $0x29] sm:$0xff]  ;;  %v1679_v10 = vadd.f32 %v1539_v54, %v1259_v60  ;;  %v1260_v11 = vadd.f32 %v1120_v61, %v840_v56  ;;  %v1406_v54 = vld [vmem:[#allocation2 + $0x52] sm:$0xff]  ;;  %v1965_v60 = vmul.f32 0.125, %v1825_v43 }
  0xa5   : > { %673 = vst.msk [vmem:[#allocation2 + $0x489] sm:$0xff] %vm189_vm0, %v506_v13  ;;  %674 = vst.msk [vmem:[#allocation2 + $0x491] sm:$0xff] %vm189_vm0, %v507_v14  ;;  %v842_v13 = vmul.f32 0.125, %v702_v8  ;;  %v1402_v14 = vld [vmem:[#allocation2 + $0x2a] sm:$0xff]  ;;  %v707_v56 = vld [vmem:[#allocation2 + $0x58] sm:$0xff]  ;;  %v1546_v7 = vmul.f32 0.375, %v1406_v54 }
  0xa6   : > { %675 = vst.msk [vmem:[#allocation2 + $0x499] sm:$0xff] %vm189_vm0, %v508_v15  ;;  %676 = vst.msk [vmem:[#allocation2 + $0x4a1] sm:$0xff] %vm189_vm0, %v509_v16  ;;  %v1822_v15 = vld [vmem:[#allocation2 + $0x2b] sm:$0xff]  ;;  %v987_v61 = vld [vmem:[#allocation2 + $0x59] sm:$0xff] }
  0xa7   : > { %677 = vst.msk [vmem:[#allocation2 + $0x4a9] sm:$0x1] %vm536_vm2, %v510_v17  ;;  %682 = vst.msk [vmem:[#allocation2 + $0x4d1] sm:$0x1] %vm536_vm2, %v515_v22  ;;  %v703_v16 = vld [vmem:[#allocation2 + $0x30] sm:$0xff]  ;;  %v2098_v17 = vadd.f32 %v1958_v47, %v1678_v3  ;;  %v1827_v3 = vld [vmem:[#allocation2 + $0x5b] sm:$0xff] }
  0xa8   : > { %678 = vst.msk [vmem:[#allocation2 + $0x4b1] sm:$0xff] %vm189_vm0, %v511_v18  ;;  %679 = vst.msk [vmem:[#allocation2 + $0x4b9] sm:$0xff] %vm189_vm0, %v512_v19  ;;  %v1261_v18 = vadd.f32 %v1121_v5, %v841_v4  ;;  %v1122_v19 = vmul.f32 0.375, %v982_v9  ;;  %v1403_v22 = vld [vmem:[#allocation2 + $0x32] sm:$0xff]  ;;  %v708_v4 = vld [vmem:[#allocation2 + $0x60] sm:$0xff]  ;;  %v847_v9 = vmul.f32 0.125, %v707_v56 }
  0xa9   : > { %680 = vst.msk [vmem:[#allocation2 + $0x4c1] sm:$0xff] %vm189_vm0, %v513_v20  ;;  %681 = vst.msk [vmem:[#allocation2 + $0x4c9] sm:$0xff] %vm189_vm0, %v514_v21  ;;  %v1542_v20 = vmul.f32 0.375, %v1402_v14  ;;  %v983_v21 = vld [vmem:[#allocation2 + $0x31] sm:$0xff]  ;;  %v988_v5 = vld [vmem:[#allocation2 + $0x61] sm:$0xff]  ;;  %v1127_v14 = vmul.f32 0.375, %v987_v61 }
  0xaa   : > { %683 = vst.msk [vmem:[#allocation2 + $0x4d9] sm:$0xff] %vm189_vm0, %v516_v23  ;;  %684 = vst.msk [vmem:[#allocation2 + $0x4e1] sm:$0xff] %vm189_vm0, %v517_v24  ;;  %v1823_v23 = vld [vmem:[#allocation2 + $0x33] sm:$0xff]  ;;  %v2099_v24 = vadd.f32 %v1959_v55, %v1679_v10  ;;  %v1408_v10 = vld [vmem:[#allocation2 + $0x62] sm:$0xff] }
  0xab   : > { %685 = vst.msk [vmem:[#allocation2 + $0x4e9] sm:$0xff] %vm189_vm0, %v518_v25  ;;  %686 = vst.msk [vmem:[#allocation2 + $0x4f1] sm:$0xff] %vm189_vm0, %v519_v26  ;;  %v1680_v25 = vadd.f32 %v1540_v62, %v1260_v11  ;;  %v1962_v26 = vmul.f32 0.125, %v1822_v15  ;;  %v1963_v39 = vmul.f32 0.125, %v1823_v23  ;;  %v1826_v55 = vld [vmem:[#allocation2 + $0x53] sm:$0xff]  ;;  %v1828_v15 = vld [vmem:[#allocation2 + $0x63] sm:$0xff] }
  0xac   : > { %687 = vst.msk [vmem:[#allocation2 + $0x4f9] sm:$0x1] %vm536_vm2, %v520_v27  ;;  %692 = vst.msk [vmem:[#allocation2 + $0x521] sm:$0x1] %vm536_vm2, %v525_v32  ;;  %v843_v27 = vmul.f32 0.125, %v703_v16  ;;  %v1262_v32 = vadd.f32 %v1122_v19, %v842_v13  ;;  %v1407_v62 = vld [vmem:[#allocation2 + $0x5a] sm:$0xff]  ;;  %v1266_v13 = vadd.f32 %v1126_v2, %v846_v1 }
  0xad   : > { %688 = vst.msk [vmem:[#allocation2 + $0x501] sm:$0xff] %vm189_vm0, %v521_v28  ;;  %689 = vst.msk [vmem:[#allocation2 + $0x509] sm:$0xff] %vm189_vm0, %v522_v29  ;;  %v704_v28 = vld [vmem:[#allocation2 + $0x38] sm:$0xff]  ;;  %v2100_v38 = vadd.f32 %v1960_v63, %v1680_v25  ;;  %v1966_v8 = vmul.f32 0.125, %v1826_v55  ;;  %v709_v16 = vld [vmem:[#allocation2 + $0x68] sm:$0xff]  ;;  %v1967_v19 = vmul.f32 0.125, %v1827_v3 }
  0xae   : > { %690 = vst.msk [vmem:[#allocation2 + $0x511] sm:$0xff] %vm189_vm0, %v523_v30  ;;  %691 = vst.msk [vmem:[#allocation2 + $0x519] sm:$0xff] %vm189_vm0, %v524_v31  ;;  %v984_v29 = vld [vmem:[#allocation2 + $0x39] sm:$0xff]  ;;  %v1681_v31 = vadd.f32 %v1541_v6, %v1261_v18  ;;  %v844_v40 = vmul.f32 0.125, %v704_v28  ;;  %v1682_v45 = vadd.f32 %v1542_v20, %v1262_v32  ;;  %v1547_v18 = vmul.f32 0.375, %v1407_v62  ;;  %v1829_v23 = vld [vmem:[#allocation2 + $0x6b] sm:$0xff] }
  0xaf   : > { %693 = vst.msk [vmem:[#allocation2 + $0x529] sm:$0xff] %vm189_vm0, %v526_v33  ;;  %694 = vst.msk [vmem:[#allocation2 + $0x531] sm:$0xff] %vm189_vm0, %v527_v34  ;;  %v1404_v30 = vld [vmem:[#allocation2 + $0x3a] sm:$0xff]  ;;  %v1123_v33 = vmul.f32 0.375, %v983_v21  ;;  %v1543_v34 = vmul.f32 0.375, %v1403_v22  ;;  %v1124_v41 = vmul.f32 0.375, %v984_v29  ;;  %v1686_v25 = vadd.f32 %v1546_v7, %v1266_v13 }
  0xb0   : > { %695 = vst.msk [vmem:[#allocation2 + $0x539] sm:$0xff] %vm189_vm0, %v528_v35  ;;  %696 = vst.msk [vmem:[#allocation2 + $0x541] sm:$0xff] %vm189_vm0, %v529_v36  ;;  %v1824_v35 = vld [vmem:[#allocation2 + $0x3b] sm:$0xff]  ;;  %v2101_v44 = vadd.f32 %v1961_v12, %v1681_v31  ;;  %v1544_v47 = vmul.f32 0.375, %v1404_v30  ;;  %v2102_v57 = vadd.f32 %v1962_v26, %v1682_v45  ;;  %v848_v20 = vmul.f32 0.125, %v708_v4  ;;  %v1409_v22 = vld [vmem:[#allocation2 + $0x6a] sm:$0xff] }
  0xb1   : > { %697 = vst.msk [vmem:[#allocation2 + $0x549] sm:$0x1] %vm536_vm2, %v530_v37  ;;  %v705_v36 = vld [vmem:[#allocation2 + $0x40] sm:$0xff]  ;;  %v1263_v46 = vadd.f32 %v1123_v33, %v843_v27  ;;  %v1264_v50 = vadd.f32 %v1124_v41, %v844_v40  ;;  %v1964_v51 = vmul.f32 0.125, %v1824_v35  ;;  %v1128_v21 = vmul.f32 0.375, %v988_v5  ;;  %v710_v28 = vld [vmem:[#allocation2 + $0x78] sm:$0xff] }
  0xb2   : > { %2238 = vst.msk [vmem:[#allocation3] sm:$0xff] %vm189_vm0, %v2098_v17  ;;  %v985_v37 = vld [vmem:[#allocation2 + $0x41] sm:$0xff]  ;;  %2239 = vst.msk [vmem:[#allocation3 + $0x8] sm:$0xff] %vm189_vm0, %v2099_v24  ;;  %v845_v52 = vmul.f32 0.125, %v705_v36  ;;  %v989_v17 = vld [vmem:[#allocation2 + $0x69] sm:$0xff]  ;;  %v1267_v26 = vadd.f32 %v1127_v14, %v847_v9  ;;  %v1548_v27 = vmul.f32 0.375, %v1408_v10 }
  0xb3   : > { %2240 = vst.msk [vmem:[#allocation3 + $0x10] sm:$0xff] %vm189_vm0, %v2100_v38  ;;  %v1125_v53 = vmul.f32 0.375, %v985_v37  ;;  %2241 = vst.msk [vmem:[#allocation3 + $0x18] sm:$0xff] %vm189_vm0, %v2101_v44  ;;  %v1683_v58 = vadd.f32 %v1543_v34, %v1263_v46  ;;  %v1684_v63 = vadd.f32 %v1544_v47, %v1264_v50  ;;  %v990_v29 = vld [vmem:[#allocation2 + $0x79] sm:$0xff]  ;;  %v1268_v30 = vadd.f32 %v1128_v21, %v848_v20  ;;  %v991_v41 = vld [vmem:[#allocation2 + $0x81] sm:$0xff] }
  0xb4   : > { %2242 = vst.msk [vmem:[#allocation3 + $0x20] sm:$0xff] %vm189_vm0, %v2102_v57  ;;  %v1968_v31 = vmul.f32 0.125, %v1828_v15  ;;  %v849_v32 = vmul.f32 0.125, %v709_v16  ;;  %v1129_v33 = vmul.f32 0.375, %v989_v17  ;;  %v1410_v34 = vld [vmem:[#allocation2 + $0x7a] sm:$0xff]  ;;  %v2106_v37 = vadd.f32 %v1966_v8, %v1686_v25  ;;  %v1831_v47 = vld [vmem:[#allocation2 + $0x83] sm:$0xff] }
  0xb5   : > { %v1265_v0 = vadd.f32 %v1125_v53, %v845_v52  ;;  %v2103_v6 = vadd.f32 %v1963_v39, %v1683_v58  ;;  %v2104_v11 = vadd.f32 %v1964_v51, %v1684_v63  ;;  %v1830_v35 = vld [vmem:[#allocation2 + $0x7b] sm:$0xff]  ;;  %v1687_v38 = vadd.f32 %v1547_v18, %v1267_v26  ;;  %v712_v48 = vld [vmem:[#allocation2 + $0x88] sm:$0xff]  ;;  %v993_v61 = vld [vmem:[#allocation2 + $0x91] sm:$0xff] }
  0xb6   : > { %v711_v36 = vld [vmem:[#allocation2 + $0x80] sm:$0xff]  ;;  %v1549_v39 = vmul.f32 0.375, %v1409_v22  ;;  %v1969_v40 = vmul.f32 0.125, %v1829_v23  ;;  %v1688_v43 = vadd.f32 %v1548_v27, %v1268_v30  ;;  %v1269_v44 = vadd.f32 %v1129_v33, %v849_v32  ;;  %v992_v49 = vld [vmem:[#allocation2 + $0x89] sm:$0xff]  ;;  %2246 = vst.msk [vmem:[#allocation3 + $0x40] sm:$0xff] %vm189_vm0, %v2106_v37  ;;  %v1413_v2 = vld [vmem:[#allocation2 + $0x92] sm:$0xff] }
  0xb7   : > { %v1685_v12 = vadd.f32 %v1545_v59, %v1265_v0  ;;  %2243 = vst.msk [vmem:[#allocation3 + $0x28] sm:$0xff] %vm189_vm0, %v2103_v6  ;;  %2244 = vst.msk [vmem:[#allocation3 + $0x30] sm:$0xff] %vm189_vm0, %v2104_v11  ;;  %v850_v45 = vmul.f32 0.125, %v710_v28  ;;  %v1130_v46 = vmul.f32 0.375, %v990_v29  ;;  %v2107_v50 = vadd.f32 %v1967_v19, %v1687_v38  ;;  %v1412_v54 = vld [vmem:[#allocation2 + $0x8a] sm:$0xff]  ;;  %v1833_v3 = vld [vmem:[#allocation2 + $0x93] sm:$0xff] }
  0xb8   : > { %v1550_v51 = vmul.f32 0.375, %v1410_v34  ;;  %v1970_v52 = vmul.f32 0.125, %v1830_v35  ;;  %v851_v53 = vmul.f32 0.125, %v711_v36  ;;  %v2108_v55 = vadd.f32 %v1968_v31, %v1688_v43  ;;  %v1832_v59 = vld [vmem:[#allocation2 + $0x8b] sm:$0xff]  ;;  %v714_v8 = vld [vmem:[#allocation2 + $0xa0] sm:$0xff] }
  0xb9   : > { %v2105_v24 = vadd.f32 %v1965_v60, %v1685_v12  ;;  %v1689_v56 = vadd.f32 %v1549_v39, %v1269_v44  ;;  %v1270_v57 = vadd.f32 %v1130_v46, %v850_v45  ;;  %v1131_v58 = vmul.f32 0.375, %v991_v41  ;;  %v713_v60 = vld [vmem:[#allocation2 + $0x90] sm:$0xff]  ;;  %2247 = vst.msk [vmem:[#allocation3 + $0x48] sm:$0xff] %vm189_vm0, %v2107_v50  ;;  %v994_v9 = vld [vmem:[#allocation2 + $0xa1] sm:$0xff]  ;;  %v997_v41 = vld [vmem:[#allocation2 + $0xb9] sm:$0xff] }
  0xba   : > { %v1551_v62 = vmul.f32 0.375, %v1411_v42  ;;  %v1971_v63 = vmul.f32 0.125, %v1831_v47  ;;  %v852_v0 = vmul.f32 0.125, %v712_v48  ;;  %v1132_v1 = vmul.f32 0.375, %v992_v49  ;;  %2248 = vst.msk [vmem:[#allocation3 + $0x50] sm:$0xff] %vm189_vm0, %v2108_v55  ;;  %v1414_v14 = vld [vmem:[#allocation2 + $0xa2] sm:$0xff] }
  0xbb   : > { %2245 = vst.msk [vmem:[#allocation3 + $0x38] sm:$0xff] %vm189_vm0, %v2105_v24  ;;  %v2109_v4 = vadd.f32 %v1969_v40, %v1689_v56  ;;  %v1690_v5 = vadd.f32 %v1550_v51, %v1270_v57  ;;  %v1271_v6 = vadd.f32 %v1131_v58, %v851_v53  ;;  %v1552_v7 = vmul.f32 0.375, %v1412_v54  ;;  %v1834_v15 = vld [vmem:[#allocation2 + $0xa3] sm:$0xff]  ;;  %v1835_v27 = vld [vmem:[#allocation2 + $0xab] sm:$0xff]  ;;  %v1836_v39 = vld [vmem:[#allocation2 + $0xb3] sm:$0xff] }
  0xbc   : > { %v1272_v10 = vadd.f32 %v1132_v1, %v852_v0  ;;  %v1972_v11 = vmul.f32 0.125, %v1832_v59  ;;  %v853_v12 = vmul.f32 0.125, %v713_v60  ;;  %v1133_v13 = vmul.f32 0.375, %v993_v61  ;;  %v715_v16 = vld [vmem:[#allocation2 + $0xa8] sm:$0xff]  ;;  %v716_v28 = vld [vmem:[#allocation2 + $0xb0] sm:$0xff]  ;;  %v717_v40 = vld [vmem:[#allocation2 + $0xb8] sm:$0xff] }
  0xbd   : > { %2249 = vst.msk [vmem:[#allocation3 + $0x58] sm:$0xff] %vm189_vm0, %v2109_v4  ;;  %v2110_v17 = vadd.f32 %v1970_v52, %v1690_v5  ;;  %v1691_v18 = vadd.f32 %v1551_v62, %v1271_v6  ;;  %v1553_v19 = vmul.f32 0.375, %v1413_v2  ;;  %v1973_v20 = vmul.f32 0.125, %v1833_v3  ;;  %v995_v21 = vld [vmem:[#allocation2 + $0xa9] sm:$0xff]  ;;  %v996_v29 = vld [vmem:[#allocation2 + $0xb1] sm:$0xff]  ;;  %v1417_v46 = vld [vmem:[#allocation2 + $0xba] sm:$0xff] }
  0xbe   : > { %v1415_v22 = vld [vmem:[#allocation2 + $0xaa] sm:$0xff]  ;;  %v1692_v23 = vadd.f32 %v1552_v7, %v1272_v10  ;;  %v1273_v24 = vadd.f32 %v1133_v13, %v853_v12  ;;  %v854_v25 = vmul.f32 0.125, %v714_v8  ;;  %v1134_v26 = vmul.f32 0.375, %v994_v9  ;;  %v1416_v34 = vld [vmem:[#allocation2 + $0xb2] sm:$0xff]  ;;  %v1837_v47 = vld [vmem:[#allocation2 + $0xbb] sm:$0xff] }
  0xbf   : > { %2250 = vst.msk [vmem:[#allocation3 + $0x60] sm:$0xff] %vm189_vm0, %v2110_v17  ;;  %v2111_v30 = vadd.f32 %v1971_v63, %v1691_v18  ;;  %v1554_v31 = vmul.f32 0.375, %v1414_v14  ;;  %v1974_v32 = vmul.f32 0.125, %v1834_v15  ;;  %v855_v33 = vmul.f32 0.125, %v715_v16  ;;  %v718_v52 = vld [vmem:[#allocation2 + $0xc8] sm:$0xff]  ;;  %v719_v60 = vld [vmem:[#allocation2 + $0xd0] sm:$0xff] }
  0xc0   : > { %v2112_v35 = vadd.f32 %v1972_v11, %v1692_v23  ;;  %v1693_v36 = vadd.f32 %v1553_v19, %v1273_v24  ;;  %v1274_v37 = vadd.f32 %v1134_v26, %v854_v25  ;;  %v1135_v38 = vmul.f32 0.375, %v995_v21  ;;  %v998_v53 = vld [vmem:[#allocation2 + $0xc9] sm:$0xff]  ;;  %v999_v1 = vld [vmem:[#allocation2 + $0xd1] sm:$0xff]  ;;  %v1000_v9 = vld [vmem:[#allocation2 + $0xd9] sm:$0xff] }
  0xc1   : > { %2251 = vst.msk [vmem:[#allocation3 + $0x68] sm:$0xff] %vm189_vm0, %v2111_v30  ;;  %v1555_v42 = vmul.f32 0.375, %v1415_v22  ;;  %v1975_v43 = vmul.f32 0.125, %v1835_v27  ;;  %v856_v44 = vmul.f32 0.125, %v716_v28  ;;  %v1136_v45 = vmul.f32 0.375, %v996_v29  ;;  %v1418_v58 = vld [vmem:[#allocation2 + $0xca] sm:$0xff] }
  0xc2   : > { %2252 = vst.msk [vmem:[#allocation3 + $0x70] sm:$0xff] %vm189_vm0, %v2112_v35  ;;  %v2113_v48 = vadd.f32 %v1973_v20, %v1693_v36  ;;  %v1694_v49 = vadd.f32 %v1554_v31, %v1274_v37  ;;  %v1275_v50 = vadd.f32 %v1135_v38, %v855_v33  ;;  %v1556_v51 = vmul.f32 0.375, %v1416_v34  ;;  %v1838_v59 = vld [vmem:[#allocation2 + $0xcb] sm:$0xff]  ;;  %v1839_v7 = vld [vmem:[#allocation2 + $0xd3] sm:$0xff]  ;;  %v1840_v19 = vld [vmem:[#allocation2 + $0xdb] sm:$0xff] }
  0xc3   : > { %v1276_v54 = vadd.f32 %v1136_v45, %v856_v44  ;;  %v1976_v55 = vmul.f32 0.125, %v1836_v39  ;;  %v857_v56 = vmul.f32 0.125, %v717_v40  ;;  %v1137_v57 = vmul.f32 0.375, %v997_v41  ;;  %v1419_v2 = vld [vmem:[#allocation2 + $0xd2] sm:$0xff]  ;;  %v1420_v14 = vld [vmem:[#allocation2 + $0xda] sm:$0xff]  ;;  %v1421_v26 = vld [vmem:[#allocation2 + $0xe2] sm:$0xff] }
  0xc4   : > { %2253 = vst.msk [vmem:[#allocation3 + $0x78] sm:$0xff] %vm189_vm0, %v2113_v48  ;;  %v2114_v61 = vadd.f32 %v1974_v32, %v1694_v49  ;;  %v1695_v62 = vadd.f32 %v1555_v42, %v1275_v50  ;;  %v1557_v63 = vmul.f32 0.375, %v1417_v46  ;;  %v1977_v0 = vmul.f32 0.125, %v1837_v47  ;;  %v720_v8 = vld [vmem:[#allocation2 + $0xd8] sm:$0xff]  ;;  %v721_v20 = vld [vmem:[#allocation2 + $0xe0] sm:$0xff]  ;;  %v722_v32 = vld [vmem:[#allocation2 + $0xf0] sm:$0xff] }
  0xc5   : > { %v1696_v3 = vadd.f32 %v1556_v51, %v1276_v54  ;;  %v1277_v4 = vadd.f32 %v1137_v57, %v857_v56  ;;  %v858_v5 = vmul.f32 0.125, %v718_v52  ;;  %v1138_v6 = vmul.f32 0.375, %v998_v53  ;;  %v1001_v21 = vld [vmem:[#allocation2 + $0xe1] sm:$0xff]  ;;  %v1002_v33 = vld [vmem:[#allocation2 + $0xf1] sm:$0xff]  ;;  %v1003_v45 = vld [vmem:[#allocation2 + $0xf9] sm:$0xff] }
  0xc6   : > { %2254 = vst.msk [vmem:[#allocation3 + $0x80] sm:$0xff] %vm189_vm0, %v2114_v61  ;;  %v2115_v10 = vadd.f32 %v1975_v43, %v1695_v62  ;;  %v1558_v11 = vmul.f32 0.375, %v1418_v58  ;;  %v1978_v12 = vmul.f32 0.125, %v1838_v59  ;;  %v859_v13 = vmul.f32 0.125, %v719_v60  ;;  %v1841_v27 = vld [vmem:[#allocation2 + $0xe3] sm:$0xff]  ;;  %v1422_v38 = vld [vmem:[#allocation2 + $0xf2] sm:$0xff] }
  0xc7   : > { %v2116_v15 = vadd.f32 %v1976_v55, %v1696_v3  ;;  %v1697_v16 = vadd.f32 %v1557_v63, %v1277_v4  ;;  %v1278_v17 = vadd.f32 %v1138_v6, %v858_v5  ;;  %v1139_v18 = vmul.f32 0.375, %v999_v1  ;;  %v1842_v39 = vld [vmem:[#allocation2 + $0xf3] sm:$0xff]  ;;  %v1843_v51 = vld [vmem:[#allocation2 + $0xfb] sm:$0xff]  ;;  %v1844_v63 = vld [vmem:[#allocation2 + $0x103] sm:$0xff] }
  0xc8   : > { %2255 = vst.msk [vmem:[#allocation3 + $0x88] sm:$0xff] %vm189_vm0, %v2115_v10  ;;  %v1559_v22 = vmul.f32 0.375, %v1419_v2  ;;  %v1979_v23 = vmul.f32 0.125, %v1839_v7  ;;  %v860_v24 = vmul.f32 0.125, %v720_v8  ;;  %v1140_v25 = vmul.f32 0.375, %v1000_v9  ;;  %v723_v40 = vld [vmem:[#allocation2 + $0xf8] sm:$0xff] }
  0xc9   : > { %2256 = vst.msk [vmem:[#allocation3 + $0x90] sm:$0xff] %vm189_vm0, %v2116_v15  ;;  %v2117_v28 = vadd.f32 %v1977_v0, %v1697_v16  ;;  %v1698_v29 = vadd.f32 %v1558_v11, %v1278_v17  ;;  %v1279_v30 = vadd.f32 %v1139_v18, %v859_v13  ;;  %v1560_v31 = vmul.f32 0.375, %v1420_v14  ;;  %v1423_v46 = vld [vmem:[#allocation2 + $0xfa] sm:$0xff]  ;;  %v1424_v58 = vld [vmem:[#allocation2 + $0x102] sm:$0xff]  ;;  %v1425_v6 = vld [vmem:[#allocation2 + $0x10a] sm:$0xff] }
  0xca   : > { %v1280_v34 = vadd.f32 %v1140_v25, %v860_v24  ;;  %v1980_v35 = vmul.f32 0.125, %v1840_v19  ;;  %v861_v36 = vmul.f32 0.125, %v721_v20  ;;  %v1141_v37 = vmul.f32 0.375, %v1001_v21  ;;  %v724_v52 = vld [vmem:[#allocation2 + $0x100] sm:$0xff]  ;;  %v725_v0 = vld [vmem:[#allocation2 + $0x108] sm:$0xff] }
  0xcb   : > { %2257 = vst.msk [vmem:[#allocation3 + $0x98] sm:$0xff] %vm189_vm0, %v2117_v28  ;;  %v2118_v41 = vadd.f32 %v1978_v12, %v1698_v29  ;;  %v1699_v42 = vadd.f32 %v1559_v22, %v1279_v30  ;;  %v1561_v43 = vmul.f32 0.375, %v1421_v26  ;;  %v1981_v44 = vmul.f32 0.125, %v1841_v27  ;;  %v1004_v53 = vld [vmem:[#allocation2 + $0x101] sm:$0xff]  ;;  %v1005_v1 = vld [vmem:[#allocation2 + $0x109] sm:$0xff]  ;;  %v726_v12 = vld [vmem:[#allocation2 + $0x118] sm:$0xff] }
  0xcc   : > { %v1700_v47 = vadd.f32 %v1560_v31, %v1280_v34  ;;  %v1281_v48 = vadd.f32 %v1141_v37, %v861_v36  ;;  %v862_v49 = vmul.f32 0.125, %v722_v32  ;;  %v1142_v50 = vmul.f32 0.375, %v1002_v33  ;;  %v1845_v7 = vld [vmem:[#allocation2 + $0x10b] sm:$0xff]  ;;  %v1006_v13 = vld [vmem:[#allocation2 + $0x119] sm:$0xff]  ;;  %v1007_v25 = vld [vmem:[#allocation2 + $0x121] sm:$0xff] }
  0xcd   : > { %2258 = vst.msk [vmem:[#allocation3 + $0xa0] sm:$0xff] %vm189_vm0, %v2118_v41  ;;  %v2119_v54 = vadd.f32 %v1979_v23, %v1699_v42  ;;  %v1562_v55 = vmul.f32 0.375, %v1422_v38  ;;  %v1982_v56 = vmul.f32 0.125, %v1842_v39  ;;  %v863_v57 = vmul.f32 0.125, %v723_v40  ;;  %v1426_v18 = vld [vmem:[#allocation2 + $0x11a] sm:$0xff]  ;;  %v1427_v26 = vld [vmem:[#allocation2 + $0x122] sm:$0xff] }
  0xce   : > { %v2120_v59 = vadd.f32 %v1980_v35, %v1700_v47  ;;  %v1701_v60 = vadd.f32 %v1561_v43, %v1281_v48  ;;  %v1282_v61 = vadd.f32 %v1142_v50, %v862_v49  ;;  %v1143_v62 = vmul.f32 0.375, %v1003_v45  ;;  %v1846_v19 = vld [vmem:[#allocation2 + $0x11b] sm:$0xff]  ;;  %v1847_v31 = vld [vmem:[#allocation2 + $0x123] sm:$0xff]  ;;  %v1848_v43 = vld [vmem:[#allocation2 + $0x12b] sm:$0xff] }
  0xcf   : > { %2259 = vst.msk [vmem:[#allocation3 + $0xa8] sm:$0xff] %vm189_vm0, %v2119_v54  ;;  %v1563_v2 = vmul.f32 0.375, %v1423_v46  ;;  %v1983_v3 = vmul.f32 0.125, %v1843_v51  ;;  %v864_v4 = vmul.f32 0.125, %v724_v52  ;;  %v1144_v5 = vmul.f32 0.375, %v1004_v53  ;;  %v727_v20 = vld [vmem:[#allocation2 + $0x120] sm:$0xff] }
  0xd0   : > { %2260 = vst.msk [vmem:[#allocation3 + $0xb0] sm:$0xff] %vm189_vm0, %v2120_v59  ;;  %v2121_v8 = vadd.f32 %v1981_v44, %v1701_v60  ;;  %v1702_v9 = vadd.f32 %v1562_v55, %v1282_v61  ;;  %v1283_v10 = vadd.f32 %v1143_v62, %v863_v57  ;;  %v1564_v11 = vmul.f32 0.375, %v1424_v58  ;;  %v728_v32 = vld [vmem:[#allocation2 + $0x128] sm:$0xff]  ;;  %v729_v44 = vld [vmem:[#allocation2 + $0x130] sm:$0xff] }
  0xd1   : > { %v1284_v14 = vadd.f32 %v1144_v5, %v864_v4  ;;  %v1984_v15 = vmul.f32 0.125, %v1844_v63  ;;  %v865_v16 = vmul.f32 0.125, %v725_v0  ;;  %v1145_v17 = vmul.f32 0.375, %v1005_v1  ;;  %v1008_v33 = vld [vmem:[#allocation2 + $0x129] sm:$0xff]  ;;  %v1009_v45 = vld [vmem:[#allocation2 + $0x131] sm:$0xff]  ;;  %v1010_v57 = vld [vmem:[#allocation2 + $0x141] sm:$0xff] }
  0xd2   : > { %2261 = vst.msk [vmem:[#allocation3 + $0xb8] sm:$0xff] %vm189_vm0, %v2121_v8  ;;  %v2122_v21 = vadd.f32 %v1982_v56, %v1702_v9  ;;  %v1703_v22 = vadd.f32 %v1563_v2, %v1283_v10  ;;  %v1565_v23 = vmul.f32 0.375, %v1425_v6  ;;  %v1985_v24 = vmul.f32 0.125, %v1845_v7  ;;  %v1428_v38 = vld [vmem:[#allocation2 + $0x12a] sm:$0xff]  ;;  %v1429_v50 = vld [vmem:[#allocation2 + $0x132] sm:$0xff]  ;;  %v730_v56 = vld [vmem:[#allocation2 + $0x140] sm:$0xff] }
  0xd3   : > { %v1704_v27 = vadd.f32 %v1564_v11, %v1284_v14  ;;  %v1285_v28 = vadd.f32 %v1145_v17, %v865_v16  ;;  %v866_v29 = vmul.f32 0.125, %v726_v12  ;;  %v1146_v30 = vmul.f32 0.375, %v1006_v13  ;;  %v1849_v51 = vld [vmem:[#allocation2 + $0x133] sm:$0xff]  ;;  %v1430_v62 = vld [vmem:[#allocation2 + $0x142] sm:$0xff]  ;;  %v1431_v6 = vld [vmem:[#allocation2 + $0x14a] sm:$0xff] }
  0xd4   : > { %2262 = vst.msk [vmem:[#allocation3 + $0xc0] sm:$0xff] %vm189_vm0, %v2122_v21  ;;  %v2123_v34 = vadd.f32 %v1983_v3, %v1703_v22  ;;  %v1566_v35 = vmul.f32 0.375, %v1426_v18  ;;  %v1986_v36 = vmul.f32 0.125, %v1846_v19  ;;  %v867_v37 = vmul.f32 0.125, %v727_v20  ;;  %v1850_v63 = vld [vmem:[#allocation2 + $0x143] sm:$0xff]  ;;  %v1851_v11 = vld [vmem:[#allocation2 + $0x14b] sm:$0xff] }
  0xd5   : > { %v2124_v39 = vadd.f32 %v1984_v15, %v1704_v27  ;;  %v1705_v40 = vadd.f32 %v1565_v23, %v1285_v28  ;;  %v1286_v41 = vadd.f32 %v1146_v30, %v866_v29  ;;  %v1147_v42 = vmul.f32 0.375, %v1007_v25  ;;  %v731_v0 = vld [vmem:[#allocation2 + $0x148] sm:$0xff]  ;;  %v732_v12 = vld [vmem:[#allocation2 + $0x150] sm:$0xff]  ;;  %v1013_v25 = vld [vmem:[#allocation2 + $0x159] sm:$0xff] }
  0xd6   : > { %2263 = vst.msk [vmem:[#allocation3 + $0xc8] sm:$0xff] %vm189_vm0, %v2123_v34  ;;  %v1567_v46 = vmul.f32 0.375, %v1427_v26  ;;  %v1987_v47 = vmul.f32 0.125, %v1847_v31  ;;  %v868_v48 = vmul.f32 0.125, %v728_v32  ;;  %v1148_v49 = vmul.f32 0.375, %v1008_v33  ;;  %v1011_v5 = vld [vmem:[#allocation2 + $0x149] sm:$0xff] }
  0xd7   : > { %2264 = vst.msk [vmem:[#allocation3 + $0xd0] sm:$0xff] %vm189_vm0, %v2124_v39  ;;  %v2125_v52 = vadd.f32 %v1985_v24, %v1705_v40  ;;  %v1706_v53 = vadd.f32 %v1566_v35, %v1286_v41  ;;  %v1287_v54 = vadd.f32 %v1147_v42, %v867_v37  ;;  %v1568_v55 = vmul.f32 0.375, %v1428_v38  ;;  %v1012_v13 = vld [vmem:[#allocation2 + $0x151] sm:$0xff]  ;;  %v1433_v30 = vld [vmem:[#allocation2 + $0x15a] sm:$0xff]  ;;  %v1014_v37 = vld [vmem:[#allocation2 + $0x169] sm:$0xff] }
  0xd8   : > { %v1288_v58 = vadd.f32 %v1148_v49, %v868_v48  ;;  %v1988_v59 = vmul.f32 0.125, %v1848_v43  ;;  %v869_v60 = vmul.f32 0.125, %v729_v44  ;;  %v1149_v61 = vmul.f32 0.375, %v1009_v45  ;;  %v1432_v18 = vld [vmem:[#allocation2 + $0x152] sm:$0xff]  ;;  %v1853_v31 = vld [vmem:[#allocation2 + $0x15b] sm:$0xff]  ;;  %v1434_v42 = vld [vmem:[#allocation2 + $0x16a] sm:$0xff] }
  0xd9   : > { %2265 = vst.msk [vmem:[#allocation3 + $0xd8] sm:$0xff] %vm189_vm0, %v2125_v52  ;;  %v2126_v1 = vadd.f32 %v1986_v36, %v1706_v53  ;;  %v1707_v2 = vadd.f32 %v1567_v46, %v1287_v54  ;;  %v1569_v3 = vmul.f32 0.375, %v1429_v50  ;;  %v1989_v4 = vmul.f32 0.125, %v1849_v51  ;;  %v1852_v23 = vld [vmem:[#allocation2 + $0x153] sm:$0xff]  ;;  %v734_v36 = vld [vmem:[#allocation2 + $0x168] sm:$0xff] }
  0xda   : > { %v1708_v7 = vadd.f32 %v1568_v55, %v1288_v58  ;;  %v1289_v8 = vadd.f32 %v1149_v61, %v869_v60  ;;  %v870_v9 = vmul.f32 0.125, %v730_v56  ;;  %v1150_v10 = vmul.f32 0.375, %v1010_v57  ;;  %v733_v24 = vld [vmem:[#allocation2 + $0x158] sm:$0xff]  ;;  %v1854_v43 = vld [vmem:[#allocation2 + $0x16b] sm:$0xff] }
  0xdb   : > { %2266 = vst.msk [vmem:[#allocation3 + $0xe0] sm:$0xff] %vm189_vm0, %v2126_v1  ;;  %v2127_v14 = vadd.f32 %v1987_v47, %v1707_v2  ;;  %v1570_v15 = vmul.f32 0.375, %v1430_v62  ;;  %v1990_v16 = vmul.f32 0.125, %v1850_v63  ;;  %v871_v17 = vmul.f32 0.125, %v731_v0  ;;  %v735_v44 = vld [vmem:[#allocation2 + $0x170] sm:$0xff]  ;;  %v736_v56 = vld [vmem:[#allocation2 + $0x178] sm:$0xff] }
  0xdc   : > { %v2128_v19 = vadd.f32 %v1988_v59, %v1708_v7  ;;  %v1709_v20 = vadd.f32 %v1569_v3, %v1289_v8  ;;  %v1290_v21 = vadd.f32 %v1150_v10, %v870_v9  ;;  %v1151_v22 = vmul.f32 0.375, %v1011_v5  ;;  %v1015_v49 = vld [vmem:[#allocation2 + $0x171] sm:$0xff]  ;;  %v1016_v57 = vld [vmem:[#allocation2 + $0x179] sm:$0xff]  ;;  %v1017_v5 = vld [vmem:[#allocation2 + $0x181] sm:$0xff] }
  0xdd   : > { %2267 = vst.msk [vmem:[#allocation3 + $0xe8] sm:$0xff] %vm189_vm0, %v2127_v14  ;;  %v1571_v26 = vmul.f32 0.375, %v1431_v6  ;;  %v1991_v27 = vmul.f32 0.125, %v1851_v11  ;;  %v872_v28 = vmul.f32 0.125, %v732_v12  ;;  %v1152_v29 = vmul.f32 0.375, %v1012_v13  ;;  %v1435_v50 = vld [vmem:[#allocation2 + $0x172] sm:$0xff] }
  0xde   : > { %2268 = vst.msk [vmem:[#allocation3 + $0xf0] sm:$0xff] %vm189_vm0, %v2128_v19  ;;  %v2129_v32 = vadd.f32 %v1989_v4, %v1709_v20  ;;  %v1710_v33 = vadd.f32 %v1570_v15, %v1290_v21  ;;  %v1291_v34 = vadd.f32 %v1151_v22, %v871_v17  ;;  %v1572_v35 = vmul.f32 0.375, %v1432_v18  ;;  %v1855_v55 = vld [vmem:[#allocation2 + $0x173] sm:$0xff]  ;;  %v1856_v3 = vld [vmem:[#allocation2 + $0x17b] sm:$0xff]  ;;  %v1857_v11 = vld [vmem:[#allocation2 + $0x183] sm:$0xff] }
  0xdf   : > { %v1292_v38 = vadd.f32 %v1152_v29, %v872_v28  ;;  %v1992_v39 = vmul.f32 0.125, %v1852_v23  ;;  %v873_v40 = vmul.f32 0.125, %v733_v24  ;;  %v1153_v41 = vmul.f32 0.375, %v1013_v25  ;;  %v1436_v62 = vld [vmem:[#allocation2 + $0x17a] sm:$0xff]  ;;  %v1437_v10 = vld [vmem:[#allocation2 + $0x182] sm:$0xff]  ;;  %v1018_v17 = vld [vmem:[#allocation2 + $0x191] sm:$0xff] }
  0xe0   : > { %2269 = vst.msk [vmem:[#allocation3 + $0xf8] sm:$0xff] %vm189_vm0, %v2129_v32  ;;  %v2130_v45 = vadd.f32 %v1990_v16, %v1710_v33  ;;  %v1711_v46 = vadd.f32 %v1571_v26, %v1291_v34  ;;  %v1573_v47 = vmul.f32 0.375, %v1433_v30  ;;  %v1993_v48 = vmul.f32 0.125, %v1853_v31  ;;  %v737_v4 = vld [vmem:[#allocation2 + $0x180] sm:$0xff]  ;;  %v738_v16 = vld [vmem:[#allocation2 + $0x190] sm:$0xff]  ;;  %v739_v24 = vld [vmem:[#allocation2 + $0x198] sm:$0xff] }
  0xe1   : > { %v1712_v51 = vadd.f32 %v1572_v35, %v1292_v38  ;;  %v1293_v52 = vadd.f32 %v1153_v41, %v873_v40  ;;  %v874_v53 = vmul.f32 0.125, %v734_v36  ;;  %v1154_v54 = vmul.f32 0.375, %v1014_v37  ;;  %v1438_v22 = vld [vmem:[#allocation2 + $0x192] sm:$0xff]  ;;  %v1439_v30 = vld [vmem:[#allocation2 + $0x19a] sm:$0xff] }
  0xe2   : > { %2270 = vst.msk [vmem:[#allocation3 + $0x100] sm:$0xff] %vm189_vm0, %v2130_v45  ;;  %v2131_v58 = vadd.f32 %v1991_v27, %v1711_v46  ;;  %v1574_v59 = vmul.f32 0.375, %v1434_v42  ;;  %v1994_v60 = vmul.f32 0.125, %v1854_v43  ;;  %v875_v61 = vmul.f32 0.125, %v735_v44  ;;  %v1858_v23 = vld [vmem:[#allocation2 + $0x193] sm:$0xff]  ;;  %v1859_v35 = vld [vmem:[#allocation2 + $0x19b] sm:$0xff] }
  0xe3   : > { %v2132_v63 = vadd.f32 %v1992_v39, %v1712_v51  ;;  %v1713_v0 = vadd.f32 %v1573_v47, %v1293_v52  ;;  %v1294_v1 = vadd.f32 %v1154_v54, %v874_v53  ;;  %v1155_v2 = vmul.f32 0.375, %v1015_v49  ;;  %v1019_v29 = vld [vmem:[#allocation2 + $0x199] sm:$0xff]  ;;  %v1020_v37 = vld [vmem:[#allocation2 + $0x1a1] sm:$0xff]  ;;  %v1021_v49 = vld [vmem:[#allocation2 + $0x1a9] sm:$0xff] }
  0xe4   : > { %2271 = vst.msk [vmem:[#allocation3 + $0x108] sm:$0xff] %vm189_vm0, %v2131_v58  ;;  %v1575_v6 = vmul.f32 0.375, %v1435_v50  ;;  %v1995_v7 = vmul.f32 0.125, %v1855_v55  ;;  %v876_v8 = vmul.f32 0.125, %v736_v56  ;;  %v1156_v9 = vmul.f32 0.375, %v1016_v57  ;;  %v740_v36 = vld [vmem:[#allocation2 + $0x1a0] sm:$0xff] }
  0xe5   : > { %2272 = vst.msk [vmem:[#allocation3 + $0x110] sm:$0xff] %vm189_vm0, %v2132_v63  ;;  %v2133_v12 = vadd.f32 %v1993_v48, %v1713_v0  ;;  %v1714_v13 = vadd.f32 %v1574_v59, %v1294_v1  ;;  %v1295_v14 = vadd.f32 %v1155_v2, %v875_v61  ;;  %v1576_v15 = vmul.f32 0.375, %v1436_v62  ;;  %v1440_v42 = vld [vmem:[#allocation2 + $0x1a2] sm:$0xff]  ;;  %v1441_v54 = vld [vmem:[#allocation2 + $0x1aa] sm:$0xff]  ;;  %v1022_v61 = vld [vmem:[#allocation2 + $0x1b9] sm:$0xff] }
  0xe6   : > { %v1296_v18 = vadd.f32 %v1156_v9, %v876_v8  ;;  %v1996_v19 = vmul.f32 0.125, %v1856_v3  ;;  %v877_v20 = vmul.f32 0.125, %v737_v4  ;;  %v1157_v21 = vmul.f32 0.375, %v1017_v5  ;;  %v1860_v47 = vld [vmem:[#allocation2 + $0x1a3] sm:$0xff]  ;;  %v1861_v55 = vld [vmem:[#allocation2 + $0x1ab] sm:$0xff]  ;;  %v1442_v2 = vld [vmem:[#allocation2 + $0x1ba] sm:$0xff] }
  0xe7   : > { %2273 = vst.msk [vmem:[#allocation3 + $0x118] sm:$0xff] %vm189_vm0, %v2133_v12  ;;  %v2134_v25 = vadd.f32 %v1994_v60, %v1714_v13  ;;  %v1715_v26 = vadd.f32 %v1575_v6, %v1295_v14  ;;  %v1577_v27 = vmul.f32 0.375, %v1437_v10  ;;  %v1997_v28 = vmul.f32 0.125, %v1857_v11  ;;  %v741_v48 = vld [vmem:[#allocation2 + $0x1a8] sm:$0xff]  ;;  %v742_v60 = vld [vmem:[#allocation2 + $0x1b8] sm:$0xff]  ;;  %v743_v4 = vld [vmem:[#allocation2 + $0x1c0] sm:$0xff] }
  0xe8   : > { %v1716_v31 = vadd.f32 %v1576_v15, %v1296_v18  ;;  %v1297_v32 = vadd.f32 %v1157_v21, %v877_v20  ;;  %v878_v33 = vmul.f32 0.125, %v738_v16  ;;  %v1158_v34 = vmul.f32 0.375, %v1018_v17  ;;  %v1862_v3 = vld [vmem:[#allocation2 + $0x1bb] sm:$0xff]  ;;  %v1863_v15 = vld [vmem:[#allocation2 + $0x1c3] sm:$0xff] }
  0xe9   : > { %2274 = vst.msk [vmem:[#allocation3 + $0x120] sm:$0xff] %vm189_vm0, %v2134_v25  ;;  %v2135_v38 = vadd.f32 %v1995_v7, %v1715_v26  ;;  %v1578_v39 = vmul.f32 0.375, %v1438_v22  ;;  %v1998_v40 = vmul.f32 0.125, %v1858_v23  ;;  %v879_v41 = vmul.f32 0.125, %v739_v24  ;;  %v1023_v9 = vld [vmem:[#allocation2 + $0x1c1] sm:$0xff]  ;;  %v1024_v17 = vld [vmem:[#allocation2 + $0x1c9] sm:$0xff] }
  0xea   : > { %v2136_v43 = vadd.f32 %v1996_v19, %v1716_v31  ;;  %v1717_v44 = vadd.f32 %v1577_v27, %v1297_v32  ;;  %v1298_v45 = vadd.f32 %v1158_v34, %v878_v33  ;;  %v1159_v46 = vmul.f32 0.375, %v1019_v29  ;;  %v1443_v10 = vld [vmem:[#allocation2 + $0x1c2] sm:$0xff]  ;;  %v1444_v22 = vld [vmem:[#allocation2 + $0x1ca] sm:$0xff]  ;;  %v1445_v34 = vld [vmem:[#allocation2 + $0x1d2] sm:$0xff] }
  0xeb   : > { %2275 = vst.msk [vmem:[#allocation3 + $0x128] sm:$0xff] %vm189_vm0, %v2135_v38  ;;  %v1579_v50 = vmul.f32 0.375, %v1439_v30  ;;  %v1999_v51 = vmul.f32 0.125, %v1859_v35  ;;  %v880_v52 = vmul.f32 0.125, %v740_v36  ;;  %v1160_v53 = vmul.f32 0.375, %v1020_v37  ;;  %v744_v16 = vld [vmem:[#allocation2 + $0x1c8] sm:$0xff] }
  0xec   : > { %2276 = vst.msk [vmem:[#allocation3 + $0x130] sm:$0xff] %vm189_vm0, %v2136_v43  ;;  %v2137_v56 = vadd.f32 %v1997_v28, %v1717_v44  ;;  %v1718_v57 = vadd.f32 %v1578_v39, %v1298_v45  ;;  %v1299_v58 = vadd.f32 %v1159_v46, %v879_v41  ;;  %v1580_v59 = vmul.f32 0.375, %v1440_v42  ;;  %v1864_v27 = vld [vmem:[#allocation2 + $0x1cb] sm:$0xff]  ;;  %v1865_v35 = vld [vmem:[#allocation2 + $0x1d3] sm:$0xff]  ;;  %v1026_v41 = vld [vmem:[#allocation2 + $0x1e1] sm:$0xff] }
  0xed   : > { %v1300_v62 = vadd.f32 %v1160_v53, %v880_v52  ;;  %v2000_v63 = vmul.f32 0.125, %v1860_v47  ;;  %v881_v0 = vmul.f32 0.125, %v741_v48  ;;  %v1161_v1 = vmul.f32 0.375, %v1021_v49  ;;  %v745_v28 = vld [vmem:[#allocation2 + $0x1d0] sm:$0xff]  ;;  %v1446_v46 = vld [vmem:[#allocation2 + $0x1e2] sm:$0xff] }
  0xee   : > { %2277 = vst.msk [vmem:[#allocation3 + $0x138] sm:$0xff] %vm189_vm0, %v2137_v56  ;;  %v2138_v5 = vadd.f32 %v1998_v40, %v1718_v57  ;;  %v1719_v6 = vadd.f32 %v1579_v50, %v1299_v58  ;;  %v1581_v7 = vmul.f32 0.375, %v1441_v54  ;;  %v2001_v8 = vmul.f32 0.125, %v1861_v55  ;;  %v1025_v29 = vld [vmem:[#allocation2 + $0x1d1] sm:$0xff]  ;;  %v746_v40 = vld [vmem:[#allocation2 + $0x1e0] sm:$0xff]  ;;  %v747_v48 = vld [vmem:[#allocation2 + $0x1e8] sm:$0xff] }
  0xef   : > { %v1720_v11 = vadd.f32 %v1580_v59, %v1300_v62  ;;  %v1301_v12 = vadd.f32 %v1161_v1, %v881_v0  ;;  %v882_v13 = vmul.f32 0.125, %v742_v60  ;;  %v1162_v14 = vmul.f32 0.375, %v1022_v61  ;;  %v1866_v47 = vld [vmem:[#allocation2 + $0x1e3] sm:$0xff]  ;;  %v1867_v59 = vld [vmem:[#allocation2 + $0x1eb] sm:$0xff] }
  0xf0   : > { %2278 = vst.msk [vmem:[#allocation3 + $0x140] sm:$0xff] %vm189_vm0, %v2138_v5  ;;  %v2139_v18 = vadd.f32 %v1999_v51, %v1719_v6  ;;  %v1582_v19 = vmul.f32 0.375, %v1442_v2  ;;  %v2002_v20 = vmul.f32 0.125, %v1862_v3  ;;  %v883_v21 = vmul.f32 0.125, %v743_v4  ;;  %v1027_v53 = vld [vmem:[#allocation2 + $0x1e9] sm:$0xff]  ;;  %v1028_v61 = vld [vmem:[#allocation2 + $0x1f1] sm:$0xff] }
  0xf1   : > { %v2140_v23 = vadd.f32 %v2000_v63, %v1720_v11  ;;  %v1721_v24 = vadd.f32 %v1581_v7, %v1301_v12  ;;  %v1302_v25 = vadd.f32 %v1162_v14, %v882_v13  ;;  %v1163_v26 = vmul.f32 0.375, %v1023_v9  ;;  %v1447_v54 = vld [vmem:[#allocation2 + $0x1ea] sm:$0xff]  ;;  %v1448_v2 = vld [vmem:[#allocation2 + $0x1f2] sm:$0xff]  ;;  %v1449_v14 = vld [vmem:[#allocation2 + $0x1fa] sm:$0xff] }
  0xf2   : > { %2279 = vst.msk [vmem:[#allocation3 + $0x148] sm:$0xff] %vm189_vm0, %v2139_v18  ;;  %v1583_v30 = vmul.f32 0.375, %v1443_v10  ;;  %v2003_v31 = vmul.f32 0.125, %v1863_v15  ;;  %v884_v32 = vmul.f32 0.125, %v744_v16  ;;  %v1164_v33 = vmul.f32 0.375, %v1024_v17  ;;  %v748_v60 = vld [vmem:[#allocation2 + $0x1f0] sm:$0xff] }
  0xf3   : > { %2280 = vst.msk [vmem:[#allocation3 + $0x150] sm:$0xff] %vm189_vm0, %v2140_v23  ;;  %v2141_v36 = vadd.f32 %v2001_v8, %v1721_v24  ;;  %v1722_v37 = vadd.f32 %v1582_v19, %v1302_v25  ;;  %v1303_v38 = vadd.f32 %v1163_v26, %v883_v21  ;;  %v1584_v39 = vmul.f32 0.375, %v1444_v22  ;;  %v1868_v7 = vld [vmem:[#allocation2 + $0x1f3] sm:$0xff]  ;;  %v1869_v15 = vld [vmem:[#allocation2 + $0x1fb] sm:$0xff]  ;;  %v1030_v21 = vld [vmem:[#allocation2 + $0x209] sm:$0xff] }
  0xf4   : > { %v1304_v42 = vadd.f32 %v1164_v33, %v884_v32  ;;  %v2004_v43 = vmul.f32 0.125, %v1864_v27  ;;  %v885_v44 = vmul.f32 0.125, %v745_v28  ;;  %v1165_v45 = vmul.f32 0.375, %v1025_v29  ;;  %v749_v8 = vld [vmem:[#allocation2 + $0x1f8] sm:$0xff]  ;;  %v1450_v26 = vld [vmem:[#allocation2 + $0x20a] sm:$0xff] }
  0xf5   : > { %2281 = vst.msk [vmem:[#allocation3 + $0x158] sm:$0xff] %vm189_vm0, %v2141_v36  ;;  %v2142_v49 = vadd.f32 %v2002_v20, %v1722_v37  ;;  %v1723_v50 = vadd.f32 %v1583_v30, %v1303_v38  ;;  %v1585_v51 = vmul.f32 0.375, %v1445_v34  ;;  %v2005_v52 = vmul.f32 0.125, %v1865_v35  ;;  %v1029_v9 = vld [vmem:[#allocation2 + $0x1f9] sm:$0xff]  ;;  %v750_v20 = vld [vmem:[#allocation2 + $0x208] sm:$0xff]  ;;  %v751_v28 = vld [vmem:[#allocation2 + $0x210] sm:$0xff] }
  0xf6   : > { %v1724_v55 = vadd.f32 %v1584_v39, %v1304_v42  ;;  %v1305_v56 = vadd.f32 %v1165_v45, %v885_v44  ;;  %v886_v57 = vmul.f32 0.125, %v746_v40  ;;  %v1166_v58 = vmul.f32 0.375, %v1026_v41  ;;  %v1870_v27 = vld [vmem:[#allocation2 + $0x20b] sm:$0xff]  ;;  %v1871_v39 = vld [vmem:[#allocation2 + $0x213] sm:$0xff] }
  0xf7   : > { %2282 = vst.msk [vmem:[#allocation3 + $0x160] sm:$0xff] %vm189_vm0, %v2142_v49  ;;  %v2143_v62 = vadd.f32 %v2003_v31, %v1723_v50  ;;  %v1586_v63 = vmul.f32 0.375, %v1446_v46  ;;  %v2006_v0 = vmul.f32 0.125, %v1866_v47  ;;  %v887_v1 = vmul.f32 0.125, %v747_v48  ;;  %v1031_v33 = vld [vmem:[#allocation2 + $0x211] sm:$0xff]  ;;  %v1032_v41 = vld [vmem:[#allocation2 + $0x219] sm:$0xff] }
  0xf8   : > { %v2144_v3 = vadd.f32 %v2004_v43, %v1724_v55  ;;  %v1725_v4 = vadd.f32 %v1585_v51, %v1305_v56  ;;  %v1306_v5 = vadd.f32 %v1166_v58, %v886_v57  ;;  %v1167_v6 = vmul.f32 0.375, %v1027_v53  ;;  %v1451_v34 = vld [vmem:[#allocation2 + $0x212] sm:$0xff]  ;;  %v1452_v46 = vld [vmem:[#allocation2 + $0x21a] sm:$0xff]  ;;  %v1453_v58 = vld [vmem:[#allocation2 + $0x222] sm:$0xff] }
  0xf9   : > { %2283 = vst.msk [vmem:[#allocation3 + $0x168] sm:$0xff] %vm189_vm0, %v2143_v62  ;;  %v1587_v10 = vmul.f32 0.375, %v1447_v54  ;;  %v2007_v11 = vmul.f32 0.125, %v1867_v59  ;;  %v888_v12 = vmul.f32 0.125, %v748_v60  ;;  %v1168_v13 = vmul.f32 0.375, %v1028_v61  ;;  %v752_v40 = vld [vmem:[#allocation2 + $0x218] sm:$0xff] }
  0xfa   : > { %2284 = vst.msk [vmem:[#allocation3 + $0x170] sm:$0xff] %vm189_vm0, %v2144_v3  ;;  %v2145_v16 = vadd.f32 %v2005_v52, %v1725_v4  ;;  %v1726_v17 = vadd.f32 %v1586_v63, %v1306_v5  ;;  %v1307_v18 = vadd.f32 %v1167_v6, %v887_v1  ;;  %v1588_v19 = vmul.f32 0.375, %v1448_v2  ;;  %v1872_v51 = vld [vmem:[#allocation2 + $0x21b] sm:$0xff]  ;;  %v1873_v59 = vld [vmem:[#allocation2 + $0x223] sm:$0xff]  ;;  %v1034_v1 = vld [vmem:[#allocation2 + $0x231] sm:$0xff] }
  0xfb   : > { %v1308_v22 = vadd.f32 %v1168_v13, %v888_v12  ;;  %v2008_v23 = vmul.f32 0.125, %v1868_v7  ;;  %v889_v24 = vmul.f32 0.125, %v749_v8  ;;  %v1169_v25 = vmul.f32 0.375, %v1029_v9  ;;  %v753_v52 = vld [vmem:[#allocation2 + $0x220] sm:$0xff]  ;;  %v1454_v6 = vld [vmem:[#allocation2 + $0x232] sm:$0xff] }
  0xfc   : > { %2285 = vst.msk [vmem:[#allocation3 + $0x178] sm:$0xff] %vm189_vm0, %v2145_v16  ;;  %v2146_v29 = vadd.f32 %v2006_v0, %v1726_v17  ;;  %v1727_v30 = vadd.f32 %v1587_v10, %v1307_v18  ;;  %v1589_v31 = vmul.f32 0.375, %v1449_v14  ;;  %v2009_v32 = vmul.f32 0.125, %v1869_v15  ;;  %v1033_v53 = vld [vmem:[#allocation2 + $0x221] sm:$0xff]  ;;  %v754_v0 = vld [vmem:[#allocation2 + $0x230] sm:$0xff]  ;;  %v755_v8 = vld [vmem:[#allocation2 + $0x238] sm:$0xff] }
  0xfd   : > { %v1728_v35 = vadd.f32 %v1588_v19, %v1308_v22  ;;  %v1309_v36 = vadd.f32 %v1169_v25, %v889_v24  ;;  %v890_v37 = vmul.f32 0.125, %v750_v20  ;;  %v1170_v38 = vmul.f32 0.375, %v1030_v21  ;;  %v1874_v7 = vld [vmem:[#allocation2 + $0x233] sm:$0xff]  ;;  %v1875_v19 = vld [vmem:[#allocation2 + $0x23b] sm:$0xff] }
  0xfe   : > { %2286 = vst.msk [vmem:[#allocation3 + $0x180] sm:$0xff] %vm189_vm0, %v2146_v29  ;;  %v2147_v42 = vadd.f32 %v2007_v11, %v1727_v30  ;;  %v1590_v43 = vmul.f32 0.375, %v1450_v26  ;;  %v2010_v44 = vmul.f32 0.125, %v1870_v27  ;;  %v891_v45 = vmul.f32 0.125, %v751_v28  ;;  %v1035_v13 = vld [vmem:[#allocation2 + $0x239] sm:$0xff]  ;;  %v1036_v21 = vld [vmem:[#allocation2 + $0x241] sm:$0xff] }
  0xff   : > { %v2148_v47 = vadd.f32 %v2008_v23, %v1728_v35  ;;  %v1729_v48 = vadd.f32 %v1589_v31, %v1309_v36  ;;  %v1310_v49 = vadd.f32 %v1170_v38, %v890_v37  ;;  %v1171_v50 = vmul.f32 0.375, %v1031_v33  ;;  %v1455_v14 = vld [vmem:[#allocation2 + $0x23a] sm:$0xff]  ;;  %v1456_v26 = vld [vmem:[#allocation2 + $0x242] sm:$0xff]  ;;  %v1457_v38 = vld [vmem:[#allocation2 + $0x24a] sm:$0xff] }
 0x100   : > { %2287 = vst.msk [vmem:[#allocation3 + $0x188] sm:$0xff] %vm189_vm0, %v2147_v42  ;;  %v1591_v54 = vmul.f32 0.375, %v1451_v34  ;;  %v2011_v55 = vmul.f32 0.125, %v1871_v39  ;;  %v892_v56 = vmul.f32 0.125, %v752_v40  ;;  %v1172_v57 = vmul.f32 0.375, %v1032_v41  ;;  %v756_v20 = vld [vmem:[#allocation2 + $0x240] sm:$0xff] }
 0x101   : > { %2288 = vst.msk [vmem:[#allocation3 + $0x190] sm:$0xff] %vm189_vm0, %v2148_v47  ;;  %v2149_v60 = vadd.f32 %v2009_v32, %v1729_v48  ;;  %v1730_v61 = vadd.f32 %v1590_v43, %v1310_v49  ;;  %v1311_v62 = vadd.f32 %v1171_v50, %v891_v45  ;;  %v1592_v63 = vmul.f32 0.375, %v1452_v46  ;;  %v1876_v31 = vld [vmem:[#allocation2 + $0x243] sm:$0xff]  ;;  %v1877_v39 = vld [vmem:[#allocation2 + $0x24b] sm:$0xff]  ;;  %v1038_v45 = vld [vmem:[#allocation2 + $0x259] sm:$0xff] }
 0x102   : > { %v1312_v2 = vadd.f32 %v1172_v57, %v892_v56  ;;  %v2012_v3 = vmul.f32 0.125, %v1872_v51  ;;  %v893_v4 = vmul.f32 0.125, %v753_v52  ;;  %v1173_v5 = vmul.f32 0.375, %v1033_v53  ;;  %v757_v32 = vld [vmem:[#allocation2 + $0x248] sm:$0xff]  ;;  %v1458_v50 = vld [vmem:[#allocation2 + $0x25a] sm:$0xff] }
 0x103   : > { %2289 = vst.msk [vmem:[#allocation3 + $0x198] sm:$0xff] %vm189_vm0, %v2149_v60  ;;  %v2150_v9 = vadd.f32 %v2010_v44, %v1730_v61  ;;  %v1731_v10 = vadd.f32 %v1591_v54, %v1311_v62  ;;  %v1593_v11 = vmul.f32 0.375, %v1453_v58  ;;  %v2013_v12 = vmul.f32 0.125, %v1873_v59  ;;  %v1037_v33 = vld [vmem:[#allocation2 + $0x249] sm:$0xff]  ;;  %v758_v44 = vld [vmem:[#allocation2 + $0x258] sm:$0xff]  ;;  %v759_v52 = vld [vmem:[#allocation2 + $0x260] sm:$0xff] }
 0x104   : > { %v1732_v15 = vadd.f32 %v1592_v63, %v1312_v2  ;;  %v1313_v16 = vadd.f32 %v1173_v5, %v893_v4  ;;  %v894_v17 = vmul.f32 0.125, %v754_v0  ;;  %v1174_v18 = vmul.f32 0.375, %v1034_v1  ;;  %v1878_v51 = vld [vmem:[#allocation2 + $0x25b] sm:$0xff]  ;;  %v1879_v63 = vld [vmem:[#allocation2 + $0x263] sm:$0xff] }
 0x105   : > { %2290 = vst.msk [vmem:[#allocation3 + $0x1a0] sm:$0xff] %vm189_vm0, %v2150_v9  ;;  %v2151_v22 = vadd.f32 %v2011_v55, %v1731_v10  ;;  %v1594_v23 = vmul.f32 0.375, %v1454_v6  ;;  %v2014_v24 = vmul.f32 0.125, %v1874_v7  ;;  %v895_v25 = vmul.f32 0.125, %v755_v8  ;;  %v1039_v57 = vld [vmem:[#allocation2 + $0x261] sm:$0xff]  ;;  %v1040_v1 = vld [vmem:[#allocation2 + $0x269] sm:$0xff] }
 0x106   : > { %v2152_v27 = vadd.f32 %v2012_v3, %v1732_v15  ;;  %v1733_v28 = vadd.f32 %v1593_v11, %v1313_v16  ;;  %v1314_v29 = vadd.f32 %v1174_v18, %v894_v17  ;;  %v1175_v30 = vmul.f32 0.375, %v1035_v13  ;;  %v1459_v58 = vld [vmem:[#allocation2 + $0x262] sm:$0xff]  ;;  %v1460_v6 = vld [vmem:[#allocation2 + $0x26a] sm:$0xff]  ;;  %v1461_v18 = vld [vmem:[#allocation2 + $0x272] sm:$0xff] }
 0x107   : > { %2291 = vst.msk [vmem:[#allocation3 + $0x1a8] sm:$0xff] %vm189_vm0, %v2151_v22  ;;  %v1595_v34 = vmul.f32 0.375, %v1455_v14  ;;  %v2015_v35 = vmul.f32 0.125, %v1875_v19  ;;  %v896_v36 = vmul.f32 0.125, %v756_v20  ;;  %v1176_v37 = vmul.f32 0.375, %v1036_v21  ;;  %v760_v0 = vld [vmem:[#allocation2 + $0x268] sm:$0xff] }
 0x108   : > { %2292 = vst.msk [vmem:[#allocation3 + $0x1b0] sm:$0xff] %vm189_vm0, %v2152_v27  ;;  %v2153_v40 = vadd.f32 %v2013_v12, %v1733_v28  ;;  %v1734_v41 = vadd.f32 %v1594_v23, %v1314_v29  ;;  %v1315_v42 = vadd.f32 %v1175_v30, %v895_v25  ;;  %v1596_v43 = vmul.f32 0.375, %v1456_v26  ;;  %v1880_v11 = vld [vmem:[#allocation2 + $0x26b] sm:$0xff]  ;;  %v1881_v19 = vld [vmem:[#allocation2 + $0x273] sm:$0xff]  ;;  %v1042_v25 = vld [vmem:[#allocation2 + $0x281] sm:$0xff] }
 0x109   : > { %v1316_v46 = vadd.f32 %v1176_v37, %v896_v36  ;;  %v2016_v47 = vmul.f32 0.125, %v1876_v31  ;;  %v897_v48 = vmul.f32 0.125, %v757_v32  ;;  %v1177_v49 = vmul.f32 0.375, %v1037_v33  ;;  %v761_v12 = vld [vmem:[#allocation2 + $0x270] sm:$0xff]  ;;  %v1462_v30 = vld [vmem:[#allocation2 + $0x282] sm:$0xff] }
 0x10a   : > { %2293 = vst.msk [vmem:[#allocation3 + $0x1b8] sm:$0xff] %vm189_vm0, %v2153_v40  ;;  %v2154_v53 = vadd.f32 %v2014_v24, %v1734_v41  ;;  %v1735_v54 = vadd.f32 %v1595_v34, %v1315_v42  ;;  %v1597_v55 = vmul.f32 0.375, %v1457_v38  ;;  %v2017_v56 = vmul.f32 0.125, %v1877_v39  ;;  %v1041_v13 = vld [vmem:[#allocation2 + $0x271] sm:$0xff]  ;;  %v762_v24 = vld [vmem:[#allocation2 + $0x280] sm:$0xff]  ;;  %v763_v32 = vld [vmem:[#allocation2 + $0x288] sm:$0xff] }
 0x10b   : > { %v1736_v59 = vadd.f32 %v1596_v43, %v1316_v46  ;;  %v1317_v60 = vadd.f32 %v1177_v49, %v897_v48  ;;  %v898_v61 = vmul.f32 0.125, %v758_v44  ;;  %v1178_v62 = vmul.f32 0.375, %v1038_v45  ;;  %v1882_v31 = vld [vmem:[#allocation2 + $0x283] sm:$0xff]  ;;  %v1883_v43 = vld [vmem:[#allocation2 + $0x28b] sm:$0xff] }
 0x10c   : > { %2294 = vst.msk [vmem:[#allocation3 + $0x1c0] sm:$0xff] %vm189_vm0, %v2154_v53  ;;  %v2155_v2 = vadd.f32 %v2015_v35, %v1735_v54  ;;  %v1598_v3 = vmul.f32 0.375, %v1458_v50  ;;  %v2018_v4 = vmul.f32 0.125, %v1878_v51  ;;  %v899_v5 = vmul.f32 0.125, %v759_v52  ;;  %v1043_v37 = vld [vmem:[#allocation2 + $0x289] sm:$0xff]  ;;  %v1044_v45 = vld [vmem:[#allocation2 + $0x291] sm:$0xff] }
 0x10d   : > { %v2156_v7 = vadd.f32 %v2016_v47, %v1736_v59  ;;  %v1737_v8 = vadd.f32 %v1597_v55, %v1317_v60  ;;  %v1318_v9 = vadd.f32 %v1178_v62, %v898_v61  ;;  %v1179_v10 = vmul.f32 0.375, %v1039_v57  ;;  %v1463_v38 = vld [vmem:[#allocation2 + $0x28a] sm:$0xff]  ;;  %v1464_v50 = vld [vmem:[#allocation2 + $0x292] sm:$0xff]  ;;  %v1465_v62 = vld [vmem:[#allocation2 + $0x29a] sm:$0xff] }
 0x10e   : > { %2295 = vst.msk [vmem:[#allocation3 + $0x1c8] sm:$0xff] %vm189_vm0, %v2155_v2  ;;  %v1599_v14 = vmul.f32 0.375, %v1459_v58  ;;  %v2019_v15 = vmul.f32 0.125, %v1879_v63  ;;  %v900_v16 = vmul.f32 0.125, %v760_v0  ;;  %v1180_v17 = vmul.f32 0.375, %v1040_v1  ;;  %v764_v44 = vld [vmem:[#allocation2 + $0x290] sm:$0xff] }
 0x10f   : > { %2296 = vst.msk [vmem:[#allocation3 + $0x1d0] sm:$0xff] %vm189_vm0, %v2156_v7  ;;  %v2157_v20 = vadd.f32 %v2017_v56, %v1737_v8  ;;  %v1738_v21 = vadd.f32 %v1598_v3, %v1318_v9  ;;  %v1319_v22 = vadd.f32 %v1179_v10, %v899_v5  ;;  %v1600_v23 = vmul.f32 0.375, %v1460_v6  ;;  %v1884_v55 = vld [vmem:[#allocation2 + $0x293] sm:$0xff]  ;;  %v1885_v63 = vld [vmem:[#allocation2 + $0x29b] sm:$0xff]  ;;  %v1046_v5 = vld [vmem:[#allocation2 + $0x2a9] sm:$0xff] }
 0x110   : > { %v1320_v26 = vadd.f32 %v1180_v17, %v900_v16  ;;  %v2020_v27 = vmul.f32 0.125, %v1880_v11  ;;  %v901_v28 = vmul.f32 0.125, %v761_v12  ;;  %v1181_v29 = vmul.f32 0.375, %v1041_v13  ;;  %v765_v56 = vld [vmem:[#allocation2 + $0x298] sm:$0xff]  ;;  %v1466_v10 = vld [vmem:[#allocation2 + $0x2aa] sm:$0xff] }
 0x111   : > { %2297 = vst.msk [vmem:[#allocation3 + $0x1d8] sm:$0xff] %vm189_vm0, %v2157_v20  ;;  %v2158_v33 = vadd.f32 %v2018_v4, %v1738_v21  ;;  %v1739_v34 = vadd.f32 %v1599_v14, %v1319_v22  ;;  %v1601_v35 = vmul.f32 0.375, %v1461_v18  ;;  %v2021_v36 = vmul.f32 0.125, %v1881_v19  ;;  %v1045_v57 = vld [vmem:[#allocation2 + $0x299] sm:$0xff]  ;;  %v766_v4 = vld [vmem:[#allocation2 + $0x2a8] sm:$0xff]  ;;  %v767_v12 = vld [vmem:[#allocation2 + $0x2b0] sm:$0xff] }
 0x112   : > { %v1740_v39 = vadd.f32 %v1600_v23, %v1320_v26  ;;  %v1321_v40 = vadd.f32 %v1181_v29, %v901_v28  ;;  %v902_v41 = vmul.f32 0.125, %v762_v24  ;;  %v1182_v42 = vmul.f32 0.375, %v1042_v25  ;;  %v1886_v11 = vld [vmem:[#allocation2 + $0x2ab] sm:$0xff]  ;;  %v1887_v23 = vld [vmem:[#allocation2 + $0x2b3] sm:$0xff] }
 0x113   : > { %2298 = vst.msk [vmem:[#allocation3 + $0x1e0] sm:$0xff] %vm189_vm0, %v2158_v33  ;;  %v2159_v46 = vadd.f32 %v2019_v15, %v1739_v34  ;;  %v1602_v47 = vmul.f32 0.375, %v1462_v30  ;;  %v2022_v48 = vmul.f32 0.125, %v1882_v31  ;;  %v903_v49 = vmul.f32 0.125, %v763_v32  ;;  %v1047_v17 = vld [vmem:[#allocation2 + $0x2b1] sm:$0xff]  ;;  %v1048_v25 = vld [vmem:[#allocation2 + $0x2b9] sm:$0xff] }
 0x114   : > { %v2160_v51 = vadd.f32 %v2020_v27, %v1740_v39  ;;  %v1741_v52 = vadd.f32 %v1601_v35, %v1321_v40  ;;  %v1322_v53 = vadd.f32 %v1182_v42, %v902_v41  ;;  %v1183_v54 = vmul.f32 0.375, %v1043_v37  ;;  %v1467_v18 = vld [vmem:[#allocation2 + $0x2b2] sm:$0xff]  ;;  %v1468_v30 = vld [vmem:[#allocation2 + $0x2ba] sm:$0xff]  ;;  %v1469_v42 = vld [vmem:[#allocation2 + $0x2c2] sm:$0xff] }
 0x115   : > { %2299 = vst.msk [vmem:[#allocation3 + $0x1e8] sm:$0xff] %vm189_vm0, %v2159_v46  ;;  %v1603_v58 = vmul.f32 0.375, %v1463_v38  ;;  %v2023_v59 = vmul.f32 0.125, %v1883_v43  ;;  %v904_v60 = vmul.f32 0.125, %v764_v44  ;;  %v1184_v61 = vmul.f32 0.375, %v1044_v45  ;;  %v768_v24 = vld [vmem:[#allocation2 + $0x2b8] sm:$0xff] }
 0x116   : > { %2300 = vst.msk [vmem:[#allocation3 + $0x1f0] sm:$0xff] %vm189_vm0, %v2160_v51  ;;  %v2161_v0 = vadd.f32 %v2021_v36, %v1741_v52  ;;  %v1742_v1 = vadd.f32 %v1602_v47, %v1322_v53  ;;  %v1323_v2 = vadd.f32 %v1183_v54, %v903_v49  ;;  %v1604_v3 = vmul.f32 0.375, %v1464_v50  ;;  %v1888_v35 = vld [vmem:[#allocation2 + $0x2bb] sm:$0xff]  ;;  %v1889_v43 = vld [vmem:[#allocation2 + $0x2c3] sm:$0xff]  ;;  %v1050_v49 = vld [vmem:[#allocation2 + $0x2d1] sm:$0xff] }
 0x117   : > { %v1324_v6 = vadd.f32 %v1184_v61, %v904_v60  ;;  %v2024_v7 = vmul.f32 0.125, %v1884_v55  ;;  %v905_v8 = vmul.f32 0.125, %v765_v56  ;;  %v1185_v9 = vmul.f32 0.375, %v1045_v57  ;;  %v769_v36 = vld [vmem:[#allocation2 + $0x2c0] sm:$0xff]  ;;  %v1470_v54 = vld [vmem:[#allocation2 + $0x2d2] sm:$0xff] }
 0x118   : > { %2301 = vst.msk [vmem:[#allocation3 + $0x1f8] sm:$0xff] %vm189_vm0, %v2161_v0  ;;  %v2162_v13 = vadd.f32 %v2022_v48, %v1742_v1  ;;  %v1743_v14 = vadd.f32 %v1603_v58, %v1323_v2  ;;  %v1605_v15 = vmul.f32 0.375, %v1465_v62  ;;  %v2025_v16 = vmul.f32 0.125, %v1885_v63  ;;  %v1049_v37 = vld [vmem:[#allocation2 + $0x2c1] sm:$0xff]  ;;  %v770_v48 = vld [vmem:[#allocation2 + $0x2d0] sm:$0xff]  ;;  %v771_v56 = vld [vmem:[#allocation2 + $0x2d8] sm:$0xff] }
 0x119   : > { %v1744_v19 = vadd.f32 %v1604_v3, %v1324_v6  ;;  %v1325_v20 = vadd.f32 %v1185_v9, %v905_v8  ;;  %v906_v21 = vmul.f32 0.125, %v766_v4  ;;  %v1186_v22 = vmul.f32 0.375, %v1046_v5  ;;  %v1890_v55 = vld [vmem:[#allocation2 + $0x2d3] sm:$0xff]  ;;  %v1891_v3 = vld [vmem:[#allocation2 + $0x2db] sm:$0xff] }
 0x11a   : > { %2302 = vst.msk [vmem:[#allocation3 + $0x200] sm:$0xff] %vm189_vm0, %v2162_v13  ;;  %v2163_v26 = vadd.f32 %v2023_v59, %v1743_v14  ;;  %v1606_v27 = vmul.f32 0.375, %v1466_v10  ;;  %v2026_v28 = vmul.f32 0.125, %v1886_v11  ;;  %v907_v29 = vmul.f32 0.125, %v767_v12  ;;  %v1051_v61 = vld [vmem:[#allocation2 + $0x2d9] sm:$0xff]  ;;  %v1052_v5 = vld [vmem:[#allocation2 + $0x2e1] sm:$0xff] }
 0x11b   : > { %v2164_v31 = vadd.f32 %v2024_v7, %v1744_v19  ;;  %v1745_v32 = vadd.f32 %v1605_v15, %v1325_v20  ;;  %v1326_v33 = vadd.f32 %v1186_v22, %v906_v21  ;;  %v1187_v34 = vmul.f32 0.375, %v1047_v17  ;;  %v1471_v62 = vld [vmem:[#allocation2 + $0x2da] sm:$0xff]  ;;  %v1472_v10 = vld [vmem:[#allocation2 + $0x2e2] sm:$0xff]  ;;  %v1473_v22 = vld [vmem:[#allocation2 + $0x2ea] sm:$0xff] }
 0x11c   : > { %2303 = vst.msk [vmem:[#allocation3 + $0x208] sm:$0xff] %vm189_vm0, %v2163_v26  ;;  %v1607_v38 = vmul.f32 0.375, %v1467_v18  ;;  %v2027_v39 = vmul.f32 0.125, %v1887_v23  ;;  %v908_v40 = vmul.f32 0.125, %v768_v24  ;;  %v1188_v41 = vmul.f32 0.375, %v1048_v25  ;;  %v772_v4 = vld [vmem:[#allocation2 + $0x2e0] sm:$0xff] }
 0x11d   : > { %2304 = vst.msk [vmem:[#allocation3 + $0x210] sm:$0xff] %vm189_vm0, %v2164_v31  ;;  %v2165_v44 = vadd.f32 %v2025_v16, %v1745_v32  ;;  %v1746_v45 = vadd.f32 %v1606_v27, %v1326_v33  ;;  %v1327_v46 = vadd.f32 %v1187_v34, %v907_v29  ;;  %v1608_v47 = vmul.f32 0.375, %v1468_v30  ;;  %v1892_v15 = vld [vmem:[#allocation2 + $0x2e3] sm:$0xff]  ;;  %v1893_v23 = vld [vmem:[#allocation2 + $0x2eb] sm:$0xff]  ;;  %v1054_v29 = vld [vmem:[#allocation2 + $0x2f9] sm:$0xff] }
 0x11e   : > { %v1328_v50 = vadd.f32 %v1188_v41, %v908_v40  ;;  %v2028_v51 = vmul.f32 0.125, %v1888_v35  ;;  %v909_v52 = vmul.f32 0.125, %v769_v36  ;;  %v1189_v53 = vmul.f32 0.375, %v1049_v37  ;;  %v773_v16 = vld [vmem:[#allocation2 + $0x2e8] sm:$0xff]  ;;  %v1474_v34 = vld [vmem:[#allocation2 + $0x2fa] sm:$0xff] }
 0x11f   : > { %2305 = vst.msk [vmem:[#allocation3 + $0x218] sm:$0xff] %vm189_vm0, %v2165_v44  ;;  %v2166_v57 = vadd.f32 %v2026_v28, %v1746_v45  ;;  %v1747_v58 = vadd.f32 %v1607_v38, %v1327_v46  ;;  %v1609_v59 = vmul.f32 0.375, %v1469_v42  ;;  %v2029_v60 = vmul.f32 0.125, %v1889_v43  ;;  %v1053_v17 = vld [vmem:[#allocation2 + $0x2e9] sm:$0xff]  ;;  %v774_v28 = vld [vmem:[#allocation2 + $0x2f8] sm:$0xff]  ;;  %v775_v36 = vld [vmem:[#allocation2 + $0x300] sm:$0xff] }
 0x120   : > { %v1748_v63 = vadd.f32 %v1608_v47, %v1328_v50  ;;  %v1329_v0 = vadd.f32 %v1189_v53, %v909_v52  ;;  %v910_v1 = vmul.f32 0.125, %v770_v48  ;;  %v1190_v2 = vmul.f32 0.375, %v1050_v49  ;;  %v1894_v35 = vld [vmem:[#allocation2 + $0x2fb] sm:$0xff]  ;;  %v1895_v47 = vld [vmem:[#allocation2 + $0x303] sm:$0xff] }
 0x121   : > { %2306 = vst.msk [vmem:[#allocation3 + $0x220] sm:$0xff] %vm189_vm0, %v2166_v57  ;;  %v2167_v6 = vadd.f32 %v2027_v39, %v1747_v58  ;;  %v1610_v7 = vmul.f32 0.375, %v1470_v54  ;;  %v2030_v8 = vmul.f32 0.125, %v1890_v55  ;;  %v911_v9 = vmul.f32 0.125, %v771_v56  ;;  %v1055_v41 = vld [vmem:[#allocation2 + $0x301] sm:$0xff]  ;;  %v1056_v49 = vld [vmem:[#allocation2 + $0x309] sm:$0xff] }
 0x122   : > { %v2168_v11 = vadd.f32 %v2028_v51, %v1748_v63  ;;  %v1749_v12 = vadd.f32 %v1609_v59, %v1329_v0  ;;  %v1330_v13 = vadd.f32 %v1190_v2, %v910_v1  ;;  %v1191_v14 = vmul.f32 0.375, %v1051_v61  ;;  %v1475_v42 = vld [vmem:[#allocation2 + $0x302] sm:$0xff]  ;;  %v1476_v54 = vld [vmem:[#allocation2 + $0x30a] sm:$0xff]  ;;  %v1477_v2 = vld [vmem:[#allocation2 + $0x312] sm:$0xff] }
 0x123   : > { %2307 = vst.msk [vmem:[#allocation3 + $0x228] sm:$0xff] %vm189_vm0, %v2167_v6  ;;  %v1611_v18 = vmul.f32 0.375, %v1471_v62  ;;  %v2031_v19 = vmul.f32 0.125, %v1891_v3  ;;  %v912_v20 = vmul.f32 0.125, %v772_v4  ;;  %v1192_v21 = vmul.f32 0.375, %v1052_v5  ;;  %v776_v48 = vld [vmem:[#allocation2 + $0x308] sm:$0xff] }
 0x124   : > { %2308 = vst.msk [vmem:[#allocation3 + $0x230] sm:$0xff] %vm189_vm0, %v2168_v11  ;;  %v2169_v24 = vadd.f32 %v2029_v60, %v1749_v12  ;;  %v1750_v25 = vadd.f32 %v1610_v7, %v1330_v13  ;;  %v1331_v26 = vadd.f32 %v1191_v14, %v911_v9  ;;  %v1612_v27 = vmul.f32 0.375, %v1472_v10  ;;  %v1896_v59 = vld [vmem:[#allocation2 + $0x30b] sm:$0xff]  ;;  %v1897_v3 = vld [vmem:[#allocation2 + $0x313] sm:$0xff]  ;;  %v1058_v9 = vld [vmem:[#allocation2 + $0x321] sm:$0xff] }
 0x125   : > { %v1332_v30 = vadd.f32 %v1192_v21, %v912_v20  ;;  %v2032_v31 = vmul.f32 0.125, %v1892_v15  ;;  %v913_v32 = vmul.f32 0.125, %v773_v16  ;;  %v1193_v33 = vmul.f32 0.375, %v1053_v17  ;;  %v777_v60 = vld [vmem:[#allocation2 + $0x310] sm:$0xff]  ;;  %v1478_v14 = vld [vmem:[#allocation2 + $0x322] sm:$0xff] }
 0x126   : > { %2309 = vst.msk [vmem:[#allocation3 + $0x238] sm:$0xff] %vm189_vm0, %v2169_v24  ;;  %v2170_v37 = vadd.f32 %v2030_v8, %v1750_v25  ;;  %v1751_v38 = vadd.f32 %v1611_v18, %v1331_v26  ;;  %v1613_v39 = vmul.f32 0.375, %v1473_v22  ;;  %v2033_v40 = vmul.f32 0.125, %v1893_v23  ;;  %v1057_v61 = vld [vmem:[#allocation2 + $0x311] sm:$0xff]  ;;  %v778_v8 = vld [vmem:[#allocation2 + $0x320] sm:$0xff]  ;;  %v779_v16 = vld [vmem:[#allocation2 + $0x328] sm:$0xff] }
 0x127   : > { %v1752_v43 = vadd.f32 %v1612_v27, %v1332_v30  ;;  %v1333_v44 = vadd.f32 %v1193_v33, %v913_v32  ;;  %v914_v45 = vmul.f32 0.125, %v774_v28  ;;  %v1194_v46 = vmul.f32 0.375, %v1054_v29  ;;  %v1898_v15 = vld [vmem:[#allocation2 + $0x323] sm:$0xff]  ;;  %v1899_v27 = vld [vmem:[#allocation2 + $0x32b] sm:$0xff] }
 0x128   : > { %2310 = vst.msk [vmem:[#allocation3 + $0x240] sm:$0xff] %vm189_vm0, %v2170_v37  ;;  %v2171_v50 = vadd.f32 %v2031_v19, %v1751_v38  ;;  %v1614_v51 = vmul.f32 0.375, %v1474_v34  ;;  %v2034_v52 = vmul.f32 0.125, %v1894_v35  ;;  %v915_v53 = vmul.f32 0.125, %v775_v36  ;;  %v1059_v21 = vld [vmem:[#allocation2 + $0x329] sm:$0xff]  ;;  %v1060_v29 = vld [vmem:[#allocation2 + $0x331] sm:$0xff] }
 0x129   : > { %v2172_v55 = vadd.f32 %v2032_v31, %v1752_v43  ;;  %v1753_v56 = vadd.f32 %v1613_v39, %v1333_v44  ;;  %v1334_v57 = vadd.f32 %v1194_v46, %v914_v45  ;;  %v1195_v58 = vmul.f32 0.375, %v1055_v41  ;;  %v1479_v22 = vld [vmem:[#allocation2 + $0x32a] sm:$0xff]  ;;  %v1480_v34 = vld [vmem:[#allocation2 + $0x332] sm:$0xff]  ;;  %v1481_v46 = vld [vmem:[#allocation2 + $0x33a] sm:$0xff] }
 0x12a   : > { %2311 = vst.msk [vmem:[#allocation3 + $0x248] sm:$0xff] %vm189_vm0, %v2171_v50  ;;  %v1615_v62 = vmul.f32 0.375, %v1475_v42  ;;  %v2035_v63 = vmul.f32 0.125, %v1895_v47  ;;  %v916_v0 = vmul.f32 0.125, %v776_v48  ;;  %v1196_v1 = vmul.f32 0.375, %v1056_v49  ;;  %v780_v28 = vld [vmem:[#allocation2 + $0x330] sm:$0xff] }
 0x12b   : > { %2312 = vst.msk [vmem:[#allocation3 + $0x250] sm:$0xff] %vm189_vm0, %v2172_v55  ;;  %v2173_v4 = vadd.f32 %v2033_v40, %v1753_v56  ;;  %v1754_v5 = vadd.f32 %v1614_v51, %v1334_v57  ;;  %v1335_v6 = vadd.f32 %v1195_v58, %v915_v53  ;;  %v1616_v7 = vmul.f32 0.375, %v1476_v54  ;;  %v1900_v39 = vld [vmem:[#allocation2 + $0x333] sm:$0xff]  ;;  %v1901_v47 = vld [vmem:[#allocation2 + $0x33b] sm:$0xff]  ;;  %v1062_v53 = vld [vmem:[#allocation2 + $0x349] sm:$0xff] }
 0x12c   : > { %v1336_v10 = vadd.f32 %v1196_v1, %v916_v0  ;;  %v2036_v11 = vmul.f32 0.125, %v1896_v59  ;;  %v917_v12 = vmul.f32 0.125, %v777_v60  ;;  %v1197_v13 = vmul.f32 0.375, %v1057_v61  ;;  %v781_v40 = vld [vmem:[#allocation2 + $0x338] sm:$0xff]  ;;  %v1482_v58 = vld [vmem:[#allocation2 + $0x34a] sm:$0xff] }
 0x12d   : > { %2313 = vst.msk [vmem:[#allocation3 + $0x258] sm:$0xff] %vm189_vm0, %v2173_v4  ;;  %v2174_v17 = vadd.f32 %v2034_v52, %v1754_v5  ;;  %v1755_v18 = vadd.f32 %v1615_v62, %v1335_v6  ;;  %v1617_v19 = vmul.f32 0.375, %v1477_v2  ;;  %v2037_v20 = vmul.f32 0.125, %v1897_v3  ;;  %v1061_v41 = vld [vmem:[#allocation2 + $0x339] sm:$0xff]  ;;  %v782_v52 = vld [vmem:[#allocation2 + $0x348] sm:$0xff]  ;;  %v783_v60 = vld [vmem:[#allocation2 + $0x350] sm:$0xff] }
 0x12e   : > { %v1756_v23 = vadd.f32 %v1616_v7, %v1336_v10  ;;  %v1337_v24 = vadd.f32 %v1197_v13, %v917_v12  ;;  %v918_v25 = vmul.f32 0.125, %v778_v8  ;;  %v1198_v26 = vmul.f32 0.375, %v1058_v9  ;;  %v1902_v59 = vld [vmem:[#allocation2 + $0x34b] sm:$0xff]  ;;  %v1903_v7 = vld [vmem:[#allocation2 + $0x353] sm:$0xff] }
 0x12f   : > { %2314 = vst.msk [vmem:[#allocation3 + $0x260] sm:$0xff] %vm189_vm0, %v2174_v17  ;;  %v2175_v30 = vadd.f32 %v2035_v63, %v1755_v18  ;;  %v1618_v31 = vmul.f32 0.375, %v1478_v14  ;;  %v2038_v32 = vmul.f32 0.125, %v1898_v15  ;;  %v919_v33 = vmul.f32 0.125, %v779_v16  ;;  %v1063_v1 = vld [vmem:[#allocation2 + $0x351] sm:$0xff]  ;;  %v1064_v9 = vld [vmem:[#allocation2 + $0x359] sm:$0xff] }
 0x130   : > { %v2176_v35 = vadd.f32 %v2036_v11, %v1756_v23  ;;  %v1757_v36 = vadd.f32 %v1617_v19, %v1337_v24  ;;  %v1338_v37 = vadd.f32 %v1198_v26, %v918_v25  ;;  %v1199_v38 = vmul.f32 0.375, %v1059_v21  ;;  %v1483_v2 = vld [vmem:[#allocation2 + $0x352] sm:$0xff]  ;;  %v1484_v14 = vld [vmem:[#allocation2 + $0x35a] sm:$0xff]  ;;  %v1485_v26 = vld [vmem:[#allocation2 + $0x362] sm:$0xff] }
 0x131   : > { %2315 = vst.msk [vmem:[#allocation3 + $0x268] sm:$0xff] %vm189_vm0, %v2175_v30  ;;  %v1619_v42 = vmul.f32 0.375, %v1479_v22  ;;  %v2039_v43 = vmul.f32 0.125, %v1899_v27  ;;  %v920_v44 = vmul.f32 0.125, %v780_v28  ;;  %v1200_v45 = vmul.f32 0.375, %v1060_v29  ;;  %v784_v8 = vld [vmem:[#allocation2 + $0x358] sm:$0xff] }
 0x132   : > { %2316 = vst.msk [vmem:[#allocation3 + $0x270] sm:$0xff] %vm189_vm0, %v2176_v35  ;;  %v2177_v48 = vadd.f32 %v2037_v20, %v1757_v36  ;;  %v1758_v49 = vadd.f32 %v1618_v31, %v1338_v37  ;;  %v1339_v50 = vadd.f32 %v1199_v38, %v919_v33  ;;  %v1620_v51 = vmul.f32 0.375, %v1480_v34  ;;  %v1904_v19 = vld [vmem:[#allocation2 + $0x35b] sm:$0xff]  ;;  %v1905_v27 = vld [vmem:[#allocation2 + $0x363] sm:$0xff]  ;;  %v1066_v33 = vld [vmem:[#allocation2 + $0x371] sm:$0xff] }
 0x133   : > { %v1340_v54 = vadd.f32 %v1200_v45, %v920_v44  ;;  %v2040_v55 = vmul.f32 0.125, %v1900_v39  ;;  %v921_v56 = vmul.f32 0.125, %v781_v40  ;;  %v1201_v57 = vmul.f32 0.375, %v1061_v41  ;;  %v785_v20 = vld [vmem:[#allocation2 + $0x360] sm:$0xff]  ;;  %v1486_v38 = vld [vmem:[#allocation2 + $0x372] sm:$0xff] }
 0x134   : > { %2317 = vst.msk [vmem:[#allocation3 + $0x278] sm:$0xff] %vm189_vm0, %v2177_v48  ;;  %v2178_v61 = vadd.f32 %v2038_v32, %v1758_v49  ;;  %v1759_v62 = vadd.f32 %v1619_v42, %v1339_v50  ;;  %v1621_v63 = vmul.f32 0.375, %v1481_v46  ;;  %v2041_v0 = vmul.f32 0.125, %v1901_v47  ;;  %v1065_v21 = vld [vmem:[#allocation2 + $0x361] sm:$0xff]  ;;  %v786_v32 = vld [vmem:[#allocation2 + $0x370] sm:$0xff]  ;;  %v787_v40 = vld [vmem:[#allocation2 + $0x378] sm:$0xff] }
 0x135   : > { %v1760_v3 = vadd.f32 %v1620_v51, %v1340_v54  ;;  %v1341_v4 = vadd.f32 %v1201_v57, %v921_v56  ;;  %v922_v5 = vmul.f32 0.125, %v782_v52  ;;  %v1202_v6 = vmul.f32 0.375, %v1062_v53  ;;  %v1906_v39 = vld [vmem:[#allocation2 + $0x373] sm:$0xff]  ;;  %v1907_v51 = vld [vmem:[#allocation2 + $0x37b] sm:$0xff] }
 0x136   : > { %2318 = vst.msk [vmem:[#allocation3 + $0x280] sm:$0xff] %vm189_vm0, %v2178_v61  ;;  %v2179_v10 = vadd.f32 %v2039_v43, %v1759_v62  ;;  %v1622_v11 = vmul.f32 0.375, %v1482_v58  ;;  %v2042_v12 = vmul.f32 0.125, %v1902_v59  ;;  %v923_v13 = vmul.f32 0.125, %v783_v60  ;;  %v1067_v45 = vld [vmem:[#allocation2 + $0x379] sm:$0xff]  ;;  %v1068_v53 = vld [vmem:[#allocation2 + $0x381] sm:$0xff] }
 0x137   : > { %v2180_v15 = vadd.f32 %v2040_v55, %v1760_v3  ;;  %v1761_v16 = vadd.f32 %v1621_v63, %v1341_v4  ;;  %v1342_v17 = vadd.f32 %v1202_v6, %v922_v5  ;;  %v1203_v18 = vmul.f32 0.375, %v1063_v1  ;;  %v1487_v46 = vld [vmem:[#allocation2 + $0x37a] sm:$0xff]  ;;  %v1488_v58 = vld [vmem:[#allocation2 + $0x382] sm:$0xff]  ;;  %v1489_v6 = vld [vmem:[#allocation2 + $0x38a] sm:$0xff] }
 0x138   : > { %2319 = vst.msk [vmem:[#allocation3 + $0x288] sm:$0xff] %vm189_vm0, %v2179_v10  ;;  %v1623_v22 = vmul.f32 0.375, %v1483_v2  ;;  %v2043_v23 = vmul.f32 0.125, %v1903_v7  ;;  %v924_v24 = vmul.f32 0.125, %v784_v8  ;;  %v1204_v25 = vmul.f32 0.375, %v1064_v9  ;;  %v788_v52 = vld [vmem:[#allocation2 + $0x380] sm:$0xff] }
 0x139   : > { %2320 = vst.msk [vmem:[#allocation3 + $0x290] sm:$0xff] %vm189_vm0, %v2180_v15  ;;  %v2181_v28 = vadd.f32 %v2041_v0, %v1761_v16  ;;  %v1762_v29 = vadd.f32 %v1622_v11, %v1342_v17  ;;  %v1343_v30 = vadd.f32 %v1203_v18, %v923_v13  ;;  %v1624_v31 = vmul.f32 0.375, %v1484_v14  ;;  %v1908_v63 = vld [vmem:[#allocation2 + $0x383] sm:$0xff]  ;;  %v1909_v7 = vld [vmem:[#allocation2 + $0x38b] sm:$0xff]  ;;  %v1070_v13 = vld [vmem:[#allocation2 + $0x399] sm:$0xff] }
 0x13a   : > { %v1344_v34 = vadd.f32 %v1204_v25, %v924_v24  ;;  %v2044_v35 = vmul.f32 0.125, %v1904_v19  ;;  %v925_v36 = vmul.f32 0.125, %v785_v20  ;;  %v1205_v37 = vmul.f32 0.375, %v1065_v21  ;;  %v789_v0 = vld [vmem:[#allocation2 + $0x388] sm:$0xff]  ;;  %v1490_v18 = vld [vmem:[#allocation2 + $0x39a] sm:$0xff] }
 0x13b   : > { %2321 = vst.msk [vmem:[#allocation3 + $0x298] sm:$0xff] %vm189_vm0, %v2181_v28  ;;  %v2182_v41 = vadd.f32 %v2042_v12, %v1762_v29  ;;  %v1763_v42 = vadd.f32 %v1623_v22, %v1343_v30  ;;  %v1625_v43 = vmul.f32 0.375, %v1485_v26  ;;  %v2045_v44 = vmul.f32 0.125, %v1905_v27  ;;  %v1069_v1 = vld [vmem:[#allocation2 + $0x389] sm:$0xff]  ;;  %v790_v12 = vld [vmem:[#allocation2 + $0x398] sm:$0xff]  ;;  %v791_v20 = vld [vmem:[#allocation2 + $0x3a0] sm:$0xff] }
 0x13c   : > { %v1764_v47 = vadd.f32 %v1624_v31, %v1344_v34  ;;  %v1345_v48 = vadd.f32 %v1205_v37, %v925_v36  ;;  %v926_v49 = vmul.f32 0.125, %v786_v32  ;;  %v1206_v50 = vmul.f32 0.375, %v1066_v33  ;;  %v1910_v19 = vld [vmem:[#allocation2 + $0x39b] sm:$0xff]  ;;  %v1911_v31 = vld [vmem:[#allocation2 + $0x3a3] sm:$0xff] }
 0x13d   : > { %2322 = vst.msk [vmem:[#allocation3 + $0x2a0] sm:$0xff] %vm189_vm0, %v2182_v41  ;;  %v2183_v54 = vadd.f32 %v2043_v23, %v1763_v42  ;;  %v1626_v55 = vmul.f32 0.375, %v1486_v38  ;;  %v2046_v56 = vmul.f32 0.125, %v1906_v39  ;;  %v927_v57 = vmul.f32 0.125, %v787_v40  ;;  %v1071_v25 = vld [vmem:[#allocation2 + $0x3a1] sm:$0xff]  ;;  %v1072_v33 = vld [vmem:[#allocation2 + $0x3a9] sm:$0xff] }
 0x13e   : > { %v2184_v59 = vadd.f32 %v2044_v35, %v1764_v47  ;;  %v1765_v60 = vadd.f32 %v1625_v43, %v1345_v48  ;;  %v1346_v61 = vadd.f32 %v1206_v50, %v926_v49  ;;  %v1207_v62 = vmul.f32 0.375, %v1067_v45  ;;  %v1491_v26 = vld [vmem:[#allocation2 + $0x3a2] sm:$0xff]  ;;  %v1492_v38 = vld [vmem:[#allocation2 + $0x3aa] sm:$0xff]  ;;  %v1493_v50 = vld [vmem:[#allocation2 + $0x3b2] sm:$0xff] }
 0x13f   : > { %2323 = vst.msk [vmem:[#allocation3 + $0x2a8] sm:$0xff] %vm189_vm0, %v2183_v54  ;;  %v1627_v2 = vmul.f32 0.375, %v1487_v46  ;;  %v2047_v3 = vmul.f32 0.125, %v1907_v51  ;;  %v928_v4 = vmul.f32 0.125, %v788_v52  ;;  %v1208_v5 = vmul.f32 0.375, %v1068_v53  ;;  %v792_v32 = vld [vmem:[#allocation2 + $0x3a8] sm:$0xff] }
 0x140   : > { %2324 = vst.msk [vmem:[#allocation3 + $0x2b0] sm:$0xff] %vm189_vm0, %v2184_v59  ;;  %v2185_v8 = vadd.f32 %v2045_v44, %v1765_v60  ;;  %v1766_v9 = vadd.f32 %v1626_v55, %v1346_v61  ;;  %v1347_v10 = vadd.f32 %v1207_v62, %v927_v57  ;;  %v1628_v11 = vmul.f32 0.375, %v1488_v58  ;;  %v1912_v43 = vld [vmem:[#allocation2 + $0x3ab] sm:$0xff]  ;;  %v1913_v51 = vld [vmem:[#allocation2 + $0x3b3] sm:$0xff]  ;;  %v1074_v57 = vld [vmem:[#allocation2 + $0x3c1] sm:$0xff] }
 0x141   : > { %v1348_v14 = vadd.f32 %v1208_v5, %v928_v4  ;;  %v2048_v15 = vmul.f32 0.125, %v1908_v63  ;;  %v929_v16 = vmul.f32 0.125, %v789_v0  ;;  %v1209_v17 = vmul.f32 0.375, %v1069_v1  ;;  %v793_v44 = vld [vmem:[#allocation2 + $0x3b0] sm:$0xff]  ;;  %v1494_v62 = vld [vmem:[#allocation2 + $0x3c2] sm:$0xff] }
 0x142   : > { %2325 = vst.msk [vmem:[#allocation3 + $0x2b8] sm:$0xff] %vm189_vm0, %v2185_v8  ;;  %v2186_v21 = vadd.f32 %v2046_v56, %v1766_v9  ;;  %v1767_v22 = vadd.f32 %v1627_v2, %v1347_v10  ;;  %v1629_v23 = vmul.f32 0.375, %v1489_v6  ;;  %v2049_v24 = vmul.f32 0.125, %v1909_v7  ;;  %v1073_v45 = vld [vmem:[#allocation2 + $0x3b1] sm:$0xff]  ;;  %v794_v56 = vld [vmem:[#allocation2 + $0x3c0] sm:$0xff]  ;;  %v795_v0 = vld [vmem:[#allocation2 + $0x3c8] sm:$0xff] }
 0x143   : > { %v1768_v27 = vadd.f32 %v1628_v11, %v1348_v14  ;;  %v1349_v28 = vadd.f32 %v1209_v17, %v929_v16  ;;  %v930_v29 = vmul.f32 0.125, %v790_v12  ;;  %v1210_v30 = vmul.f32 0.375, %v1070_v13  ;;  %v1914_v63 = vld [vmem:[#allocation2 + $0x3c3] sm:$0xff]  ;;  %v1915_v11 = vld [vmem:[#allocation2 + $0x3cb] sm:$0xff] }
 0x144   : > { %2326 = vst.msk [vmem:[#allocation3 + $0x2c0] sm:$0xff] %vm189_vm0, %v2186_v21  ;;  %v2187_v34 = vadd.f32 %v2047_v3, %v1767_v22  ;;  %v1630_v35 = vmul.f32 0.375, %v1490_v18  ;;  %v2050_v36 = vmul.f32 0.125, %v1910_v19  ;;  %v931_v37 = vmul.f32 0.125, %v791_v20  ;;  %v1075_v5 = vld [vmem:[#allocation2 + $0x3c9] sm:$0xff]  ;;  %v1076_v13 = vld [vmem:[#allocation2 + $0x3d1] sm:$0xff] }
 0x145   : > { %v2188_v39 = vadd.f32 %v2048_v15, %v1768_v27  ;;  %v1769_v40 = vadd.f32 %v1629_v23, %v1349_v28  ;;  %v1350_v41 = vadd.f32 %v1210_v30, %v930_v29  ;;  %v1211_v42 = vmul.f32 0.375, %v1071_v25  ;;  %v1495_v6 = vld [vmem:[#allocation2 + $0x3ca] sm:$0xff]  ;;  %v1496_v18 = vld [vmem:[#allocation2 + $0x3d2] sm:$0xff]  ;;  %v1497_v30 = vld [vmem:[#allocation2 + $0x3da] sm:$0xff] }
 0x146   : > { %2327 = vst.msk [vmem:[#allocation3 + $0x2c8] sm:$0xff] %vm189_vm0, %v2187_v34  ;;  %v1631_v46 = vmul.f32 0.375, %v1491_v26  ;;  %v2051_v47 = vmul.f32 0.125, %v1911_v31  ;;  %v932_v48 = vmul.f32 0.125, %v792_v32  ;;  %v1212_v49 = vmul.f32 0.375, %v1072_v33  ;;  %v796_v12 = vld [vmem:[#allocation2 + $0x3d0] sm:$0xff] }
 0x147   : > { %2328 = vst.msk [vmem:[#allocation3 + $0x2d0] sm:$0xff] %vm189_vm0, %v2188_v39  ;;  %v2189_v52 = vadd.f32 %v2049_v24, %v1769_v40  ;;  %v1770_v53 = vadd.f32 %v1630_v35, %v1350_v41  ;;  %v1351_v54 = vadd.f32 %v1211_v42, %v931_v37  ;;  %v1632_v55 = vmul.f32 0.375, %v1492_v38  ;;  %v1916_v23 = vld [vmem:[#allocation2 + $0x3d3] sm:$0xff]  ;;  %v1917_v31 = vld [vmem:[#allocation2 + $0x3db] sm:$0xff]  ;;  %v1078_v37 = vld [vmem:[#allocation2 + $0x3e9] sm:$0xff] }
 0x148   : > { %v1352_v58 = vadd.f32 %v1212_v49, %v932_v48  ;;  %v2052_v59 = vmul.f32 0.125, %v1912_v43  ;;  %v933_v60 = vmul.f32 0.125, %v793_v44  ;;  %v1213_v61 = vmul.f32 0.375, %v1073_v45  ;;  %v797_v24 = vld [vmem:[#allocation2 + $0x3d8] sm:$0xff]  ;;  %v1498_v42 = vld [vmem:[#allocation2 + $0x3ea] sm:$0xff] }
 0x149   : > { %2329 = vst.msk [vmem:[#allocation3 + $0x2d8] sm:$0xff] %vm189_vm0, %v2189_v52  ;;  %v2190_v1 = vadd.f32 %v2050_v36, %v1770_v53  ;;  %v1771_v2 = vadd.f32 %v1631_v46, %v1351_v54  ;;  %v1633_v3 = vmul.f32 0.375, %v1493_v50  ;;  %v2053_v4 = vmul.f32 0.125, %v1913_v51  ;;  %v1077_v25 = vld [vmem:[#allocation2 + $0x3d9] sm:$0xff]  ;;  %v798_v36 = vld [vmem:[#allocation2 + $0x3e8] sm:$0xff]  ;;  %v799_v44 = vld [vmem:[#allocation2 + $0x3f0] sm:$0xff] }
 0x14a   : > { %v1772_v7 = vadd.f32 %v1632_v55, %v1352_v58  ;;  %v1353_v8 = vadd.f32 %v1213_v61, %v933_v60  ;;  %v934_v9 = vmul.f32 0.125, %v794_v56  ;;  %v1214_v10 = vmul.f32 0.375, %v1074_v57  ;;  %v1918_v43 = vld [vmem:[#allocation2 + $0x3eb] sm:$0xff]  ;;  %v1919_v55 = vld [vmem:[#allocation2 + $0x3f3] sm:$0xff] }
 0x14b   : > { %2330 = vst.msk [vmem:[#allocation3 + $0x2e0] sm:$0xff] %vm189_vm0, %v2190_v1  ;;  %v2191_v14 = vadd.f32 %v2051_v47, %v1771_v2  ;;  %v1634_v15 = vmul.f32 0.375, %v1494_v62  ;;  %v2054_v16 = vmul.f32 0.125, %v1914_v63  ;;  %v935_v17 = vmul.f32 0.125, %v795_v0  ;;  %v1079_v49 = vld [vmem:[#allocation2 + $0x3f1] sm:$0xff]  ;;  %v1080_v57 = vld [vmem:[#allocation2 + $0x3f9] sm:$0xff] }
 0x14c   : > { %v2192_v19 = vadd.f32 %v2052_v59, %v1772_v7  ;;  %v1773_v20 = vadd.f32 %v1633_v3, %v1353_v8  ;;  %v1354_v21 = vadd.f32 %v1214_v10, %v934_v9  ;;  %v1215_v22 = vmul.f32 0.375, %v1075_v5  ;;  %v1499_v50 = vld [vmem:[#allocation2 + $0x3f2] sm:$0xff]  ;;  %v1500_v62 = vld [vmem:[#allocation2 + $0x3fa] sm:$0xff]  ;;  %v1501_v10 = vld [vmem:[#allocation2 + $0x402] sm:$0xff] }
 0x14d   : > { %2331 = vst.msk [vmem:[#allocation3 + $0x2e8] sm:$0xff] %vm189_vm0, %v2191_v14  ;;  %v1635_v26 = vmul.f32 0.375, %v1495_v6  ;;  %v2055_v27 = vmul.f32 0.125, %v1915_v11  ;;  %v936_v28 = vmul.f32 0.125, %v796_v12  ;;  %v1216_v29 = vmul.f32 0.375, %v1076_v13  ;;  %v800_v56 = vld [vmem:[#allocation2 + $0x3f8] sm:$0xff] }
 0x14e   : > { %2332 = vst.msk [vmem:[#allocation3 + $0x2f0] sm:$0xff] %vm189_vm0, %v2192_v19  ;;  %v2193_v32 = vadd.f32 %v2053_v4, %v1773_v20  ;;  %v1774_v33 = vadd.f32 %v1634_v15, %v1354_v21  ;;  %v1355_v34 = vadd.f32 %v1215_v22, %v935_v17  ;;  %v1636_v35 = vmul.f32 0.375, %v1496_v18  ;;  %v1920_v3 = vld [vmem:[#allocation2 + $0x3fb] sm:$0xff]  ;;  %v1921_v11 = vld [vmem:[#allocation2 + $0x403] sm:$0xff]  ;;  %v1082_v17 = vld [vmem:[#allocation2 + $0x411] sm:$0xff] }
 0x14f   : > { %v1356_v38 = vadd.f32 %v1216_v29, %v936_v28  ;;  %v2056_v39 = vmul.f32 0.125, %v1916_v23  ;;  %v937_v40 = vmul.f32 0.125, %v797_v24  ;;  %v1217_v41 = vmul.f32 0.375, %v1077_v25  ;;  %v801_v4 = vld [vmem:[#allocation2 + $0x400] sm:$0xff]  ;;  %v1502_v22 = vld [vmem:[#allocation2 + $0x412] sm:$0xff] }
 0x150   : > { %2333 = vst.msk [vmem:[#allocation3 + $0x2f8] sm:$0xff] %vm189_vm0, %v2193_v32  ;;  %v2194_v45 = vadd.f32 %v2054_v16, %v1774_v33  ;;  %v1775_v46 = vadd.f32 %v1635_v26, %v1355_v34  ;;  %v1637_v47 = vmul.f32 0.375, %v1497_v30  ;;  %v2057_v48 = vmul.f32 0.125, %v1917_v31  ;;  %v1081_v5 = vld [vmem:[#allocation2 + $0x401] sm:$0xff]  ;;  %v802_v16 = vld [vmem:[#allocation2 + $0x410] sm:$0xff]  ;;  %v803_v24 = vld [vmem:[#allocation2 + $0x418] sm:$0xff] }
 0x151   : > { %v1776_v51 = vadd.f32 %v1636_v35, %v1356_v38  ;;  %v1357_v52 = vadd.f32 %v1217_v41, %v937_v40  ;;  %v938_v53 = vmul.f32 0.125, %v798_v36  ;;  %v1218_v54 = vmul.f32 0.375, %v1078_v37  ;;  %v1922_v23 = vld [vmem:[#allocation2 + $0x413] sm:$0xff]  ;;  %v1923_v35 = vld [vmem:[#allocation2 + $0x41b] sm:$0xff] }
 0x152   : > { %2334 = vst.msk [vmem:[#allocation3 + $0x300] sm:$0xff] %vm189_vm0, %v2194_v45  ;;  %v2195_v58 = vadd.f32 %v2055_v27, %v1775_v46  ;;  %v1638_v59 = vmul.f32 0.375, %v1498_v42  ;;  %v2058_v60 = vmul.f32 0.125, %v1918_v43  ;;  %v939_v61 = vmul.f32 0.125, %v799_v44  ;;  %v1083_v29 = vld [vmem:[#allocation2 + $0x419] sm:$0xff]  ;;  %v1084_v37 = vld [vmem:[#allocation2 + $0x421] sm:$0xff] }
 0x153   : > { %v2196_v63 = vadd.f32 %v2056_v39, %v1776_v51  ;;  %v1777_v0 = vadd.f32 %v1637_v47, %v1357_v52  ;;  %v1358_v1 = vadd.f32 %v1218_v54, %v938_v53  ;;  %v1219_v2 = vmul.f32 0.375, %v1079_v49  ;;  %v1503_v30 = vld [vmem:[#allocation2 + $0x41a] sm:$0xff]  ;;  %v1504_v42 = vld [vmem:[#allocation2 + $0x422] sm:$0xff]  ;;  %v1505_v54 = vld [vmem:[#allocation2 + $0x42a] sm:$0xff] }
 0x154   : > { %2335 = vst.msk [vmem:[#allocation3 + $0x308] sm:$0xff] %vm189_vm0, %v2195_v58  ;;  %v1639_v6 = vmul.f32 0.375, %v1499_v50  ;;  %v2059_v7 = vmul.f32 0.125, %v1919_v55  ;;  %v940_v8 = vmul.f32 0.125, %v800_v56  ;;  %v1220_v9 = vmul.f32 0.375, %v1080_v57  ;;  %v804_v36 = vld [vmem:[#allocation2 + $0x420] sm:$0xff] }
 0x155   : > { %2336 = vst.msk [vmem:[#allocation3 + $0x310] sm:$0xff] %vm189_vm0, %v2196_v63  ;;  %v2197_v12 = vadd.f32 %v2057_v48, %v1777_v0  ;;  %v1778_v13 = vadd.f32 %v1638_v59, %v1358_v1  ;;  %v1359_v14 = vadd.f32 %v1219_v2, %v939_v61  ;;  %v1640_v15 = vmul.f32 0.375, %v1500_v62  ;;  %v1924_v47 = vld [vmem:[#allocation2 + $0x423] sm:$0xff]  ;;  %v1925_v55 = vld [vmem:[#allocation2 + $0x42b] sm:$0xff]  ;;  %v1086_v61 = vld [vmem:[#allocation2 + $0x439] sm:$0xff] }
 0x156   : > { %v1360_v18 = vadd.f32 %v1220_v9, %v940_v8  ;;  %v2060_v19 = vmul.f32 0.125, %v1920_v3  ;;  %v941_v20 = vmul.f32 0.125, %v801_v4  ;;  %v1221_v21 = vmul.f32 0.375, %v1081_v5  ;;  %v805_v48 = vld [vmem:[#allocation2 + $0x428] sm:$0xff]  ;;  %v1506_v2 = vld [vmem:[#allocation2 + $0x43a] sm:$0xff] }
 0x157   : > { %2337 = vst.msk [vmem:[#allocation3 + $0x318] sm:$0xff] %vm189_vm0, %v2197_v12  ;;  %v2198_v25 = vadd.f32 %v2058_v60, %v1778_v13  ;;  %v1779_v26 = vadd.f32 %v1639_v6, %v1359_v14  ;;  %v1641_v27 = vmul.f32 0.375, %v1501_v10  ;;  %v2061_v28 = vmul.f32 0.125, %v1921_v11  ;;  %v1085_v49 = vld [vmem:[#allocation2 + $0x429] sm:$0xff]  ;;  %v806_v60 = vld [vmem:[#allocation2 + $0x438] sm:$0xff]  ;;  %v807_v4 = vld [vmem:[#allocation2 + $0x440] sm:$0xff] }
 0x158   : > { %v1780_v31 = vadd.f32 %v1640_v15, %v1360_v18  ;;  %v1361_v32 = vadd.f32 %v1221_v21, %v941_v20  ;;  %v942_v33 = vmul.f32 0.125, %v802_v16  ;;  %v1222_v34 = vmul.f32 0.375, %v1082_v17  ;;  %v1926_v3 = vld [vmem:[#allocation2 + $0x43b] sm:$0xff]  ;;  %v1927_v15 = vld [vmem:[#allocation2 + $0x443] sm:$0xff] }
 0x159   : > { %2338 = vst.msk [vmem:[#allocation3 + $0x320] sm:$0xff] %vm189_vm0, %v2198_v25  ;;  %v2199_v38 = vadd.f32 %v2059_v7, %v1779_v26  ;;  %v1642_v39 = vmul.f32 0.375, %v1502_v22  ;;  %v2062_v40 = vmul.f32 0.125, %v1922_v23  ;;  %v943_v41 = vmul.f32 0.125, %v803_v24  ;;  %v1087_v9 = vld [vmem:[#allocation2 + $0x441] sm:$0xff]  ;;  %v1088_v17 = vld [vmem:[#allocation2 + $0x449] sm:$0xff] }
 0x15a   : > { %v2200_v43 = vadd.f32 %v2060_v19, %v1780_v31  ;;  %v1781_v44 = vadd.f32 %v1641_v27, %v1361_v32  ;;  %v1362_v45 = vadd.f32 %v1222_v34, %v942_v33  ;;  %v1223_v46 = vmul.f32 0.375, %v1083_v29  ;;  %v1507_v10 = vld [vmem:[#allocation2 + $0x442] sm:$0xff]  ;;  %v1508_v22 = vld [vmem:[#allocation2 + $0x44a] sm:$0xff]  ;;  %v1509_v34 = vld [vmem:[#allocation2 + $0x452] sm:$0xff] }
 0x15b   : > { %2339 = vst.msk [vmem:[#allocation3 + $0x328] sm:$0xff] %vm189_vm0, %v2199_v38  ;;  %v1643_v50 = vmul.f32 0.375, %v1503_v30  ;;  %v2063_v51 = vmul.f32 0.125, %v1923_v35  ;;  %v944_v52 = vmul.f32 0.125, %v804_v36  ;;  %v1224_v53 = vmul.f32 0.375, %v1084_v37  ;;  %v808_v16 = vld [vmem:[#allocation2 + $0x448] sm:$0xff] }
 0x15c   : > { %2340 = vst.msk [vmem:[#allocation3 + $0x330] sm:$0xff] %vm189_vm0, %v2200_v43  ;;  %v2201_v56 = vadd.f32 %v2061_v28, %v1781_v44  ;;  %v1782_v57 = vadd.f32 %v1642_v39, %v1362_v45  ;;  %v1363_v58 = vadd.f32 %v1223_v46, %v943_v41  ;;  %v1644_v59 = vmul.f32 0.375, %v1504_v42  ;;  %v1928_v27 = vld [vmem:[#allocation2 + $0x44b] sm:$0xff]  ;;  %v1929_v35 = vld [vmem:[#allocation2 + $0x453] sm:$0xff]  ;;  %v1090_v41 = vld [vmem:[#allocation2 + $0x461] sm:$0xff] }
 0x15d   : > { %v1364_v62 = vadd.f32 %v1224_v53, %v944_v52  ;;  %v2064_v63 = vmul.f32 0.125, %v1924_v47  ;;  %v945_v0 = vmul.f32 0.125, %v805_v48  ;;  %v1225_v1 = vmul.f32 0.375, %v1085_v49  ;;  %v809_v28 = vld [vmem:[#allocation2 + $0x450] sm:$0xff]  ;;  %v1510_v46 = vld [vmem:[#allocation2 + $0x462] sm:$0xff] }
 0x15e   : > { %2341 = vst.msk [vmem:[#allocation3 + $0x338] sm:$0xff] %vm189_vm0, %v2201_v56  ;;  %v2202_v5 = vadd.f32 %v2062_v40, %v1782_v57  ;;  %v1783_v6 = vadd.f32 %v1643_v50, %v1363_v58  ;;  %v1645_v7 = vmul.f32 0.375, %v1505_v54  ;;  %v2065_v8 = vmul.f32 0.125, %v1925_v55  ;;  %v1089_v29 = vld [vmem:[#allocation2 + $0x451] sm:$0xff]  ;;  %v810_v40 = vld [vmem:[#allocation2 + $0x460] sm:$0xff]  ;;  %v811_v48 = vld [vmem:[#allocation2 + $0x468] sm:$0xff] }
 0x15f   : > { %v1784_v11 = vadd.f32 %v1644_v59, %v1364_v62  ;;  %v1365_v12 = vadd.f32 %v1225_v1, %v945_v0  ;;  %v946_v13 = vmul.f32 0.125, %v806_v60  ;;  %v1226_v14 = vmul.f32 0.375, %v1086_v61  ;;  %v1930_v47 = vld [vmem:[#allocation2 + $0x463] sm:$0xff]  ;;  %v1931_v59 = vld [vmem:[#allocation2 + $0x46b] sm:$0xff] }
 0x160   : > { %2342 = vst.msk [vmem:[#allocation3 + $0x340] sm:$0xff] %vm189_vm0, %v2202_v5  ;;  %v2203_v18 = vadd.f32 %v2063_v51, %v1783_v6  ;;  %v1646_v19 = vmul.f32 0.375, %v1506_v2  ;;  %v2066_v20 = vmul.f32 0.125, %v1926_v3  ;;  %v947_v21 = vmul.f32 0.125, %v807_v4  ;;  %v1091_v53 = vld [vmem:[#allocation2 + $0x469] sm:$0xff]  ;;  %v1092_v61 = vld [vmem:[#allocation2 + $0x471] sm:$0xff] }
 0x161   : > { %v2204_v23 = vadd.f32 %v2064_v63, %v1784_v11  ;;  %v1785_v24 = vadd.f32 %v1645_v7, %v1365_v12  ;;  %v1366_v25 = vadd.f32 %v1226_v14, %v946_v13  ;;  %v1227_v26 = vmul.f32 0.375, %v1087_v9  ;;  %v1511_v54 = vld [vmem:[#allocation2 + $0x46a] sm:$0xff]  ;;  %v1512_v2 = vld [vmem:[#allocation2 + $0x472] sm:$0xff]  ;;  %v1513_v14 = vld [vmem:[#allocation2 + $0x47a] sm:$0xff] }
 0x162   : > { %2343 = vst.msk [vmem:[#allocation3 + $0x348] sm:$0xff] %vm189_vm0, %v2203_v18  ;;  %v1647_v30 = vmul.f32 0.375, %v1507_v10  ;;  %v2067_v31 = vmul.f32 0.125, %v1927_v15  ;;  %v948_v32 = vmul.f32 0.125, %v808_v16  ;;  %v1228_v33 = vmul.f32 0.375, %v1088_v17  ;;  %v812_v60 = vld [vmem:[#allocation2 + $0x470] sm:$0xff] }
 0x163   : > { %2344 = vst.msk [vmem:[#allocation3 + $0x350] sm:$0xff] %vm189_vm0, %v2204_v23  ;;  %v2205_v36 = vadd.f32 %v2065_v8, %v1785_v24  ;;  %v1786_v37 = vadd.f32 %v1646_v19, %v1366_v25  ;;  %v1367_v38 = vadd.f32 %v1227_v26, %v947_v21  ;;  %v1648_v39 = vmul.f32 0.375, %v1508_v22  ;;  %v1932_v7 = vld [vmem:[#allocation2 + $0x473] sm:$0xff]  ;;  %v1933_v15 = vld [vmem:[#allocation2 + $0x47b] sm:$0xff]  ;;  %v1094_v21 = vld [vmem:[#allocation2 + $0x489] sm:$0xff] }
 0x164   : > { %v1368_v42 = vadd.f32 %v1228_v33, %v948_v32  ;;  %v2068_v43 = vmul.f32 0.125, %v1928_v27  ;;  %v949_v44 = vmul.f32 0.125, %v809_v28  ;;  %v1229_v45 = vmul.f32 0.375, %v1089_v29  ;;  %v813_v8 = vld [vmem:[#allocation2 + $0x478] sm:$0xff]  ;;  %v1514_v26 = vld [vmem:[#allocation2 + $0x48a] sm:$0xff] }
 0x165   : > { %2345 = vst.msk [vmem:[#allocation3 + $0x358] sm:$0xff] %vm189_vm0, %v2205_v36  ;;  %v2206_v49 = vadd.f32 %v2066_v20, %v1786_v37  ;;  %v1787_v50 = vadd.f32 %v1647_v30, %v1367_v38  ;;  %v1649_v51 = vmul.f32 0.375, %v1509_v34  ;;  %v2069_v52 = vmul.f32 0.125, %v1929_v35  ;;  %v1093_v9 = vld [vmem:[#allocation2 + $0x479] sm:$0xff]  ;;  %v814_v20 = vld [vmem:[#allocation2 + $0x488] sm:$0xff]  ;;  %v815_v28 = vld [vmem:[#allocation2 + $0x490] sm:$0xff] }
 0x166   : > { %v1788_v55 = vadd.f32 %v1648_v39, %v1368_v42  ;;  %v1369_v56 = vadd.f32 %v1229_v45, %v949_v44  ;;  %v950_v57 = vmul.f32 0.125, %v810_v40  ;;  %v1230_v58 = vmul.f32 0.375, %v1090_v41  ;;  %v1934_v27 = vld [vmem:[#allocation2 + $0x48b] sm:$0xff]  ;;  %v1935_v39 = vld [vmem:[#allocation2 + $0x493] sm:$0xff] }
 0x167   : > { %2346 = vst.msk [vmem:[#allocation3 + $0x360] sm:$0xff] %vm189_vm0, %v2206_v49  ;;  %v2207_v62 = vadd.f32 %v2067_v31, %v1787_v50  ;;  %v1650_v63 = vmul.f32 0.375, %v1510_v46  ;;  %v2070_v0 = vmul.f32 0.125, %v1930_v47  ;;  %v951_v1 = vmul.f32 0.125, %v811_v48  ;;  %v1095_v33 = vld [vmem:[#allocation2 + $0x491] sm:$0xff]  ;;  %v1096_v41 = vld [vmem:[#allocation2 + $0x499] sm:$0xff] }
 0x168   : > { %v2208_v3 = vadd.f32 %v2068_v43, %v1788_v55  ;;  %v1789_v4 = vadd.f32 %v1649_v51, %v1369_v56  ;;  %v1370_v5 = vadd.f32 %v1230_v58, %v950_v57  ;;  %v1231_v6 = vmul.f32 0.375, %v1091_v53  ;;  %v1515_v34 = vld [vmem:[#allocation2 + $0x492] sm:$0xff]  ;;  %v1516_v46 = vld [vmem:[#allocation2 + $0x49a] sm:$0xff]  ;;  %v1517_v58 = vld [vmem:[#allocation2 + $0x4a2] sm:$0xff] }
 0x169   : > { %2347 = vst.msk [vmem:[#allocation3 + $0x368] sm:$0xff] %vm189_vm0, %v2207_v62  ;;  %v1651_v10 = vmul.f32 0.375, %v1511_v54  ;;  %v2071_v11 = vmul.f32 0.125, %v1931_v59  ;;  %v952_v12 = vmul.f32 0.125, %v812_v60  ;;  %v1232_v13 = vmul.f32 0.375, %v1092_v61  ;;  %v816_v40 = vld [vmem:[#allocation2 + $0x498] sm:$0xff] }
 0x16a   : > { %2348 = vst.msk [vmem:[#allocation3 + $0x370] sm:$0xff] %vm189_vm0, %v2208_v3  ;;  %v2209_v16 = vadd.f32 %v2069_v52, %v1789_v4  ;;  %v1790_v17 = vadd.f32 %v1650_v63, %v1370_v5  ;;  %v1371_v18 = vadd.f32 %v1231_v6, %v951_v1  ;;  %v1652_v19 = vmul.f32 0.375, %v1512_v2  ;;  %v1936_v51 = vld [vmem:[#allocation2 + $0x49b] sm:$0xff]  ;;  %v1937_v59 = vld [vmem:[#allocation2 + $0x4a3] sm:$0xff]  ;;  %v1098_v1 = vld [vmem:[#allocation2 + $0x4b1] sm:$0xff] }
 0x16b   : > { %v1372_v22 = vadd.f32 %v1232_v13, %v952_v12  ;;  %v2072_v23 = vmul.f32 0.125, %v1932_v7  ;;  %v953_v24 = vmul.f32 0.125, %v813_v8  ;;  %v1233_v25 = vmul.f32 0.375, %v1093_v9  ;;  %v817_v52 = vld [vmem:[#allocation2 + $0x4a0] sm:$0xff]  ;;  %v1518_v6 = vld [vmem:[#allocation2 + $0x4b2] sm:$0xff] }
 0x16c   : > { %2349 = vst.msk [vmem:[#allocation3 + $0x378] sm:$0xff] %vm189_vm0, %v2209_v16  ;;  %v2210_v29 = vadd.f32 %v2070_v0, %v1790_v17  ;;  %v1791_v30 = vadd.f32 %v1651_v10, %v1371_v18  ;;  %v1653_v31 = vmul.f32 0.375, %v1513_v14  ;;  %v2073_v32 = vmul.f32 0.125, %v1933_v15  ;;  %v1097_v53 = vld [vmem:[#allocation2 + $0x4a1] sm:$0xff]  ;;  %v818_v0 = vld [vmem:[#allocation2 + $0x4b0] sm:$0xff]  ;;  %v819_v8 = vld [vmem:[#allocation2 + $0x4b8] sm:$0xff] }
 0x16d   : > { %v1792_v35 = vadd.f32 %v1652_v19, %v1372_v22  ;;  %v1373_v36 = vadd.f32 %v1233_v25, %v953_v24  ;;  %v954_v37 = vmul.f32 0.125, %v814_v20  ;;  %v1234_v38 = vmul.f32 0.375, %v1094_v21  ;;  %v1938_v7 = vld [vmem:[#allocation2 + $0x4b3] sm:$0xff]  ;;  %v1939_v19 = vld [vmem:[#allocation2 + $0x4bb] sm:$0xff] }
 0x16e   : > { %2350 = vst.msk [vmem:[#allocation3 + $0x380] sm:$0xff] %vm189_vm0, %v2210_v29  ;;  %v2211_v42 = vadd.f32 %v2071_v11, %v1791_v30  ;;  %v1654_v43 = vmul.f32 0.375, %v1514_v26  ;;  %v2074_v44 = vmul.f32 0.125, %v1934_v27  ;;  %v955_v45 = vmul.f32 0.125, %v815_v28  ;;  %v1099_v13 = vld [vmem:[#allocation2 + $0x4b9] sm:$0xff]  ;;  %v1100_v21 = vld [vmem:[#allocation2 + $0x4c1] sm:$0xff] }
 0x16f   : > { %v2212_v47 = vadd.f32 %v2072_v23, %v1792_v35  ;;  %v1793_v48 = vadd.f32 %v1653_v31, %v1373_v36  ;;  %v1374_v49 = vadd.f32 %v1234_v38, %v954_v37  ;;  %v1235_v50 = vmul.f32 0.375, %v1095_v33  ;;  %v1519_v14 = vld [vmem:[#allocation2 + $0x4ba] sm:$0xff]  ;;  %v1520_v26 = vld [vmem:[#allocation2 + $0x4c2] sm:$0xff]  ;;  %v1521_v38 = vld [vmem:[#allocation2 + $0x4ca] sm:$0xff] }
 0x170   : > { %2351 = vst.msk [vmem:[#allocation3 + $0x388] sm:$0xff] %vm189_vm0, %v2211_v42  ;;  %v1655_v54 = vmul.f32 0.375, %v1515_v34  ;;  %v2075_v55 = vmul.f32 0.125, %v1935_v39  ;;  %v956_v56 = vmul.f32 0.125, %v816_v40  ;;  %v1236_v57 = vmul.f32 0.375, %v1096_v41  ;;  %v820_v20 = vld [vmem:[#allocation2 + $0x4c0] sm:$0xff] }
 0x171   : > { %2352 = vst.msk [vmem:[#allocation3 + $0x390] sm:$0xff] %vm189_vm0, %v2212_v47  ;;  %v2213_v60 = vadd.f32 %v2073_v32, %v1793_v48  ;;  %v1794_v61 = vadd.f32 %v1654_v43, %v1374_v49  ;;  %v1375_v62 = vadd.f32 %v1235_v50, %v955_v45  ;;  %v1656_v63 = vmul.f32 0.375, %v1516_v46  ;;  %v1940_v31 = vld [vmem:[#allocation2 + $0x4c3] sm:$0xff]  ;;  %v1941_v39 = vld [vmem:[#allocation2 + $0x4cb] sm:$0xff]  ;;  %v1102_v45 = vld [vmem:[#allocation2 + $0x4d9] sm:$0xff] }
 0x172   : > { %v1376_v2 = vadd.f32 %v1236_v57, %v956_v56  ;;  %v2076_v3 = vmul.f32 0.125, %v1936_v51  ;;  %v957_v4 = vmul.f32 0.125, %v817_v52  ;;  %v1237_v5 = vmul.f32 0.375, %v1097_v53  ;;  %v821_v32 = vld [vmem:[#allocation2 + $0x4c8] sm:$0xff]  ;;  %v1522_v50 = vld [vmem:[#allocation2 + $0x4da] sm:$0xff] }
 0x173   : > { %2353 = vst.msk [vmem:[#allocation3 + $0x398] sm:$0xff] %vm189_vm0, %v2213_v60  ;;  %v2214_v9 = vadd.f32 %v2074_v44, %v1794_v61  ;;  %v1795_v10 = vadd.f32 %v1655_v54, %v1375_v62  ;;  %v1657_v11 = vmul.f32 0.375, %v1517_v58  ;;  %v2077_v12 = vmul.f32 0.125, %v1937_v59  ;;  %v1101_v33 = vld [vmem:[#allocation2 + $0x4c9] sm:$0xff]  ;;  %v822_v44 = vld [vmem:[#allocation2 + $0x4d8] sm:$0xff]  ;;  %v823_v52 = vld [vmem:[#allocation2 + $0x4e0] sm:$0xff] }
 0x174   : > { %v1796_v15 = vadd.f32 %v1656_v63, %v1376_v2  ;;  %v1377_v16 = vadd.f32 %v1237_v5, %v957_v4  ;;  %v958_v17 = vmul.f32 0.125, %v818_v0  ;;  %v1238_v18 = vmul.f32 0.375, %v1098_v1  ;;  %v1942_v51 = vld [vmem:[#allocation2 + $0x4db] sm:$0xff]  ;;  %v1943_v63 = vld [vmem:[#allocation2 + $0x4e3] sm:$0xff] }
 0x175   : > { %2354 = vst.msk [vmem:[#allocation3 + $0x3a0] sm:$0xff] %vm189_vm0, %v2214_v9  ;;  %v2215_v22 = vadd.f32 %v2075_v55, %v1795_v10  ;;  %v1658_v23 = vmul.f32 0.375, %v1518_v6  ;;  %v2078_v24 = vmul.f32 0.125, %v1938_v7  ;;  %v959_v25 = vmul.f32 0.125, %v819_v8  ;;  %v1103_v57 = vld [vmem:[#allocation2 + $0x4e1] sm:$0xff]  ;;  %v1104_v1 = vld [vmem:[#allocation2 + $0x4e9] sm:$0xff] }
 0x176   : > { %v2216_v27 = vadd.f32 %v2076_v3, %v1796_v15  ;;  %v1797_v28 = vadd.f32 %v1657_v11, %v1377_v16  ;;  %v1378_v29 = vadd.f32 %v1238_v18, %v958_v17  ;;  %v1239_v30 = vmul.f32 0.375, %v1099_v13  ;;  %v1523_v58 = vld [vmem:[#allocation2 + $0x4e2] sm:$0xff]  ;;  %v1524_v6 = vld [vmem:[#allocation2 + $0x4ea] sm:$0xff]  ;;  %v1525_v18 = vld [vmem:[#allocation2 + $0x4f2] sm:$0xff] }
 0x177   : > { %2355 = vst.msk [vmem:[#allocation3 + $0x3a8] sm:$0xff] %vm189_vm0, %v2215_v22  ;;  %v1659_v34 = vmul.f32 0.375, %v1519_v14  ;;  %v2079_v35 = vmul.f32 0.125, %v1939_v19  ;;  %v960_v36 = vmul.f32 0.125, %v820_v20  ;;  %v1240_v37 = vmul.f32 0.375, %v1100_v21  ;;  %v824_v0 = vld [vmem:[#allocation2 + $0x4e8] sm:$0xff] }
 0x178   : > { %2356 = vst.msk [vmem:[#allocation3 + $0x3b0] sm:$0xff] %vm189_vm0, %v2216_v27  ;;  %v2217_v40 = vadd.f32 %v2077_v12, %v1797_v28  ;;  %v1798_v41 = vadd.f32 %v1658_v23, %v1378_v29  ;;  %v1379_v42 = vadd.f32 %v1239_v30, %v959_v25  ;;  %v1660_v43 = vmul.f32 0.375, %v1520_v26  ;;  %v1944_v11 = vld [vmem:[#allocation2 + $0x4eb] sm:$0xff]  ;;  %v1945_v19 = vld [vmem:[#allocation2 + $0x4f3] sm:$0xff]  ;;  %v1106_v25 = vld [vmem:[#allocation2 + $0x501] sm:$0xff] }
 0x179   : > { %v1380_v46 = vadd.f32 %v1240_v37, %v960_v36  ;;  %v2080_v47 = vmul.f32 0.125, %v1940_v31  ;;  %v961_v48 = vmul.f32 0.125, %v821_v32  ;;  %v1241_v49 = vmul.f32 0.375, %v1101_v33  ;;  %v825_v12 = vld [vmem:[#allocation2 + $0x4f0] sm:$0xff]  ;;  %v1526_v30 = vld [vmem:[#allocation2 + $0x502] sm:$0xff] }
 0x17a   : > { %2357 = vst.msk [vmem:[#allocation3 + $0x3b8] sm:$0xff] %vm189_vm0, %v2217_v40  ;;  %v2218_v53 = vadd.f32 %v2078_v24, %v1798_v41  ;;  %v1799_v54 = vadd.f32 %v1659_v34, %v1379_v42  ;;  %v1661_v55 = vmul.f32 0.375, %v1521_v38  ;;  %v2081_v56 = vmul.f32 0.125, %v1941_v39  ;;  %v1105_v13 = vld [vmem:[#allocation2 + $0x4f1] sm:$0xff]  ;;  %v826_v24 = vld [vmem:[#allocation2 + $0x500] sm:$0xff]  ;;  %v827_v32 = vld [vmem:[#allocation2 + $0x508] sm:$0xff] }
 0x17b   : > { %v1800_v59 = vadd.f32 %v1660_v43, %v1380_v46  ;;  %v1381_v60 = vadd.f32 %v1241_v49, %v961_v48  ;;  %v962_v61 = vmul.f32 0.125, %v822_v44  ;;  %v1242_v62 = vmul.f32 0.375, %v1102_v45  ;;  %v1946_v31 = vld [vmem:[#allocation2 + $0x503] sm:$0xff]  ;;  %v1947_v43 = vld [vmem:[#allocation2 + $0x50b] sm:$0xff] }
 0x17c   : > { %2358 = vst.msk [vmem:[#allocation3 + $0x3c0] sm:$0xff] %vm189_vm0, %v2218_v53  ;;  %v2219_v2 = vadd.f32 %v2079_v35, %v1799_v54  ;;  %v1662_v3 = vmul.f32 0.375, %v1522_v50  ;;  %v2082_v4 = vmul.f32 0.125, %v1942_v51  ;;  %v963_v5 = vmul.f32 0.125, %v823_v52  ;;  %v1107_v37 = vld [vmem:[#allocation2 + $0x509] sm:$0xff]  ;;  %v1108_v45 = vld [vmem:[#allocation2 + $0x511] sm:$0xff] }
 0x17d   : > { %v2220_v7 = vadd.f32 %v2080_v47, %v1800_v59  ;;  %v1801_v8 = vadd.f32 %v1661_v55, %v1381_v60  ;;  %v1382_v9 = vadd.f32 %v1242_v62, %v962_v61  ;;  %v1243_v10 = vmul.f32 0.375, %v1103_v57  ;;  %v1527_v38 = vld [vmem:[#allocation2 + $0x50a] sm:$0xff]  ;;  %v1528_v50 = vld [vmem:[#allocation2 + $0x512] sm:$0xff]  ;;  %v1529_v62 = vld [vmem:[#allocation2 + $0x51a] sm:$0xff] }
 0x17e   : > { %2359 = vst.msk [vmem:[#allocation3 + $0x3c8] sm:$0xff] %vm189_vm0, %v2219_v2  ;;  %v1663_v14 = vmul.f32 0.375, %v1523_v58  ;;  %v2083_v15 = vmul.f32 0.125, %v1943_v63  ;;  %v964_v16 = vmul.f32 0.125, %v824_v0  ;;  %v1244_v17 = vmul.f32 0.375, %v1104_v1  ;;  %v828_v44 = vld [vmem:[#allocation2 + $0x510] sm:$0xff] }
 0x17f   : > { %2360 = vst.msk [vmem:[#allocation3 + $0x3d0] sm:$0xff] %vm189_vm0, %v2220_v7  ;;  %v2221_v20 = vadd.f32 %v2081_v56, %v1801_v8  ;;  %v1802_v21 = vadd.f32 %v1662_v3, %v1382_v9  ;;  %v1383_v22 = vadd.f32 %v1243_v10, %v963_v5  ;;  %v1664_v23 = vmul.f32 0.375, %v1524_v6  ;;  %v1948_v55 = vld [vmem:[#allocation2 + $0x513] sm:$0xff]  ;;  %v1949_v63 = vld [vmem:[#allocation2 + $0x51b] sm:$0xff]  ;;  %v1110_v5 = vld [vmem:[#allocation2 + $0x529] sm:$0xff] }
 0x180   : > { %v1384_v26 = vadd.f32 %v1244_v17, %v964_v16  ;;  %v2084_v27 = vmul.f32 0.125, %v1944_v11  ;;  %v965_v28 = vmul.f32 0.125, %v825_v12  ;;  %v1245_v29 = vmul.f32 0.375, %v1105_v13  ;;  %v829_v56 = vld [vmem:[#allocation2 + $0x518] sm:$0xff]  ;;  %v1530_v10 = vld [vmem:[#allocation2 + $0x52a] sm:$0xff] }
 0x181   : > { %2361 = vst.msk [vmem:[#allocation3 + $0x3d8] sm:$0xff] %vm189_vm0, %v2221_v20  ;;  %v2222_v33 = vadd.f32 %v2082_v4, %v1802_v21  ;;  %v1803_v34 = vadd.f32 %v1663_v14, %v1383_v22  ;;  %v1665_v35 = vmul.f32 0.375, %v1525_v18  ;;  %v2085_v36 = vmul.f32 0.125, %v1945_v19  ;;  %v1109_v57 = vld [vmem:[#allocation2 + $0x519] sm:$0xff]  ;;  %v830_v4 = vld [vmem:[#allocation2 + $0x528] sm:$0xff]  ;;  %v831_v12 = vld [vmem:[#allocation2 + $0x530] sm:$0xff] }
 0x182   : > { %v1804_v39 = vadd.f32 %v1664_v23, %v1384_v26  ;;  %v1385_v40 = vadd.f32 %v1245_v29, %v965_v28  ;;  %v966_v41 = vmul.f32 0.125, %v826_v24  ;;  %v1246_v42 = vmul.f32 0.375, %v1106_v25  ;;  %v1950_v11 = vld [vmem:[#allocation2 + $0x52b] sm:$0xff]  ;;  %v1951_v23 = vld [vmem:[#allocation2 + $0x533] sm:$0xff] }
 0x183   : > { %2362 = vst.msk [vmem:[#allocation3 + $0x3e0] sm:$0xff] %vm189_vm0, %v2222_v33  ;;  %v2223_v46 = vadd.f32 %v2083_v15, %v1803_v34  ;;  %v1666_v47 = vmul.f32 0.375, %v1526_v30  ;;  %v2086_v48 = vmul.f32 0.125, %v1946_v31  ;;  %v967_v49 = vmul.f32 0.125, %v827_v32  ;;  %v1111_v17 = vld [vmem:[#allocation2 + $0x531] sm:$0xff]  ;;  %v1112_v25 = vld [vmem:[#allocation2 + $0x539] sm:$0xff] }
 0x184   : > { %v2224_v51 = vadd.f32 %v2084_v27, %v1804_v39  ;;  %v1805_v52 = vadd.f32 %v1665_v35, %v1385_v40  ;;  %v1386_v53 = vadd.f32 %v1246_v42, %v966_v41  ;;  %v1247_v54 = vmul.f32 0.375, %v1107_v37  ;;  %v1531_v18 = vld [vmem:[#allocation2 + $0x532] sm:$0xff]  ;;  %v1532_v30 = vld [vmem:[#allocation2 + $0x53a] sm:$0xff]  ;;  %v1533_v42 = vld [vmem:[#allocation2 + $0x542] sm:$0xff] }
 0x185   : > { %2363 = vst.msk [vmem:[#allocation3 + $0x3e8] sm:$0xff] %vm189_vm0, %v2223_v46  ;;  %v1667_v58 = vmul.f32 0.375, %v1527_v38  ;;  %v2087_v59 = vmul.f32 0.125, %v1947_v43  ;;  %v968_v60 = vmul.f32 0.125, %v828_v44  ;;  %v1248_v61 = vmul.f32 0.375, %v1108_v45  ;;  %v832_v24 = vld [vmem:[#allocation2 + $0x538] sm:$0xff] }
 0x186   : > { %2364 = vst.msk [vmem:[#allocation3 + $0x3f0] sm:$0xff] %vm189_vm0, %v2224_v51  ;;  %v2225_v0 = vadd.f32 %v2085_v36, %v1805_v52  ;;  %v1806_v1 = vadd.f32 %v1666_v47, %v1386_v53  ;;  %v1387_v2 = vadd.f32 %v1247_v54, %v967_v49  ;;  %v1668_v3 = vmul.f32 0.375, %v1528_v50  ;;  %v1952_v35 = vld [vmem:[#allocation2 + $0x53b] sm:$0xff]  ;;  %v1953_v43 = vld [vmem:[#allocation2 + $0x543] sm:$0xff]  ;;  %v1114_v49 = vld [vmem:[#allocation2 + $0x551] sm:$0xff] }
 0x187   : > { %v1388_v6 = vadd.f32 %v1248_v61, %v968_v60  ;;  %v2088_v7 = vmul.f32 0.125, %v1948_v55  ;;  %v969_v8 = vmul.f32 0.125, %v829_v56  ;;  %v1249_v9 = vmul.f32 0.375, %v1109_v57  ;;  %v833_v36 = vld [vmem:[#allocation2 + $0x540] sm:$0xff]  ;;  %v1534_v54 = vld [vmem:[#allocation2 + $0x552] sm:$0xff] }
 0x188   : > { %2365 = vst.msk [vmem:[#allocation3 + $0x3f8] sm:$0xff] %vm189_vm0, %v2225_v0  ;;  %v2226_v13 = vadd.f32 %v2086_v48, %v1806_v1  ;;  %v1807_v14 = vadd.f32 %v1667_v58, %v1387_v2  ;;  %v1669_v15 = vmul.f32 0.375, %v1529_v62  ;;  %v2089_v16 = vmul.f32 0.125, %v1949_v63  ;;  %v1113_v37 = vld [vmem:[#allocation2 + $0x541] sm:$0xff]  ;;  %v834_v48 = vld [vmem:[#allocation2 + $0x550] sm:$0xff]  ;;  %v835_v56 = vld [vmem:[#allocation2 + $0x558] sm:$0xff] }
 0x189   : > { %v1808_v19 = vadd.f32 %v1668_v3, %v1388_v6  ;;  %v1389_v20 = vadd.f32 %v1249_v9, %v969_v8  ;;  %v970_v21 = vmul.f32 0.125, %v830_v4  ;;  %v1250_v22 = vmul.f32 0.375, %v1110_v5  ;;  %v1954_v55 = vld [vmem:[#allocation2 + $0x553] sm:$0xff]  ;;  %v1955_v3 = vld [vmem:[#allocation2 + $0x55b] sm:$0xff] }
 0x18a   : > { %2366 = vst.msk [vmem:[#allocation3 + $0x400] sm:$0xff] %vm189_vm0, %v2226_v13  ;;  %v2227_v26 = vadd.f32 %v2087_v59, %v1807_v14  ;;  %v1670_v27 = vmul.f32 0.375, %v1530_v10  ;;  %v2090_v28 = vmul.f32 0.125, %v1950_v11  ;;  %v971_v29 = vmul.f32 0.125, %v831_v12  ;;  %v1115_v61 = vld [vmem:[#allocation2 + $0x559] sm:$0xff]  ;;  %v1116_v5 = vld [vmem:[#allocation2 + $0x561] sm:$0xff] }
 0x18b   : > { %v2228_v31 = vadd.f32 %v2088_v7, %v1808_v19  ;;  %v1809_v32 = vadd.f32 %v1669_v15, %v1389_v20  ;;  %v1390_v33 = vadd.f32 %v1250_v22, %v970_v21  ;;  %v1251_v34 = vmul.f32 0.375, %v1111_v17  ;;  %v1535_v62 = vld [vmem:[#allocation2 + $0x55a] sm:$0xff]  ;;  %v1536_v10 = vld [vmem:[#allocation2 + $0x562] sm:$0xff]  ;;  %v1537_v22 = vld [vmem:[#allocation2 + $0x56a] sm:$0xff] }
 0x18c   : > { %2367 = vst.msk [vmem:[#allocation3 + $0x408] sm:$0xff] %vm189_vm0, %v2227_v26  ;;  %v1671_v38 = vmul.f32 0.375, %v1531_v18  ;;  %v2091_v39 = vmul.f32 0.125, %v1951_v23  ;;  %v972_v40 = vmul.f32 0.125, %v832_v24  ;;  %v1252_v41 = vmul.f32 0.375, %v1112_v25  ;;  %v836_v4 = vld [vmem:[#allocation2 + $0x560] sm:$0xff] }
 0x18d   : > { %2368 = vst.msk [vmem:[#allocation3 + $0x410] sm:$0xff] %vm189_vm0, %v2228_v31  ;;  %v2229_v44 = vadd.f32 %v2089_v16, %v1809_v32  ;;  %v1810_v45 = vadd.f32 %v1670_v27, %v1390_v33  ;;  %v1391_v46 = vadd.f32 %v1251_v34, %v971_v29  ;;  %v1672_v47 = vmul.f32 0.375, %v1532_v30  ;;  %v1956_v15 = vld [vmem:[#allocation2 + $0x563] sm:$0xff]  ;;  %v1957_v23 = vld [vmem:[#allocation2 + $0x56b] sm:$0xff]  ;;  %v2635_v29 = vld [vmem:[#allocation3 + $0x20] sm:$0xff] }
 0x18e   : > { %v1392_v50 = vadd.f32 %v1252_v41, %v972_v40  ;;  %v2092_v51 = vmul.f32 0.125, %v1952_v35  ;;  %v973_v52 = vmul.f32 0.125, %v833_v36  ;;  %v1253_v53 = vmul.f32 0.375, %v1113_v37  ;;  %v837_v16 = vld [vmem:[#allocation2 + $0x568] sm:$0xff]  ;;  %v5588_v34 = vld [vmem:[#allocation3 + $0x40] sm:$0xff]  ;;  %v2379_v36 = vld [vmem:[#allocation3 + $0x8] sm:$0xff] }
 0x18f   : > { %2369 = vst.msk [vmem:[#allocation3 + $0x418] sm:$0xff] %vm189_vm0, %v2229_v44  ;;  %v2230_v57 = vadd.f32 %v2090_v28, %v1810_v45  ;;  %v1811_v58 = vadd.f32 %v1671_v38, %v1391_v46  ;;  %v1673_v59 = vmul.f32 0.375, %v1533_v42  ;;  %v2093_v60 = vmul.f32 0.125, %v1953_v43  ;;  %v1117_v17 = vld [vmem:[#allocation2 + $0x569] sm:$0xff]  ;;  %v2378_v28 = vld [vmem:[#allocation3] sm:$0xff]  ;;  %v2636_v41 = vld [vmem:[#allocation3 + $0x28] sm:$0xff] }
 0x190   : > { %v1812_v63 = vadd.f32 %v1672_v47, %v1392_v50  ;;  %v1393_v0 = vadd.f32 %v1253_v53, %v973_v52  ;;  %v974_v1 = vmul.f32 0.125, %v834_v48  ;;  %v1254_v2 = vmul.f32 0.375, %v1114_v49  ;;  %v3405_v35 = vld [vmem:[#allocation3 + $0x60] sm:$0xff]  ;;  %v5591_v42 = vld [vmem:[#allocation3 + $0x48] sm:$0xff]  ;;  %v2380_v48 = vld [vmem:[#allocation3 + $0x10] sm:$0xff] }
 0x191   : > { %2370 = vst.msk [vmem:[#allocation3 + $0x420] sm:$0xff] %vm189_vm0, %v2230_v57  ;;  %v2231_v6 = vadd.f32 %v2091_v39, %v1811_v58  ;;  %v1674_v7 = vmul.f32 0.375, %v1534_v54  ;;  %v2094_v8 = vmul.f32 0.125, %v1954_v55  ;;  %v975_v9 = vmul.f32 0.125, %v835_v56  ;;  %v3406_v47 = vld [vmem:[#allocation3 + $0x68] sm:$0xff]  ;;  %v5593_v49 = vld [vmem:[#allocation3 + $0x30] sm:$0xff] }
 0x192   : > { %v2232_v11 = vadd.f32 %v2092_v51, %v1812_v63  ;;  %v1813_v12 = vadd.f32 %v1673_v59, %v1393_v0  ;;  %v1394_v13 = vadd.f32 %v1254_v2, %v974_v1  ;;  %v1255_v14 = vmul.f32 0.375, %v1115_v61  ;;  %v5599_v54 = vld [vmem:[#allocation3 + $0x50] sm:$0xff]  ;;  %v5603_v61 = vld [vmem:[#allocation3 + $0x38] sm:$0xff] }
 0x193   : > { %2371 = vst.msk [vmem:[#allocation3 + $0x428] sm:$0xff] %vm189_vm0, %v2231_v6  ;;  %v1675_v18 = vmul.f32 0.375, %v1535_v62  ;;  %v2095_v19 = vmul.f32 0.125, %v1955_v3  ;;  %v976_v20 = vmul.f32 0.125, %v836_v4  ;;  %v1256_v21 = vmul.f32 0.375, %v1116_v5  ;;  %v5601_v59 = vld [vmem:[#allocation3 + $0x70] sm:$0xff] }
 0x194   : > { %2372 = vst.msk [vmem:[#allocation3 + $0x430] sm:$0xff] %vm189_vm0, %v2232_v11  ;;  %v2233_v24 = vadd.f32 %v2093_v60, %v1813_v12  ;;  %v1814_v25 = vadd.f32 %v1674_v7, %v1394_v13  ;;  %v1395_v26 = vadd.f32 %v1255_v14, %v975_v9  ;;  %v1676_v27 = vmul.f32 0.375, %v1536_v10  ;;  %v2381_v60 = vld [vmem:[#allocation3 + $0x18] sm:$0xff]  ;;  %v5625_v13 = vld [vmem:[#allocation3 + $0x80] sm:$0xff] }
 0x195   : > { %v1396_v30 = vadd.f32 %v1256_v21, %v976_v20  ;;  %v2096_v31 = vmul.f32 0.125, %v1956_v15  ;;  %v977_v32 = vmul.f32 0.125, %v837_v16  ;;  %v1257_v33 = vmul.f32 0.375, %v1117_v17  ;;  %v5610_v2 = vld [vmem:[#allocation3 + $0x58] sm:$0xff] }
 0x196   : > { %2373 = vst.msk [vmem:[#allocation3 + $0x438] sm:$0xff] %vm189_vm0, %v2233_v24  ;;  %v2234_v37 = vadd.f32 %v2094_v8, %v1814_v25  ;;  %v1815_v38 = vadd.f32 %v1675_v18, %v1395_v26  ;;  %v1677_v39 = vmul.f32 0.375, %v1537_v22  ;;  %v2097_v40 = vmul.f32 0.125, %v1957_v23  ;;  %v5612_v3 = vld [vmem:[#allocation3 + $0x78] sm:$0xff]  ;;  %v5619_v8 = vld [vmem:[%s6520_s1] ss:$0 sm:$0xff] }
 0x197   : > { %v1816_v43 = vadd.f32 %v1676_v27, %v1396_v30  ;;  %v1397_v44 = vadd.f32 %v1257_v33, %v977_v32  ;;  %v2506_v45 = vmul.f32 0.5, %v2378_v28  ;;  %v2763_v46 = vmul.f32 1.5, %v2635_v29  ;;  %v5640_v26 = vld [vmem:[#allocation3 + $0x88] sm:$0xff] }
 0x198   : > { %2374 = vst.msk [vmem:[#allocation3 + $0x440] sm:$0xff] %vm189_vm0, %v2234_v37  ;;  %v2235_v50 = vadd.f32 %v2095_v19, %v1815_v38  ;;  %v3148_v51 = vmul.f32 1.5, %v5588_v34  ;;  %v5597_v52 = vmul.f32 0.5, %v3405_v35  ;;  %v2507_v53 = vmul.f32 0.5, %v2379_v36 }
 0x199   : > { %v2236_v55 = vadd.f32 %v2096_v31, %v1816_v43  ;;  %v1817_v56 = vadd.f32 %v1677_v39, %v1397_v44  ;;  %v2891_v57 = vadd.f32 %v2763_v46, %v2506_v45  ;;  %v2764_v58 = vmul.f32 1.5, %v2636_v41 }
 0x19a   : > { %2375 = vst.msk [vmem:[#allocation3 + $0x448] sm:$0xff] %vm189_vm0, %v2235_v50  ;;  %v3149_v62 = vmul.f32 1.5, %v5591_v42  ;;  %v5607_v63 = vmul.f32 0.5, %v3406_v47  ;;  %v2508_v0 = vmul.f32 0.5, %v2380_v48  ;;  %v2765_v1 = vmul.f32 1.5, %v5593_v49 }
 0x19b   : > { %2376 = vst.msk [vmem:[#allocation3 + $0x450] sm:$0xff] %vm189_vm0, %v2236_v55  ;;  %v2237_v4 = vadd.f32 %v2097_v40, %v1817_v56  ;;  %v3276_v5 = vadd.f32 %v3148_v51, %v2891_v57  ;;  %v2892_v6 = vadd.f32 %v2764_v58, %v2507_v53  ;;  %v3150_v7 = vmul.f32 1.5, %v5599_v54 }
 0x19c   : > { %v2893_v9 = vadd.f32 %v2765_v1, %v2508_v0  ;;  %v5622_v10 = vmul.f32 0.5, %v5601_v59  ;;  %v2509_v11 = vmul.f32 0.5, %v2381_v60  ;;  %v2766_v12 = vmul.f32 1.5, %v5603_v61 }
 0x19d   : > { %2377 = vst.msk [vmem:[#allocation3 + $0x458] sm:$0xff] %vm189_vm0, %v2237_v4  ;;  %v3661_v14 = vadd.f32 %v5597_v52, %v3276_v5  ;;  %v3277_v15 = vadd.f32 %v3149_v62, %v2892_v6  ;;  %v3151_v16 = vmul.f32 1.5, %v5610_v2  ;;  %v5631_v17 = vmul.f32 0.5, %v5612_v3  ;;  %v3412_v5 = vld [vmem:[#allocation3 + $0x98] sm:$0xff] }
 0x19e   : > { %v3278_v18 = vadd.f32 %v3150_v7, %v2893_v9  ;;  %v2894_v19 = vadd.f32 %v2766_v12, %v2509_v11  ;;  %v2510_v20 = vmul.f32 0.5, %v2635_v29  ;;  %v5633_v21 = vmul.f32 1.5, %v3405_v35 }
 0x19f   : > { %v3796_v22 = vadd.f32 %v5619_v8, %v3661_v14  ;;  %v3662_v23 = vadd.f32 %v5607_v63, %v3277_v15  ;;  %v5638_v24 = vmul.f32 0.5, %v5625_v13  ;;  %v2511_v25 = vmul.f32 0.5, %v2636_v41 }
 0x1a0   : > { %v3663_v27 = vadd.f32 %v5622_v10, %v3278_v18  ;;  %v3279_v28 = vadd.f32 %v3151_v16, %v2894_v19  ;;  %v2895_v30 = vadd.f32 %v3148_v51, %v2510_v20  ;;  %v5644_v31 = vmul.f32 1.5, %v3406_v47  ;;  %v3411_v51 = vld [vmem:[#allocation3 + $0x90] sm:$0xff]  ;;  %v3413_v18 = vld [vmem:[#allocation3 + $0xa0] sm:$0xff] }
 0x1a1   : > { %vm3924_vm3 = vcmp.ge.f32.partialorder %v3796_v22, 0.0  ;;  %v4052_v29 = vmul.f32 0.2, %v3796_v22  ;;  %v3797_v32 = vadd.f32 %v5619_v8, %v3662_v23  ;;  %v2896_v33 = vadd.f32 %v3149_v62, %v2511_v25  ;;  %v3414_v25 = vld [vmem:[#allocation3 + $0xa8] sm:$0xff] }
 0x1a2   : > { %v3798_v35 = vadd.f32 %v5619_v8, %v3663_v27  ;;  %v3664_v36 = vadd.f32 %v5631_v17, %v3279_v28  ;;  %v3280_v37 = vadd.f32 %v5633_v21, %v2895_v30  ;;  %v5651_v38 = vmul.f32 0.5, %v5640_v26 }
 0x1a3   : > { %v4180_v39 = vsel %vm3924_vm3, %v3796_v22, %v4052_v29  ;;  %vm3925_vm4 = vcmp.ge.f32.partialorder %v3797_v32, 0.0  ;;  %v4053_v40 = vmul.f32 0.2, %v3797_v32  ;;  %v3281_v41 = vadd.f32 %v5644_v31, %v2896_v33 }
 0x1a4   : > { %v4308_v43 = vmul.f32 1.4142135, %v4180_v39  ;;  %vm3926_vm5 = vcmp.ge.f32.partialorder %v3798_v35, 0.0  ;;  %v4054_v44 = vmul.f32 0.2, %v3798_v35  ;;  %v3799_v45 = vadd.f32 %v5619_v8, %v3664_v36 }
 0x1a5   : > { %v4181_v46 = vsel %vm3925_vm4, %v3797_v32, %v4053_v40  ;;  %v3665_v47 = vadd.f32 %v5638_v24, %v3280_v37  ;;  %v3666_v48 = vadd.f32 %v5651_v38, %v3281_v41  ;;  %v2512_v50 = vmul.f32 0.5, %v5593_v49 }
 0x1a6   : > { %4436 = vst.msk [vmem:[%s5656_s22] sm:$0xff] %vm189_vm0, %v4308_v43  ;;  %v4309_v53 = vmul.f32 1.4142135, %v4181_v46  ;;  %v4182_v55 = vsel %vm3926_vm5, %v3798_v35, %v4054_v44  ;;  %vm3927_vm6 = vcmp.ge.f32.partialorder %v3799_v45, 0.0  ;;  %v4055_v56 = vmul.f32 0.2, %v3799_v45 }
 0x1a7   : > { %v4310_v57 = vmul.f32 1.4142135, %v4182_v55  ;;  %v3800_v58 = vadd.f32 %v5619_v8, %v3665_v47  ;;  %v3801_v60 = vadd.f32 %v5619_v8, %v3666_v48  ;;  %v2897_v62 = vadd.f32 %v3150_v7, %v2512_v50  ;;  %v3416_v50 = vld [vmem:[#allocation3 + $0xb8] sm:$0xff] }
 0x1a8   : > { %4437 = vst.msk [vmem:[%s5656_s22 + $0x8] sm:$0xff] %vm189_vm0, %v4309_v53  ;;  %v4183_v0 = vsel %vm3927_vm6, %v3799_v45, %v4055_v56  ;;  %v3154_v49 = vmul.f32 1.5, %v5601_v59  ;;  %v5670_v1 = vmul.f32 0.5, %v3411_v51  ;;  %v2513_v4 = vmul.f32 0.5, %v5603_v61 }
 0x1a9   : > { %4438 = vst.msk [vmem:[%s5656_s22 + $0x10] sm:$0xff] %vm189_vm0, %v4310_v57  ;;  %v4311_v6 = vmul.f32 1.4142135, %v4183_v0  ;;  %vm3928_vm7 = vcmp.ge.f32.partialorder %v3800_v58, 0.0  ;;  %v4056_v9 = vmul.f32 0.2, %v3800_v58 }
 0x1aa   : > { %vm3929_vm8 = vcmp.ge.f32.partialorder %v3801_v60, 0.0  ;;  %v4057_v11 = vmul.f32 0.2, %v3801_v60  ;;  %v3282_v12 = vadd.f32 %v3154_v49, %v2897_v62  ;;  %v2898_v7 = vadd.f32 %v3151_v16, %v2513_v4  ;;  %v3417_v4 = vld [vmem:[#allocation3 + $0xc0] sm:$0xff] }
 0x1ab   : > { %v3155_v14 = vmul.f32 1.5, %v5612_v3  ;;  %4439 = vst.msk [vmem:[%s5656_s22 + $0x18] sm:$0xff] %vm189_vm0, %v4311_v6  ;;  %v4184_v59 = vsel %vm3928_vm7, %v3800_v58, %v4056_v9  ;;  %v5678_v15 = vmul.f32 0.5, %v3412_v5  ;;  %v2514_v61 = vmul.f32 0.5, %v5588_v34 }
 0x1ac   : > { %v4312_v19 = vmul.f32 1.4142135, %v4184_v59  ;;  %v4185_v20 = vsel %vm3929_vm8, %v3801_v60, %v4057_v11  ;;  %v3667_v22 = vadd.f32 %v5670_v1, %v3282_v12  ;;  %v3156_v3 = vmul.f32 1.5, %v5625_v13 }
 0x1ad   : > { %v3283_v23 = vadd.f32 %v3155_v14, %v2898_v7  ;;  %v4313_v27 = vmul.f32 1.4142135, %v4185_v20  ;;  %v2899_v16 = vadd.f32 %v5633_v21, %v2514_v61  ;;  %v2515_v28 = vmul.f32 0.5, %v5591_v42  ;;  %v3415_v42 = vld [vmem:[#allocation3 + $0xb0] sm:$0xff] }
 0x1ae   : > { %4440 = vst.msk [vmem:[%s5656_s22 + $0x20] sm:$0xff] %vm189_vm0, %v4312_v19  ;;  %v3802_v30 = vadd.f32 %v5619_v8, %v3667_v22  ;;  %v5689_v29 = vmul.f32 0.5, %v3413_v18  ;;  %v3157_v32 = vmul.f32 1.5, %v5640_v26  ;;  %v5695_v21 = vmul.f32 0.5, %v3414_v25 }
 0x1af   : > { %v3668_v34 = vadd.f32 %v5678_v15, %v3283_v23  ;;  %4441 = vst.msk [vmem:[%s5656_s22 + $0x28] sm:$0xff] %vm189_vm0, %v4313_v27  ;;  %v3284_v33 = vadd.f32 %v3156_v3, %v2899_v16  ;;  %v2900_v35 = vadd.f32 %v5644_v31, %v2515_v28  ;;  %v2516_v13 = vmul.f32 0.5, %v5599_v54  ;;  %v3419_v28 = vld [vmem:[#allocation3 + $0xd0] sm:$0xff] }
 0x1b0   : > { %vm3930_vm9 = vcmp.ge.f32.partialorder %v3802_v30, 0.0  ;;  %v4058_v36 = vmul.f32 0.2, %v3802_v30  ;;  %v3158_v39 = vmul.f32 1.5, %v3411_v51  ;;  %v2517_v43 = vmul.f32 0.5, %v5610_v2 }
 0x1b1   : > { %v3803_v37 = vadd.f32 %v5619_v8, %v3668_v34  ;;  %v3669_v40 = vadd.f32 %v5689_v29, %v3284_v33  ;;  %v3285_v41 = vadd.f32 %v3157_v32, %v2900_v35  ;;  %v2901_v26 = vadd.f32 %v3154_v49, %v2516_v13  ;;  %v3420_v13 = vld [vmem:[#allocation3 + $0xd8] sm:$0xff] }
 0x1b2   : > { %v4186_v44 = vsel %vm3930_vm9, %v3802_v30, %v4058_v36  ;;  %v5701_v45 = vmul.f32 0.5, %v3415_v42  ;;  %v2902_v53 = vadd.f32 %v3155_v14, %v2517_v43  ;;  %v3159_v55 = vmul.f32 1.5, %v3412_v5  ;;  %v3418_v14 = vld [vmem:[#allocation3 + $0xc8] sm:$0xff] }
 0x1b3   : > { %vm3931_vm10 = vcmp.ge.f32.partialorder %v3803_v37, 0.0  ;;  %v4059_v31 = vmul.f32 0.2, %v3803_v37  ;;  %v4314_v46 = vmul.f32 1.4142135, %v4186_v44  ;;  %v3804_v54 = vadd.f32 %v5619_v8, %v3669_v40 }
 0x1b4   : > { %v3670_v47 = vadd.f32 %v5695_v21, %v3285_v41  ;;  %v3286_v48 = vadd.f32 %v3158_v39, %v2901_v26  ;;  %v2903_v56 = vadd.f32 %v5597_v52, %v3156_v3  ;;  %v3287_v62 = vadd.f32 %v3159_v55, %v2902_v53 }
 0x1b5   : > { %v4187_v51 = vsel %vm3931_vm10, %v3803_v37, %v4059_v31  ;;  %4442 = vst.msk [vmem:[%s5656_s22 + $0x30] sm:$0xff] %vm189_vm0, %v4314_v46  ;;  %vm3932_vm11 = vcmp.ge.f32.partialorder %v3804_v54, 0.0  ;;  %v4060_v57 = vmul.f32 0.2, %v3804_v54  ;;  %v5710_v0 = vmul.f32 0.5, %v3416_v50  ;;  %v3421_v46 = vld [vmem:[#allocation3 + $0xe0] sm:$0xff] }
 0x1b6   : > { %v4315_v2 = vmul.f32 1.4142135, %v4187_v51  ;;  %v3805_v58 = vadd.f32 %v5619_v8, %v3670_v47  ;;  %v3671_v60 = vadd.f32 %v5701_v45, %v3286_v48  ;;  %v3160_v49 = vmul.f32 1.5, %v3413_v18 }
 0x1b7   : > { %v4188_v5 = vsel %vm3932_vm11, %v3804_v54, %v4060_v57  ;;  %v2904_v6 = vadd.f32 %v5607_v63, %v3157_v32  ;;  %v3672_v12 = vadd.f32 %v5710_v0, %v3287_v62  ;;  %v5717_v61 = vmul.f32 0.5, %v3417_v4 }
 0x1b8   : > { %4443 = vst.msk [vmem:[%s5656_s22 + $0x38] sm:$0xff] %vm189_vm0, %v4315_v2  ;;  %vm3933_vm12 = vcmp.ge.f32.partialorder %v3805_v58, 0.0  ;;  %v4061_v52 = vmul.f32 0.2, %v3805_v58  ;;  %v4316_v9 = vmul.f32 1.4142135, %v4188_v5  ;;  %v3806_v11 = vadd.f32 %v5619_v8, %v3671_v60 }
 0x1b9   : > { %v3288_v7 = vadd.f32 %v3160_v49, %v2903_v56  ;;  %v3161_v18 = vmul.f32 1.5, %v3414_v25  ;;  %v2905_v19 = vadd.f32 %v5622_v10, %v3158_v39  ;;  %v3807_v63 = vadd.f32 %v5619_v8, %v3672_v12 }
 0x1ba   : > { %v4189_v59 = vsel %vm3933_vm12, %v3805_v58, %v4061_v52  ;;  %4444 = vst.msk [vmem:[%s5656_s22 + $0x40] sm:$0xff] %vm189_vm0, %v4316_v9  ;;  %vm3934_vm13 = vcmp.ge.f32.partialorder %v3806_v11, 0.0  ;;  %v4062_v22 = vmul.f32 0.2, %v3806_v11  ;;  %v5724_v16 = vmul.f32 0.5, %v3418_v14 }
 0x1bb   : > { %v4317_v20 = vmul.f32 1.4142135, %v4189_v59  ;;  %v3673_v23 = vadd.f32 %v5717_v61, %v3288_v7  ;;  %v3289_v27 = vadd.f32 %v3161_v18, %v2904_v6  ;;  %v3162_v3 = vmul.f32 1.5, %v3415_v42  ;;  %v3423_v6 = vld [vmem:[#allocation3 + $0xf0] sm:$0xff] }
 0x1bc   : > { %v4190_v25 = vsel %vm3934_vm13, %v3806_v11, %v4062_v22  ;;  %vm3935_vm14 = vcmp.ge.f32.partialorder %v3807_v63, 0.0  ;;  %v4063_v10 = vmul.f32 0.2, %v3807_v63  ;;  %v2906_v30 = vadd.f32 %v5631_v17, %v3159_v55  ;;  %v3422_v55 = vld [vmem:[#allocation3 + $0xe8] sm:$0xff] }
 0x1bd   : > { %4445 = vst.msk [vmem:[%s5656_s22 + $0x48] sm:$0xff] %vm189_vm0, %v4317_v20  ;;  %v4318_v34 = vmul.f32 1.4142135, %v4190_v25  ;;  %v3808_v32 = vadd.f32 %v5619_v8, %v3673_v23  ;;  %v3674_v33 = vadd.f32 %v5724_v16, %v3289_v27  ;;  %v3290_v35 = vadd.f32 %v3162_v3, %v2905_v19 }
 0x1be   : > { %v4191_v36 = vsel %vm3935_vm14, %v3807_v63, %v4063_v10  ;;  %v5731_v37 = vmul.f32 0.5, %v3419_v28  ;;  %v3163_v42 = vmul.f32 1.5, %v3416_v50  ;;  %v2907_v39 = vadd.f32 %v5638_v24, %v3160_v49 }
 0x1bf   : > { %4446 = vst.msk [vmem:[%s5656_s22 + $0x50] sm:$0xff] %vm189_vm0, %v4318_v34  ;;  %v4319_v40 = vmul.f32 1.4142135, %v4191_v36  ;;  %vm3936_vm15 = vcmp.ge.f32.partialorder %v3808_v32, 0.0  ;;  %v4064_v41 = vmul.f32 0.2, %v3808_v32  ;;  %v3809_v17 = vadd.f32 %v5619_v8, %v3674_v33 }
 0x1c0   : > { %v3675_v26 = vadd.f32 %v5731_v37, %v3290_v35  ;;  %v3291_v43 = vadd.f32 %v3163_v42, %v2906_v30  ;;  %v5738_v44 = vmul.f32 0.5, %v3420_v13  ;;  %v3164_v31 = vmul.f32 1.5, %v3417_v4  ;;  %v3425_v30 = vld [vmem:[#allocation3 + $0x100] sm:$0xff] }
 0x1c1   : > { %4447 = vst.msk [vmem:[%s5656_s22 + $0x58] sm:$0xff] %vm189_vm0, %v4319_v40  ;;  %v4192_v54 = vsel %vm3936_vm15, %v3808_v32, %v4064_v41  ;;  %vm3937_vm1 = vcmp.ge.f32.partialorder %v3809_v17, 0.0  ;;  %v4065_v24 = vmul.f32 0.2, %v3809_v17  ;;  %v2908_v47 = vadd.f32 %v5651_v38, %v3161_v18  ;;  %v3424_v18 = vld [vmem:[#allocation3 + $0xf8] sm:$0xff] }
 0x1c2   : > { %v4320_v48 = vmul.f32 1.4142135, %v4192_v54  ;;  %v3810_v50 = vadd.f32 %v5619_v8, %v3675_v26  ;;  %v3676_v51 = vadd.f32 %v5738_v44, %v3291_v43  ;;  %v3292_v53 = vadd.f32 %v3164_v31, %v2907_v39 }
 0x1c3   : > { %v4193_v56 = vsel %vm3937_vm1, %v3809_v17, %v4065_v24  ;;  %v5745_v2 = vmul.f32 0.5, %v3421_v46  ;;  %v3165_v57 = vmul.f32 1.5, %v3418_v14  ;;  %v2909_v58 = vadd.f32 %v5670_v1, %v3162_v3 }
 0x1c4   : > { %4448 = vst.msk [vmem:[%s5656_s22 + $0x60] sm:$0xff] %vm189_vm0, %v4320_v48  ;;  %v4321_v60 = vmul.f32 1.4142135, %v4193_v56  ;;  %vm3938_vm2 = vcmp.ge.f32.partialorder %v3810_v50, 0.0  ;;  %v4066_v62 = vmul.f32 0.2, %v3810_v50  ;;  %v3811_v38 = vadd.f32 %v5619_v8, %v3676_v51 }
 0x1c5   : > { %v3677_v49 = vadd.f32 %v5745_v2, %v3292_v53  ;;  %v3293_v4 = vadd.f32 %v3165_v57, %v2908_v47  ;;  %v5752_v5 = vmul.f32 0.5, %v3422_v55  ;;  %v3166_v52 = vmul.f32 1.5, %v3419_v28  ;;  %v3427_v47 = vld [vmem:[#allocation3 + $0x110] sm:$0xff] }
 0x1c6   : > { %4449 = vst.msk [vmem:[%s5656_s22 + $0x68] sm:$0xff] %vm189_vm0, %v4321_v60  ;;  %v4194_v9 = vsel %vm3938_vm2, %v3810_v50, %v4066_v62  ;;  %vm3939_vm3 = vcmp.ge.f32.partialorder %v3811_v38, 0.0  ;;  %v4067_v1 = vmul.f32 0.2, %v3811_v38  ;;  %v2910_v11 = vadd.f32 %v5678_v15, %v3163_v42  ;;  %v3426_v42 = vld [vmem:[#allocation3 + $0x108] sm:$0xff] }
 0x1c7   : > { %v4322_v12 = vmul.f32 1.4142135, %v4194_v9  ;;  %v3812_v7 = vadd.f32 %v5619_v8, %v3677_v49  ;;  %v3678_v14 = vadd.f32 %v5752_v5, %v3293_v4  ;;  %v3294_v59 = vadd.f32 %v3166_v52, %v2909_v58 }
 0x1c8   : > { %v4195_v19 = vsel %vm3939_vm3, %v3811_v38, %v4067_v1  ;;  %v5759_v20 = vmul.f32 0.5, %v3423_v6  ;;  %v3167_v22 = vmul.f32 1.5, %v3420_v13  ;;  %v2911_v63 = vadd.f32 %v5689_v29, %v3164_v31 }
 0x1c9   : > { %4450 = vst.msk [vmem:[%s5656_s22 + $0x70] sm:$0xff] %vm189_vm0, %v4322_v12  ;;  %v4323_v23 = vmul.f32 1.4142135, %v4195_v19  ;;  %vm3940_vm4 = vcmp.ge.f32.partialorder %v3812_v7, 0.0  ;;  %v4068_v27 = vmul.f32 0.2, %v3812_v7  ;;  %v3813_v15 = vadd.f32 %v5619_v8, %v3678_v14 }
 0x1ca   : > { %v3679_v3 = vadd.f32 %v5759_v20, %v3294_v59  ;;  %v3295_v28 = vadd.f32 %v3167_v22, %v2910_v11  ;;  %v5766_v25 = vmul.f32 0.5, %v3424_v18  ;;  %v3168_v10 = vmul.f32 1.5, %v3421_v46  ;;  %v3429_v11 = vld [vmem:[#allocation3 + $0x120] sm:$0xff] }
 0x1cb   : > { %4451 = vst.msk [vmem:[%s5656_s22 + $0x78] sm:$0xff] %vm189_vm0, %v4323_v23  ;;  %v4196_v34 = vsel %vm3940_vm4, %v3812_v7, %v4068_v27  ;;  %vm3941_vm5 = vcmp.ge.f32.partialorder %v3813_v15, 0.0  ;;  %v4069_v29 = vmul.f32 0.2, %v3813_v15  ;;  %v2912_v32 = vadd.f32 %v5695_v21, %v3165_v57  ;;  %v3428_v57 = vld [vmem:[#allocation3 + $0x118] sm:$0xff] }
 0x1cc   : > { %v4324_v33 = vmul.f32 1.4142135, %v4196_v34  ;;  %v3814_v35 = vadd.f32 %v5619_v8, %v3679_v3  ;;  %v3680_v13 = vadd.f32 %v5766_v25, %v3295_v28  ;;  %v3296_v36 = vadd.f32 %v3168_v10, %v2911_v63 }
 0x1cd   : > { %v4197_v39 = vsel %vm3941_vm5, %v3813_v15, %v4069_v29  ;;  %v5773_v40 = vmul.f32 0.5, %v3425_v30  ;;  %v3169_v41 = vmul.f32 1.5, %v3422_v55  ;;  %v2913_v17 = vadd.f32 %v5701_v45, %v3166_v52 }
 0x1ce   : > { %4452 = vst.msk [vmem:[%s5656_s22 + $0x80] sm:$0xff] %vm189_vm0, %v4324_v33  ;;  %v4325_v26 = vmul.f32 1.4142135, %v4197_v39  ;;  %vm3942_vm6 = vcmp.ge.f32.partialorder %v3814_v35, 0.0  ;;  %v4070_v43 = vmul.f32 0.2, %v3814_v35  ;;  %v3815_v21 = vadd.f32 %v5619_v8, %v3680_v13 }
 0x1cf   : > { %v3681_v31 = vadd.f32 %v5773_v40, %v3296_v36  ;;  %v3297_v46 = vadd.f32 %v3169_v41, %v2912_v32  ;;  %v5780_v54 = vmul.f32 0.5, %v3426_v42  ;;  %v3170_v24 = vmul.f32 1.5, %v3423_v6  ;;  %v3431_v32 = vld [vmem:[#allocation3 + $0x130] sm:$0xff] }
 0x1d0   : > { %4453 = vst.msk [vmem:[%s5656_s22 + $0x88] sm:$0xff] %vm189_vm0, %v4325_v26  ;;  %v4198_v48 = vsel %vm3942_vm6, %v3814_v35, %v4070_v43  ;;  %vm3943_vm7 = vcmp.ge.f32.partialorder %v3815_v21, 0.0  ;;  %v4071_v45 = vmul.f32 0.2, %v3815_v21  ;;  %v2914_v50 = vadd.f32 %v5710_v0, %v3167_v22  ;;  %v3430_v22 = vld [vmem:[#allocation3 + $0x128] sm:$0xff] }
 0x1d1   : > { %v4326_v51 = vmul.f32 1.4142135, %v4198_v48  ;;  %v3816_v53 = vadd.f32 %v5619_v8, %v3681_v31  ;;  %v3682_v55 = vadd.f32 %v5780_v54, %v3297_v46  ;;  %v3298_v56 = vadd.f32 %v3170_v24, %v2913_v17 }
 0x1d2   : > { %v4199_v58 = vsel %vm3943_vm7, %v3815_v21, %v4071_v45  ;;  %v5787_v60 = vmul.f32 0.5, %v3427_v47  ;;  %v3171_v62 = vmul.f32 1.5, %v3424_v18  ;;  %v2915_v38 = vadd.f32 %v5717_v61, %v3168_v10 }
 0x1d3   : > { %4454 = vst.msk [vmem:[%s5656_s22 + $0x90] sm:$0xff] %vm189_vm0, %v4326_v51  ;;  %v4327_v49 = vmul.f32 1.4142135, %v4199_v58  ;;  %vm3944_vm8 = vcmp.ge.f32.partialorder %v3816_v53, 0.0  ;;  %v4072_v4 = vmul.f32 0.2, %v3816_v53  ;;  %v3817_v0 = vadd.f32 %v5619_v8, %v3682_v55 }
 0x1d4   : > { %v3683_v52 = vadd.f32 %v5787_v60, %v3298_v56  ;;  %v3299_v6 = vadd.f32 %v3171_v62, %v2914_v50  ;;  %v5794_v9 = vmul.f32 0.5, %v3428_v57  ;;  %v3172_v1 = vmul.f32 1.5, %v3425_v30  ;;  %v3433_v50 = vld [vmem:[#allocation3 + $0x140] sm:$0xff] }
 0x1d5   : > { %4455 = vst.msk [vmem:[%s5656_s22 + $0x98] sm:$0xff] %vm189_vm0, %v4327_v49  ;;  %v4200_v12 = vsel %vm3944_vm8, %v3816_v53, %v4072_v4  ;;  %vm3945_vm9 = vcmp.ge.f32.partialorder %v3817_v0, 0.0  ;;  %v4073_v61 = vmul.f32 0.2, %v3817_v0  ;;  %v2916_v7 = vadd.f32 %v5724_v16, %v3169_v41  ;;  %v3432_v41 = vld [vmem:[#allocation3 + $0x138] sm:$0xff] }
 0x1d6   : > { %v4328_v14 = vmul.f32 1.4142135, %v4200_v12  ;;  %v3818_v59 = vadd.f32 %v5619_v8, %v3683_v52  ;;  %v3684_v18 = vadd.f32 %v5794_v9, %v3299_v6  ;;  %v3300_v19 = vadd.f32 %v3172_v1, %v2915_v38 }
 0x1d7   : > { %v4201_v63 = vsel %vm3945_vm9, %v3817_v0, %v4073_v61  ;;  %v5801_v23 = vmul.f32 0.5, %v3429_v11  ;;  %v3173_v27 = vmul.f32 1.5, %v3426_v42  ;;  %v2917_v15 = vadd.f32 %v5731_v37, %v3170_v24 }
 0x1d8   : > { %4456 = vst.msk [vmem:[%s5656_s22 + $0xa0] sm:$0xff] %vm189_vm0, %v4328_v14  ;;  %v4329_v3 = vmul.f32 1.4142135, %v4201_v63  ;;  %vm3946_vm10 = vcmp.ge.f32.partialorder %v3818_v59, 0.0  ;;  %v4074_v28 = vmul.f32 0.2, %v3818_v59  ;;  %v3819_v16 = vadd.f32 %v5619_v8, %v3684_v18 }
 0x1d9   : > { %v3685_v10 = vadd.f32 %v5801_v23, %v3300_v19  ;;  %v3301_v30 = vadd.f32 %v3173_v27, %v2916_v7  ;;  %v5808_v34 = vmul.f32 0.5, %v3430_v22  ;;  %v3174_v29 = vmul.f32 1.5, %v3427_v47  ;;  %v3435_v7 = vld [vmem:[#allocation3 + $0x150] sm:$0xff] }
 0x1da   : > { %4457 = vst.msk [vmem:[%s5656_s22 + $0xa8] sm:$0xff] %vm189_vm0, %v4329_v3  ;;  %v4202_v33 = vsel %vm3946_vm10, %v3818_v59, %v4074_v28  ;;  %vm3947_vm11 = vcmp.ge.f32.partialorder %v3819_v16, 0.0  ;;  %v4075_v37 = vmul.f32 0.2, %v3819_v16  ;;  %v2918_v35 = vadd.f32 %v5738_v44, %v3171_v62  ;;  %v3434_v62 = vld [vmem:[#allocation3 + $0x148] sm:$0xff] }
 0x1db   : > { %v4330_v13 = vmul.f32 1.4142135, %v4202_v33  ;;  %v3820_v36 = vadd.f32 %v5619_v8, %v3685_v10  ;;  %v3686_v42 = vadd.f32 %v5808_v34, %v3301_v30  ;;  %v3302_v39 = vadd.f32 %v3174_v29, %v2917_v15 }
 0x1dc   : > { %v4203_v17 = vsel %vm3947_vm11, %v3819_v16, %v4075_v37  ;;  %v5815_v26 = vmul.f32 0.5, %v3431_v32  ;;  %v3175_v43 = vmul.f32 1.5, %v3428_v57  ;;  %v2919_v21 = vadd.f32 %v5745_v2, %v3172_v1 }
 0x1dd   : > { %4458 = vst.msk [vmem:[%s5656_s22 + $0xb0] sm:$0xff] %vm189_vm0, %v4330_v13  ;;  %v4331_v31 = vmul.f32 1.4142135, %v4203_v17  ;;  %vm3948_vm12 = vcmp.ge.f32.partialorder %v3820_v36, 0.0  ;;  %v4076_v46 = vmul.f32 0.2, %v3820_v36  ;;  %v3821_v44 = vadd.f32 %v5619_v8, %v3686_v42 }
 0x1de   : > { %v3687_v24 = vadd.f32 %v5815_v26, %v3302_v39  ;;  %v3303_v47 = vadd.f32 %v3175_v43, %v2918_v35  ;;  %v5822_v48 = vmul.f32 0.5, %v3432_v41  ;;  %v3176_v45 = vmul.f32 1.5, %v3429_v11  ;;  %v3437_v35 = vld [vmem:[#allocation3 + $0x160] sm:$0xff] }
 0x1df   : > { %4459 = vst.msk [vmem:[%s5656_s22 + $0xb8] sm:$0xff] %vm189_vm0, %v4331_v31  ;;  %v4204_v51 = vsel %vm3948_vm12, %v3820_v36, %v4076_v46  ;;  %vm3949_vm13 = vcmp.ge.f32.partialorder %v3821_v44, 0.0  ;;  %v4077_v2 = vmul.f32 0.2, %v3821_v44  ;;  %v2920_v53 = vadd.f32 %v5752_v5, %v3173_v27  ;;  %v3436_v27 = vld [vmem:[#allocation3 + $0x158] sm:$0xff] }
 0x1e0   : > { %v4332_v55 = vmul.f32 1.4142135, %v4204_v51  ;;  %v3822_v56 = vadd.f32 %v5619_v8, %v3687_v24  ;;  %v3688_v57 = vadd.f32 %v5822_v48, %v3303_v47  ;;  %v3304_v58 = vadd.f32 %v3176_v45, %v2919_v21 }
 0x1e1   : > { %v4205_v38 = vsel %vm3949_vm13, %v3821_v44, %v4077_v2  ;;  %v5829_v49 = vmul.f32 0.5, %v3433_v50  ;;  %v3177_v4 = vmul.f32 1.5, %v3430_v22  ;;  %v2921_v0 = vadd.f32 %v5759_v20, %v3174_v29 }
 0x1e2   : > { %4460 = vst.msk [vmem:[%s5656_s22 + $0xc0] sm:$0xff] %vm189_vm0, %v4332_v55  ;;  %v4333_v52 = vmul.f32 1.4142135, %v4205_v38  ;;  %vm3950_vm14 = vcmp.ge.f32.partialorder %v3822_v56, 0.0  ;;  %v4078_v6 = vmul.f32 0.2, %v3822_v56  ;;  %v3823_v5 = vadd.f32 %v5619_v8, %v3688_v57 }
 0x1e3   : > { %v3689_v1 = vadd.f32 %v5829_v49, %v3304_v58  ;;  %v3305_v11 = vadd.f32 %v3177_v4, %v2920_v53  ;;  %v5836_v12 = vmul.f32 0.5, %v3434_v62  ;;  %v3178_v61 = vmul.f32 1.5, %v3431_v32  ;;  %v3439_v53 = vld [vmem:[#allocation3 + $0x170] sm:$0xff] }
 0x1e4   : > { %4461 = vst.msk [vmem:[%s5656_s22 + $0xc8] sm:$0xff] %vm189_vm0, %v4333_v52  ;;  %v4206_v14 = vsel %vm3950_vm14, %v3822_v56, %v4078_v6  ;;  %vm3951_vm15 = vcmp.ge.f32.partialorder %v3823_v5, 0.0  ;;  %v4079_v20 = vmul.f32 0.2, %v3823_v5  ;;  %v2922_v59 = vadd.f32 %v5766_v25, %v3175_v43  ;;  %v3438_v43 = vld [vmem:[#allocation3 + $0x168] sm:$0xff] }
 0x1e5   : > { %v4334_v18 = vmul.f32 1.4142135, %v4206_v14  ;;  %v3824_v19 = vadd.f32 %v5619_v8, %v3689_v1  ;;  %v3690_v22 = vadd.f32 %v5836_v12, %v3305_v11  ;;  %v3306_v63 = vadd.f32 %v3178_v61, %v2921_v0 }
 0x1e6   : > { %v4207_v15 = vsel %vm3951_vm15, %v3823_v5, %v4079_v20  ;;  %v5843_v3 = vmul.f32 0.5, %v3435_v7  ;;  %v3179_v28 = vmul.f32 1.5, %v3432_v41  ;;  %v2923_v16 = vadd.f32 %v5773_v40, %v3176_v45 }
 0x1e7   : > { %4462 = vst.msk [vmem:[%s5656_s22 + $0xd0] sm:$0xff] %vm189_vm0, %v4334_v18  ;;  %v4335_v10 = vmul.f32 1.4142135, %v4207_v15  ;;  %vm3952_vm1 = vcmp.ge.f32.partialorder %v3824_v19, 0.0  ;;  %v4080_v30 = vmul.f32 0.2, %v3824_v19  ;;  %v3825_v25 = vadd.f32 %v5619_v8, %v3690_v22 }
 0x1e8   : > { %v3691_v29 = vadd.f32 %v5843_v3, %v3306_v63  ;;  %v3307_v32 = vadd.f32 %v3179_v28, %v2922_v59  ;;  %v5850_v33 = vmul.f32 0.5, %v3436_v27  ;;  %v3180_v37 = vmul.f32 1.5, %v3433_v50  ;;  %v3441_v59 = vld [vmem:[#allocation3 + $0x180] sm:$0xff] }
 0x1e9   : > { %4463 = vst.msk [vmem:[%s5656_s22 + $0xd8] sm:$0xff] %vm189_vm0, %v4335_v10  ;;  %v4208_v13 = vsel %vm3952_vm1, %v3824_v19, %v4080_v30  ;;  %vm3953_vm2 = vcmp.ge.f32.partialorder %v3825_v25, 0.0  ;;  %v4081_v40 = vmul.f32 0.2, %v3825_v25  ;;  %v2924_v36 = vadd.f32 %v5780_v54, %v3177_v4  ;;  %v3440_v4 = vld [vmem:[#allocation3 + $0x178] sm:$0xff] }
 0x1ea   : > { %v4336_v42 = vmul.f32 1.4142135, %v4208_v13  ;;  %v3826_v39 = vadd.f32 %v5619_v8, %v3691_v29  ;;  %v3692_v41 = vadd.f32 %v5850_v33, %v3307_v32  ;;  %v3308_v17 = vadd.f32 %v3180_v37, %v2923_v16 }
 0x1eb   : > { %v4209_v21 = vsel %vm3953_vm2, %v3825_v25, %v4081_v40  ;;  %v5857_v31 = vmul.f32 0.5, %v3437_v35  ;;  %v3181_v46 = vmul.f32 1.5, %v3434_v62  ;;  %v2925_v44 = vadd.f32 %v5787_v60, %v3178_v61 }
 0x1ec   : > { %4464 = vst.msk [vmem:[%s5656_s22 + $0xe0] sm:$0xff] %vm189_vm0, %v4336_v42  ;;  %v4337_v24 = vmul.f32 1.4142135, %v4209_v21  ;;  %vm3954_vm3 = vcmp.ge.f32.partialorder %v3826_v39, 0.0  ;;  %v4082_v47 = vmul.f32 0.2, %v3826_v39  ;;  %v3827_v54 = vadd.f32 %v5619_v8, %v3692_v41 }
 0x1ed   : > { %v3693_v45 = vadd.f32 %v5857_v31, %v3308_v17  ;;  %v3309_v50 = vadd.f32 %v3181_v46, %v2924_v36  ;;  %v5864_v51 = vmul.f32 0.5, %v3438_v43  ;;  %v3182_v2 = vmul.f32 1.5, %v3435_v7  ;;  %v3443_v36 = vld [vmem:[#allocation3 + $0x190] sm:$0xff] }
 0x1ee   : > { %4465 = vst.msk [vmem:[%s5656_s22 + $0xe8] sm:$0xff] %vm189_vm0, %v4337_v24  ;;  %v4210_v55 = vsel %vm3954_vm3, %v3826_v39, %v4082_v47  ;;  %vm3955_vm4 = vcmp.ge.f32.partialorder %v3827_v54, 0.0  ;;  %v4083_v60 = vmul.f32 0.2, %v3827_v54  ;;  %v2926_v56 = vadd.f32 %v5794_v9, %v3179_v28  ;;  %v3442_v28 = vld [vmem:[#allocation3 + $0x188] sm:$0xff] }
 0x1ef   : > { %v4338_v57 = vmul.f32 1.4142135, %v4210_v55  ;;  %v3828_v58 = vadd.f32 %v5619_v8, %v3693_v45  ;;  %v3694_v62 = vadd.f32 %v5864_v51, %v3309_v50  ;;  %v3310_v38 = vadd.f32 %v3182_v2, %v2925_v44 }
 0x1f0   : > { %v4211_v0 = vsel %vm3955_vm4, %v3827_v54, %v4083_v60  ;;  %v5871_v52 = vmul.f32 0.5, %v3439_v53  ;;  %v3183_v6 = vmul.f32 1.5, %v3436_v27  ;;  %v2927_v5 = vadd.f32 %v5801_v23, %v3180_v37 }
 0x1f1   : > { %4466 = vst.msk [vmem:[%s5656_s22 + $0xf0] sm:$0xff] %vm189_vm0, %v4338_v57  ;;  %v4339_v1 = vmul.f32 1.4142135, %v4211_v0  ;;  %vm3956_vm5 = vcmp.ge.f32.partialorder %v3828_v58, 0.0  ;;  %v4084_v11 = vmul.f32 0.2, %v3828_v58  ;;  %v3829_v9 = vadd.f32 %v5619_v8, %v3694_v62 }
 0x1f2   : > { %v3695_v61 = vadd.f32 %v5871_v52, %v3310_v38  ;;  %v3311_v7 = vadd.f32 %v3183_v6, %v2926_v56  ;;  %v5878_v14 = vmul.f32 0.5, %v3440_v4  ;;  %v3184_v20 = vmul.f32 1.5, %v3437_v35  ;;  %v3445_v56 = vld [vmem:[#allocation3 + $0x1a0] sm:$0xff] }
 0x1f3   : > { %4467 = vst.msk [vmem:[%s5656_s22 + $0xf8] sm:$0xff] %vm189_vm0, %v4339_v1  ;;  %v4212_v18 = vsel %vm3956_vm5, %v3828_v58, %v4084_v11  ;;  %vm3957_vm6 = vcmp.ge.f32.partialorder %v3829_v9, 0.0  ;;  %v4085_v23 = vmul.f32 0.2, %v3829_v9  ;;  %v2928_v19 = vadd.f32 %v5808_v34, %v3181_v46  ;;  %v3444_v46 = vld [vmem:[#allocation3 + $0x198] sm:$0xff] }
 0x1f4   : > { %v4340_v22 = vmul.f32 1.4142135, %v4212_v18  ;;  %v3830_v63 = vadd.f32 %v5619_v8, %v3695_v61  ;;  %v3696_v27 = vadd.f32 %v5878_v14, %v3311_v7  ;;  %v3312_v15 = vadd.f32 %v3184_v20, %v2927_v5 }
 0x1f5   : > { %v4213_v16 = vsel %vm3957_vm6, %v3829_v9, %v4085_v23  ;;  %v5885_v10 = vmul.f32 0.5, %v3441_v59  ;;  %v3185_v30 = vmul.f32 1.5, %v3438_v43  ;;  %v2929_v25 = vadd.f32 %v5815_v26, %v3182_v2 }
 0x1f6   : > { %4468 = vst.msk [vmem:[%s5656_s22 + $0x100] sm:$0xff] %vm189_vm0, %v4340_v22  ;;  %v4341_v29 = vmul.f32 1.4142135, %v4213_v16  ;;  %vm3958_vm7 = vcmp.ge.f32.partialorder %v3830_v63, 0.0  ;;  %v4086_v32 = vmul.f32 0.2, %v3830_v63  ;;  %v3831_v34 = vadd.f32 %v5619_v8, %v3696_v27 }
 0x1f7   : > { %v3697_v37 = vadd.f32 %v5885_v10, %v3312_v15  ;;  %v3313_v35 = vadd.f32 %v3185_v30, %v2928_v19  ;;  %v5892_v13 = vmul.f32 0.5, %v3442_v28  ;;  %v3186_v40 = vmul.f32 1.5, %v3439_v53  ;;  %v3447_v19 = vld [vmem:[#allocation3 + $0x1b0] sm:$0xff] }
 0x1f8   : > { %4469 = vst.msk [vmem:[%s5656_s22 + $0x108] sm:$0xff] %vm189_vm0, %v4341_v29  ;;  %v4214_v42 = vsel %vm3958_vm7, %v3830_v63, %v4086_v32  ;;  %vm3959_vm8 = vcmp.ge.f32.partialorder %v3831_v34, 0.0  ;;  %v4087_v26 = vmul.f32 0.2, %v3831_v34  ;;  %v2930_v39 = vadd.f32 %v5822_v48, %v3183_v6  ;;  %v3446_v6 = vld [vmem:[#allocation3 + $0x1a8] sm:$0xff] }
 0x1f9   : > { %v4342_v41 = vmul.f32 1.4142135, %v4214_v42  ;;  %v3832_v17 = vadd.f32 %v5619_v8, %v3697_v37  ;;  %v3698_v43 = vadd.f32 %v5892_v13, %v3313_v35  ;;  %v3314_v21 = vadd.f32 %v3186_v40, %v2929_v25 }
 0x1fa   : > { %v4215_v44 = vsel %vm3959_vm8, %v3831_v34, %v4087_v26  ;;  %v5899_v24 = vmul.f32 0.5, %v3443_v36  ;;  %v3187_v47 = vmul.f32 1.5, %v3440_v4  ;;  %v2931_v54 = vadd.f32 %v5829_v49, %v3184_v20 }
 0x1fb   : > { %4470 = vst.msk [vmem:[%s5656_s22 + $0x110] sm:$0xff] %vm189_vm0, %v4342_v41  ;;  %v4343_v45 = vmul.f32 1.4142135, %v4215_v44  ;;  %vm3960_vm9 = vcmp.ge.f32.partialorder %v3832_v17, 0.0  ;;  %v4088_v50 = vmul.f32 0.2, %v3832_v17  ;;  %v3833_v48 = vadd.f32 %v5619_v8, %v3698_v43 }
 0x1fc   : > { %v3699_v2 = vadd.f32 %v5899_v24, %v3314_v21  ;;  %v3315_v53 = vadd.f32 %v3187_v47, %v2930_v39  ;;  %v5906_v55 = vmul.f32 0.5, %v3444_v46  ;;  %v3188_v60 = vmul.f32 1.5, %v3441_v59  ;;  %v3449_v39 = vld [vmem:[#allocation3 + $0x1c0] sm:$0xff] }
 0x1fd   : > { %4471 = vst.msk [vmem:[%s5656_s22 + $0x118] sm:$0xff] %vm189_vm0, %v4343_v45  ;;  %v4216_v57 = vsel %vm3960_vm9, %v3832_v17, %v4088_v50  ;;  %vm3961_vm10 = vcmp.ge.f32.partialorder %v3833_v48, 0.0  ;;  %v4089_v49 = vmul.f32 0.2, %v3833_v48  ;;  %v2932_v58 = vadd.f32 %v5836_v12, %v3185_v30  ;;  %v3448_v30 = vld [vmem:[#allocation3 + $0x1b8] sm:$0xff] }
 0x1fe   : > { %v4344_v62 = vmul.f32 1.4142135, %v4216_v57  ;;  %v3834_v38 = vadd.f32 %v5619_v8, %v3699_v2  ;;  %v3700_v4 = vadd.f32 %v5906_v55, %v3315_v53  ;;  %v3316_v0 = vadd.f32 %v3188_v60, %v2931_v54 }
 0x1ff   : > { %v4217_v5 = vsel %vm3961_vm10, %v3833_v48, %v4089_v49  ;;  %v5913_v1 = vmul.f32 0.5, %v3445_v56  ;;  %v3189_v11 = vmul.f32 1.5, %v3442_v28  ;;  %v2933_v9 = vadd.f32 %v5843_v3, %v3186_v40 }
 0x200   : > { %4472 = vst.msk [vmem:[%s5656_s22 + $0x120] sm:$0xff] %vm189_vm0, %v4344_v62  ;;  %v4345_v61 = vmul.f32 1.4142135, %v4217_v5  ;;  %vm3962_vm11 = vcmp.ge.f32.partialorder %v3834_v38, 0.0  ;;  %v4090_v7 = vmul.f32 0.2, %v3834_v38  ;;  %v3835_v12 = vadd.f32 %v5619_v8, %v3700_v4 }
 0x201   : > { %v3701_v20 = vadd.f32 %v5913_v1, %v3316_v0  ;;  %v3317_v59 = vadd.f32 %v3189_v11, %v2932_v58  ;;  %v5920_v18 = vmul.f32 0.5, %v3446_v6  ;;  %v3190_v23 = vmul.f32 1.5, %v3443_v36  ;;  %v3451_v58 = vld [vmem:[#allocation3 + $0x1d0] sm:$0xff] }
 0x202   : > { %4473 = vst.msk [vmem:[%s5656_s22 + $0x128] sm:$0xff] %vm189_vm0, %v4345_v61  ;;  %v4218_v22 = vsel %vm3962_vm11, %v3834_v38, %v4090_v7  ;;  %vm3963_vm12 = vcmp.ge.f32.partialorder %v3835_v12, 0.0  ;;  %v4091_v3 = vmul.f32 0.2, %v3835_v12  ;;  %v2934_v63 = vadd.f32 %v5850_v33, %v3187_v47  ;;  %v3450_v47 = vld [vmem:[#allocation3 + $0x1c8] sm:$0xff] }
 0x203   : > { %v4346_v27 = vmul.f32 1.4142135, %v4218_v22  ;;  %v3836_v15 = vadd.f32 %v5619_v8, %v3701_v20  ;;  %v3702_v28 = vadd.f32 %v5920_v18, %v3317_v59  ;;  %v3318_v16 = vadd.f32 %v3190_v23, %v2933_v9 }
 0x204   : > { %v4219_v25 = vsel %vm3963_vm12, %v3835_v12, %v4091_v3  ;;  %v5927_v29 = vmul.f32 0.5, %v3447_v19  ;;  %v3191_v32 = vmul.f32 1.5, %v3444_v46  ;;  %v2935_v34 = vadd.f32 %v5857_v31, %v3188_v60 }
 0x205   : > { %4474 = vst.msk [vmem:[%s5656_s22 + $0x130] sm:$0xff] %vm189_vm0, %v4346_v27  ;;  %v4347_v37 = vmul.f32 1.4142135, %v4219_v25  ;;  %vm3964_vm13 = vcmp.ge.f32.partialorder %v3836_v15, 0.0  ;;  %v4092_v35 = vmul.f32 0.2, %v3836_v15  ;;  %v3837_v33 = vadd.f32 %v5619_v8, %v3702_v28 }
 0x206   : > { %v3703_v40 = vadd.f32 %v5927_v29, %v3318_v16  ;;  %v3319_v36 = vadd.f32 %v3191_v32, %v2934_v63  ;;  %v5934_v42 = vmul.f32 0.5, %v3448_v30  ;;  %v3192_v26 = vmul.f32 1.5, %v3445_v56  ;;  %v5942_v8 = vld [vmem:[%s6520_s1] ss:$0 sm:$0xff]  ;;  %v3453_v63 = vld [vmem:[#allocation3 + $0x1e0] sm:$0xff] }
 0x207   : > { %4475 = vst.msk [vmem:[%s5656_s22 + $0x138] sm:$0xff] %vm189_vm0, %v4347_v37  ;;  %v4220_v41 = vsel %vm3964_vm13, %v3836_v15, %v4092_v35  ;;  %vm3965_vm14 = vcmp.ge.f32.partialorder %v3837_v33, 0.0  ;;  %v4093_v31 = vmul.f32 0.2, %v3837_v33  ;;  %v2936_v17 = vadd.f32 %v5864_v51, %v3189_v11  ;;  %v3452_v11 = vld [vmem:[#allocation3 + $0x1d8] sm:$0xff] }
 0x208   : > { %v4348_v43 = vmul.f32 1.4142135, %v4220_v41  ;;  %v3838_v21 = vadd.f32 %v5942_v8, %v3703_v40  ;;  %v3704_v46 = vadd.f32 %v5934_v42, %v3319_v36  ;;  %v3320_v44 = vadd.f32 %v3192_v26, %v2935_v34 }
 0x209   : > { %v4221_v54 = vsel %vm3965_vm14, %v3837_v33, %v4093_v31  ;;  %v5946_v45 = vmul.f32 0.5, %v3449_v39  ;;  %v3193_v50 = vmul.f32 1.5, %v3446_v6  ;;  %v2937_v48 = vadd.f32 %v5871_v52, %v3190_v23 }
 0x20a   : > { %4476 = vst.msk [vmem:[%s5656_s22 + $0x140] sm:$0xff] %vm189_vm0, %v4348_v43  ;;  %v4349_v51 = vmul.f32 1.4142135, %v4221_v54  ;;  %vm3966_vm15 = vcmp.ge.f32.partialorder %v3838_v21, 0.0  ;;  %v4094_v2 = vmul.f32 0.2, %v3838_v21  ;;  %v3839_v53 = vadd.f32 %v5942_v8, %v3704_v46 }
 0x20b   : > { %v3705_v60 = vadd.f32 %v5946_v45, %v3320_v44  ;;  %v3321_v56 = vadd.f32 %v3193_v50, %v2936_v17  ;;  %v5953_v57 = vmul.f32 0.5, %v3450_v47  ;;  %v3194_v49 = vmul.f32 1.5, %v3447_v19  ;;  %v3455_v17 = vld [vmem:[#allocation3 + $0x1f0] sm:$0xff] }
 0x20c   : > { %4477 = vst.msk [vmem:[%s5656_s22 + $0x148] sm:$0xff] %vm189_vm0, %v4349_v51  ;;  %v4222_v62 = vsel %vm3966_vm15, %v3838_v21, %v4094_v2  ;;  %vm3967_vm1 = vcmp.ge.f32.partialorder %v3839_v53, 0.0  ;;  %v4095_v52 = vmul.f32 0.2, %v3839_v53  ;;  %v2938_v38 = vadd.f32 %v5878_v14, %v3191_v32  ;;  %v3454_v32 = vld [vmem:[#allocation3 + $0x1e8] sm:$0xff] }
 0x20d   : > { %v4350_v4 = vmul.f32 1.4142135, %v4222_v62  ;;  %v3840_v0 = vadd.f32 %v5942_v8, %v3705_v60  ;;  %v3706_v6 = vadd.f32 %v5953_v57, %v3321_v56  ;;  %v3322_v5 = vadd.f32 %v3194_v49, %v2937_v48 }
 0x20e   : > { %v4223_v9 = vsel %vm3967_vm1, %v3839_v53, %v4095_v52  ;;  %v5960_v61 = vmul.f32 0.5, %v3451_v58  ;;  %v3195_v7 = vmul.f32 1.5, %v3448_v30  ;;  %v2939_v12 = vadd.f32 %v5885_v10, %v3192_v26 }
 0x20f   : > { %4478 = vst.msk [vmem:[%s5656_s22 + $0x150] sm:$0xff] %vm189_vm0, %v4350_v4  ;;  %v4351_v20 = vmul.f32 1.4142135, %v4223_v9  ;;  %vm3968_vm2 = vcmp.ge.f32.partialorder %v3840_v0, 0.0  ;;  %v4096_v59 = vmul.f32 0.2, %v3840_v0  ;;  %v3841_v14 = vadd.f32 %v5942_v8, %v3706_v6 }
 0x210   : > { %v3707_v23 = vadd.f32 %v5960_v61, %v3322_v5  ;;  %v3323_v19 = vadd.f32 %v3195_v7, %v2938_v38  ;;  %v5967_v22 = vmul.f32 0.5, %v3452_v11  ;;  %v3196_v3 = vmul.f32 1.5, %v3449_v39  ;;  %v3457_v38 = vld [vmem:[#allocation3 + $0x200] sm:$0xff] }
 0x211   : > { %4479 = vst.msk [vmem:[%s5656_s22 + $0x158] sm:$0xff] %vm189_vm0, %v4351_v20  ;;  %v4224_v27 = vsel %vm3968_vm2, %v3840_v0, %v4096_v59  ;;  %vm3969_vm3 = vcmp.ge.f32.partialorder %v3841_v14, 0.0  ;;  %v4097_v10 = vmul.f32 0.2, %v3841_v14  ;;  %v2940_v15 = vadd.f32 %v5892_v13, %v3193_v50  ;;  %v3456_v50 = vld [vmem:[#allocation3 + $0x1f8] sm:$0xff] }
 0x212   : > { %v4352_v28 = vmul.f32 1.4142135, %v4224_v27  ;;  %v3842_v16 = vadd.f32 %v5942_v8, %v3707_v23  ;;  %v3708_v30 = vadd.f32 %v5967_v22, %v3323_v19  ;;  %v3324_v25 = vadd.f32 %v3196_v3, %v2939_v12 }
 0x213   : > { %v4225_v34 = vsel %vm3969_vm3, %v3841_v14, %v4097_v10  ;;  %v5974_v37 = vmul.f32 0.5, %v3453_v63  ;;  %v3197_v35 = vmul.f32 1.5, %v3450_v47  ;;  %v2941_v33 = vadd.f32 %v5899_v24, %v3194_v49 }
 0x214   : > { %4480 = vst.msk [vmem:[%s5656_s22 + $0x160] sm:$0xff] %vm189_vm0, %v4352_v28  ;;  %v4353_v40 = vmul.f32 1.4142135, %v4225_v34  ;;  %vm3970_vm4 = vcmp.ge.f32.partialorder %v3842_v16, 0.0  ;;  %v4098_v36 = vmul.f32 0.2, %v3842_v16  ;;  %v3843_v13 = vadd.f32 %v5942_v8, %v3708_v30 }
 0x215   : > { %v3709_v26 = vadd.f32 %v5974_v37, %v3324_v25  ;;  %v3325_v39 = vadd.f32 %v3197_v35, %v2940_v15  ;;  %v5981_v41 = vmul.f32 0.5, %v3454_v32  ;;  %v3198_v31 = vmul.f32 1.5, %v3451_v58  ;;  %v3459_v15 = vld [vmem:[#allocation3 + $0x210] sm:$0xff] }
 0x216   : > { %4481 = vst.msk [vmem:[%s5656_s22 + $0x168] sm:$0xff] %vm189_vm0, %v4353_v40  ;;  %v4226_v43 = vsel %vm3970_vm4, %v3842_v16, %v4098_v36  ;;  %vm3971_vm5 = vcmp.ge.f32.partialorder %v3843_v13, 0.0  ;;  %v4099_v24 = vmul.f32 0.2, %v3843_v13  ;;  %v2942_v21 = vadd.f32 %v5906_v55, %v3195_v7  ;;  %v3458_v7 = vld [vmem:[#allocation3 + $0x208] sm:$0xff] }
 0x217   : > { %v4354_v46 = vmul.f32 1.4142135, %v4226_v43  ;;  %v3844_v44 = vadd.f32 %v5942_v8, %v3709_v26  ;;  %v3710_v47 = vadd.f32 %v5981_v41, %v3325_v39  ;;  %v3326_v54 = vadd.f32 %v3198_v31, %v2941_v33 }
 0x218   : > { %v4227_v48 = vsel %vm3971_vm5, %v3843_v13, %v4099_v24  ;;  %v5988_v51 = vmul.f32 0.5, %v3455_v17  ;;  %v3199_v2 = vmul.f32 1.5, %v3452_v11  ;;  %v2943_v53 = vadd.f32 %v5913_v1, %v3196_v3 }
 0x219   : > { %4482 = vst.msk [vmem:[%s5656_s22 + $0x170] sm:$0xff] %vm189_vm0, %v4354_v46  ;;  %v4355_v60 = vmul.f32 1.4142135, %v4227_v48  ;;  %vm3972_vm6 = vcmp.ge.f32.partialorder %v3844_v44, 0.0  ;;  %v4100_v56 = vmul.f32 0.2, %v3844_v44  ;;  %v3845_v55 = vadd.f32 %v5942_v8, %v3710_v47 }
 0x21a   : > { %v3711_v49 = vadd.f32 %v5988_v51, %v3326_v54  ;;  %v3327_v58 = vadd.f32 %v3199_v2, %v2942_v21  ;;  %v5995_v62 = vmul.f32 0.5, %v3456_v50  ;;  %v3200_v52 = vmul.f32 1.5, %v3453_v63  ;;  %v3461_v21 = vld [vmem:[#allocation3 + $0x220] sm:$0xff] }
 0x21b   : > { %4483 = vst.msk [vmem:[%s5656_s22 + $0x178] sm:$0xff] %vm189_vm0, %v4355_v60  ;;  %v4228_v4 = vsel %vm3972_vm6, %v3844_v44, %v4100_v56  ;;  %vm3973_vm7 = vcmp.ge.f32.partialorder %v3845_v55, 0.0  ;;  %v4101_v1 = vmul.f32 0.2, %v3845_v55  ;;  %v2944_v0 = vadd.f32 %v5920_v18, %v3197_v35  ;;  %v3460_v35 = vld [vmem:[#allocation3 + $0x218] sm:$0xff] }
 0x21c   : > { %v4356_v6 = vmul.f32 1.4142135, %v4228_v4  ;;  %v3846_v5 = vadd.f32 %v5942_v8, %v3711_v49  ;;  %v3712_v11 = vadd.f32 %v5995_v62, %v3327_v58  ;;  %v3328_v9 = vadd.f32 %v3200_v52, %v2943_v53 }
 0x21d   : > { %v4229_v12 = vsel %vm3973_vm7, %v3845_v55, %v4101_v1  ;;  %v6002_v20 = vmul.f32 0.5, %v3457_v38  ;;  %v3201_v59 = vmul.f32 1.5, %v3454_v32  ;;  %v2945_v14 = vadd.f32 %v5927_v29, %v3198_v31 }
 0x21e   : > { %4484 = vst.msk [vmem:[%s5656_s22 + $0x180] sm:$0xff] %vm189_vm0, %v4356_v6  ;;  %v4357_v23 = vmul.f32 1.4142135, %v4229_v12  ;;  %vm3974_vm8 = vcmp.ge.f32.partialorder %v3846_v5, 0.0  ;;  %v4102_v19 = vmul.f32 0.2, %v3846_v5  ;;  %v3847_v18 = vadd.f32 %v5942_v8, %v3712_v11 }
 0x21f   : > { %v3713_v3 = vadd.f32 %v6002_v20, %v3328_v9  ;;  %v3329_v63 = vadd.f32 %v3201_v59, %v2944_v0  ;;  %v6009_v27 = vmul.f32 0.5, %v3458_v7  ;;  %v3202_v10 = vmul.f32 1.5, %v3455_v17  ;;  %v3463_v0 = vld [vmem:[#allocation3 + $0x230] sm:$0xff] }
 0x220   : > { %4485 = vst.msk [vmem:[%s5656_s22 + $0x188] sm:$0xff] %vm189_vm0, %v4357_v23  ;;  %v4230_v28 = vsel %vm3974_vm8, %v3846_v5, %v4102_v19  ;;  %vm3975_vm9 = vcmp.ge.f32.partialorder %v3847_v18, 0.0  ;;  %v4103_v29 = vmul.f32 0.2, %v3847_v18  ;;  %v2946_v16 = vadd.f32 %v5934_v42, %v3199_v2  ;;  %v3462_v2 = vld [vmem:[#allocation3 + $0x228] sm:$0xff] }
 0x221   : > { %v4358_v30 = vmul.f32 1.4142135, %v4230_v28  ;;  %v3848_v25 = vadd.f32 %v5942_v8, %v3713_v3  ;;  %v3714_v32 = vadd.f32 %v6009_v27, %v3329_v63  ;;  %v3330_v34 = vadd.f32 %v3202_v10, %v2945_v14 }
 0x222   : > { %v4231_v33 = vsel %vm3975_vm9, %v3847_v18, %v4103_v29  ;;  %v6016_v40 = vmul.f32 0.5, %v3459_v15  ;;  %v3203_v36 = vmul.f32 1.5, %v3456_v50  ;;  %v2947_v13 = vadd.f32 %v5946_v45, %v3200_v52 }
 0x223   : > { %4486 = vst.msk [vmem:[%s5656_s22 + $0x190] sm:$0xff] %vm189_vm0, %v4358_v30  ;;  %v4359_v26 = vmul.f32 1.4142135, %v4231_v33  ;;  %vm3976_vm10 = vcmp.ge.f32.partialorder %v3848_v25, 0.0  ;;  %v4104_v39 = vmul.f32 0.2, %v3848_v25  ;;  %v3849_v42 = vadd.f32 %v5942_v8, %v3714_v32 }
 0x224   : > { %v3715_v31 = vadd.f32 %v6016_v40, %v3330_v34  ;;  %v3331_v17 = vadd.f32 %v3203_v36, %v2946_v16  ;;  %v6023_v43 = vmul.f32 0.5, %v3460_v35  ;;  %v3204_v24 = vmul.f32 1.5, %v3457_v38  ;;  %v3465_v16 = vld [vmem:[#allocation3 + $0x240] sm:$0xff] }
 0x225   : > { %4487 = vst.msk [vmem:[%s5656_s22 + $0x198] sm:$0xff] %vm189_vm0, %v4359_v26  ;;  %v4232_v46 = vsel %vm3976_vm10, %v3848_v25, %v4104_v39  ;;  %vm3977_vm11 = vcmp.ge.f32.partialorder %v3849_v42, 0.0  ;;  %v4105_v45 = vmul.f32 0.2, %v3849_v42  ;;  %v2948_v44 = vadd.f32 %v5953_v57, %v3201_v59  ;;  %v3464_v59 = vld [vmem:[#allocation3 + $0x238] sm:$0xff] }
 0x226   : > { %v4360_v47 = vmul.f32 1.4142135, %v4232_v46  ;;  %v3850_v54 = vadd.f32 %v5942_v8, %v3715_v31  ;;  %v3716_v50 = vadd.f32 %v6023_v43, %v3331_v17  ;;  %v3332_v48 = vadd.f32 %v3204_v24, %v2947_v13 }
 0x227   : > { %v4233_v53 = vsel %vm3977_vm11, %v3849_v42, %v4105_v45  ;;  %v6030_v60 = vmul.f32 0.5, %v3461_v21  ;;  %v3205_v56 = vmul.f32 1.5, %v3458_v7  ;;  %v2949_v55 = vadd.f32 %v5960_v61, %v3202_v10 }
 0x228   : > { %4488 = vst.msk [vmem:[%s5656_s22 + $0x1a0] sm:$0xff] %vm189_vm0, %v4360_v47  ;;  %v4361_v49 = vmul.f32 1.4142135, %v4233_v53  ;;  %vm3978_vm12 = vcmp.ge.f32.partialorder %v3850_v54, 0.0  ;;  %v4106_v58 = vmul.f32 0.2, %v3850_v54  ;;  %v3851_v57 = vadd.f32 %v5942_v8, %v3716_v50 }
 0x229   : > { %v3717_v52 = vadd.f32 %v6030_v60, %v3332_v48  ;;  %v3333_v38 = vadd.f32 %v3205_v56, %v2948_v44  ;;  %v6037_v4 = vmul.f32 0.5, %v3462_v2  ;;  %v3206_v1 = vmul.f32 1.5, %v3459_v15  ;;  %v3467_v44 = vld [vmem:[#allocation3 + $0x250] sm:$0xff] }
 0x22a   : > { %4489 = vst.msk [vmem:[%s5656_s22 + $0x1a8] sm:$0xff] %vm189_vm0, %v4361_v49  ;;  %v4234_v6 = vsel %vm3978_vm12, %v3850_v54, %v4106_v58  ;;  %vm3979_vm13 = vcmp.ge.f32.partialorder %v3851_v57, 0.0  ;;  %v4107_v61 = vmul.f32 0.2, %v3851_v57  ;;  %v2950_v5 = vadd.f32 %v5967_v22, %v3203_v36  ;;  %v3466_v36 = vld [vmem:[#allocation3 + $0x248] sm:$0xff] }
 0x22b   : > { %v4362_v11 = vmul.f32 1.4142135, %v4234_v6  ;;  %v3852_v9 = vadd.f32 %v5942_v8, %v3717_v52  ;;  %v3718_v7 = vadd.f32 %v6037_v4, %v3333_v38  ;;  %v3334_v12 = vadd.f32 %v3206_v1, %v2949_v55 }
 0x22c   : > { %v4235_v14 = vsel %vm3979_vm13, %v3851_v57, %v4107_v61  ;;  %v6044_v23 = vmul.f32 0.5, %v3463_v0  ;;  %v3207_v19 = vmul.f32 1.5, %v3460_v35  ;;  %v2951_v18 = vadd.f32 %v5974_v37, %v3204_v24 }
 0x22d   : > { %4490 = vst.msk [vmem:[%s5656_s22 + $0x1b0] sm:$0xff] %vm189_vm0, %v4362_v11  ;;  %v4363_v3 = vmul.f32 1.4142135, %v4235_v14  ;;  %vm3980_vm14 = vcmp.ge.f32.partialorder %v3852_v9, 0.0  ;;  %v4108_v63 = vmul.f32 0.2, %v3852_v9  ;;  %v3853_v22 = vadd.f32 %v5942_v8, %v3718_v7 }
 0x22e   : > { %v3719_v10 = vadd.f32 %v6044_v23, %v3334_v12  ;;  %v3335_v15 = vadd.f32 %v3207_v19, %v2950_v5  ;;  %v6051_v28 = vmul.f32 0.5, %v3464_v59  ;;  %v3208_v29 = vmul.f32 1.5, %v3461_v21  ;;  %v3469_v5 = vld [vmem:[#allocation3 + $0x260] sm:$0xff] }
 0x22f   : > { %4491 = vst.msk [vmem:[%s5656_s22 + $0x1b8] sm:$0xff] %vm189_vm0, %v4363_v3  ;;  %v4236_v30 = vsel %vm3980_vm14, %v3852_v9, %v4108_v63  ;;  %vm3981_vm15 = vcmp.ge.f32.partialorder %v3853_v22, 0.0  ;;  %v4109_v37 = vmul.f32 0.2, %v3853_v22  ;;  %v2952_v25 = vadd.f32 %v5981_v41, %v3205_v56  ;;  %v3468_v56 = vld [vmem:[#allocation3 + $0x258] sm:$0xff] }
 0x230   : > { %v4364_v32 = vmul.f32 1.4142135, %v4236_v30  ;;  %v3854_v34 = vadd.f32 %v5942_v8, %v3719_v10  ;;  %v3720_v35 = vadd.f32 %v6051_v28, %v3335_v15  ;;  %v3336_v33 = vadd.f32 %v3208_v29, %v2951_v18 }
 0x231   : > { %v4237_v13 = vsel %vm3981_vm15, %v3853_v22, %v4109_v37  ;;  %v6058_v26 = vmul.f32 0.5, %v3465_v16  ;;  %v3209_v39 = vmul.f32 1.5, %v3462_v2  ;;  %v2953_v42 = vadd.f32 %v5988_v51, %v3206_v1 }
 0x232   : > { %4492 = vst.msk [vmem:[%s5656_s22 + $0x1c0] sm:$0xff] %vm189_vm0, %v4364_v32  ;;  %v4365_v31 = vmul.f32 1.4142135, %v4237_v13  ;;  %vm3982_vm1 = vcmp.ge.f32.partialorder %v3854_v34, 0.0  ;;  %v4110_v17 = vmul.f32 0.2, %v3854_v34  ;;  %v3855_v41 = vadd.f32 %v5942_v8, %v3720_v35 }
 0x233   : > { %v3721_v24 = vadd.f32 %v6058_v26, %v3336_v33  ;;  %v3337_v21 = vadd.f32 %v3209_v39, %v2952_v25  ;;  %v6065_v46 = vmul.f32 0.5, %v3466_v36  ;;  %v3210_v45 = vmul.f32 1.5, %v3463_v0  ;;  %v3471_v25 = vld [vmem:[#allocation3 + $0x270] sm:$0xff] }
 0x234   : > { %4493 = vst.msk [vmem:[%s5656_s22 + $0x1c8] sm:$0xff] %vm189_vm0, %v4365_v31  ;;  %v4238_v47 = vsel %vm3982_vm1, %v3854_v34, %v4110_v17  ;;  %vm3983_vm2 = vcmp.ge.f32.partialorder %v3855_v41, 0.0  ;;  %v4111_v51 = vmul.f32 0.2, %v3855_v41  ;;  %v2954_v54 = vadd.f32 %v5995_v62, %v3207_v19  ;;  %v3470_v19 = vld [vmem:[#allocation3 + $0x268] sm:$0xff] }
 0x235   : > { %v4366_v50 = vmul.f32 1.4142135, %v4238_v47  ;;  %v3856_v48 = vadd.f32 %v5942_v8, %v3721_v24  ;;  %v3722_v2 = vadd.f32 %v6065_v46, %v3337_v21  ;;  %v3338_v53 = vadd.f32 %v3210_v45, %v2953_v42 }
 0x236   : > { %v4239_v55 = vsel %vm3983_vm2, %v3855_v41, %v4111_v51  ;;  %v6072_v49 = vmul.f32 0.5, %v3467_v44  ;;  %v3211_v58 = vmul.f32 1.5, %v3464_v59  ;;  %v2955_v57 = vadd.f32 %v6002_v20, %v3208_v29 }
 0x237   : > { %4494 = vst.msk [vmem:[%s5656_s22 + $0x1d0] sm:$0xff] %vm189_vm0, %v4366_v50  ;;  %v4367_v52 = vmul.f32 1.4142135, %v4239_v55  ;;  %vm3984_vm3 = vcmp.ge.f32.partialorder %v3856_v48, 0.0  ;;  %v4112_v38 = vmul.f32 0.2, %v3856_v48  ;;  %v3857_v62 = vadd.f32 %v5942_v8, %v3722_v2 }
 0x238   : > { %v3723_v1 = vadd.f32 %v6072_v49, %v3338_v53  ;;  %v3339_v0 = vadd.f32 %v3211_v58, %v2954_v54  ;;  %v6079_v6 = vmul.f32 0.5, %v3468_v56  ;;  %v3212_v61 = vmul.f32 1.5, %v3465_v16  ;;  %v3473_v54 = vld [vmem:[#allocation3 + $0x280] sm:$0xff] }
 0x239   : > { %4495 = vst.msk [vmem:[%s5656_s22 + $0x1d8] sm:$0xff] %vm189_vm0, %v4367_v52  ;;  %v4240_v11 = vsel %vm3984_vm3, %v3856_v48, %v4112_v38  ;;  %vm3985_vm4 = vcmp.ge.f32.partialorder %v3857_v62, 0.0  ;;  %v4113_v20 = vmul.f32 0.2, %v3857_v62  ;;  %v2956_v9 = vadd.f32 %v6009_v27, %v3209_v39  ;;  %v3472_v39 = vld [vmem:[#allocation3 + $0x278] sm:$0xff] }
 0x23a   : > { %v4368_v7 = vmul.f32 1.4142135, %v4240_v11  ;;  %v3858_v12 = vadd.f32 %v5942_v8, %v3723_v1  ;;  %v3724_v59 = vadd.f32 %v6079_v6, %v3339_v0  ;;  %v3340_v14 = vadd.f32 %v3212_v61, %v2955_v57 }
 0x23b   : > { %v4241_v18 = vsel %vm3985_vm4, %v3857_v62, %v4113_v20  ;;  %v6086_v3 = vmul.f32 0.5, %v3469_v5  ;;  %v3213_v63 = vmul.f32 1.5, %v3466_v36  ;;  %v2957_v22 = vadd.f32 %v6016_v40, %v3210_v45 }
 0x23c   : > { %4496 = vst.msk [vmem:[%s5656_s22 + $0x1e0] sm:$0xff] %vm189_vm0, %v4368_v7  ;;  %v4369_v10 = vmul.f32 1.4142135, %v4241_v18  ;;  %vm3986_vm5 = vcmp.ge.f32.partialorder %v3858_v12, 0.0  ;;  %v4114_v15 = vmul.f32 0.2, %v3858_v12  ;;  %v3859_v27 = vadd.f32 %v5942_v8, %v3724_v59 }
 0x23d   : > { %v3725_v29 = vadd.f32 %v6086_v3, %v3340_v14  ;;  %v3341_v16 = vadd.f32 %v3213_v63, %v2956_v9  ;;  %v6093_v30 = vmul.f32 0.5, %v3470_v19  ;;  %v3214_v37 = vmul.f32 1.5, %v3467_v44  ;;  %v3475_v9 = vld [vmem:[#allocation3 + $0x290] sm:$0xff] }
 0x23e   : > { %4497 = vst.msk [vmem:[%s5656_s22 + $0x1e8] sm:$0xff] %vm189_vm0, %v4369_v10  ;;  %v4242_v32 = vsel %vm3986_vm5, %v3858_v12, %v4114_v15  ;;  %vm3987_vm6 = vcmp.ge.f32.partialorder %v3859_v27, 0.0  ;;  %v4115_v40 = vmul.f32 0.2, %v3859_v27  ;;  %v2958_v34 = vadd.f32 %v6023_v43, %v3211_v58  ;;  %v3474_v58 = vld [vmem:[#allocation3 + $0x288] sm:$0xff] }
 0x23f   : > { %v4370_v35 = vmul.f32 1.4142135, %v4242_v32  ;;  %v3860_v33 = vadd.f32 %v5942_v8, %v3725_v29  ;;  %v3726_v36 = vadd.f32 %v6093_v30, %v3341_v16  ;;  %v3342_v13 = vadd.f32 %v3214_v37, %v2957_v22 }
 0x240   : > { %v4243_v42 = vsel %vm3987_vm6, %v3859_v27, %v4115_v40  ;;  %v6100_v31 = vmul.f32 0.5, %v3471_v25  ;;  %v3215_v17 = vmul.f32 1.5, %v3468_v56  ;;  %v2959_v41 = vadd.f32 %v6030_v60, %v3212_v61 }
 0x241   : > { %4498 = vst.msk [vmem:[%s5656_s22 + $0x1f0] sm:$0xff] %vm189_vm0, %v4370_v35  ;;  %v4371_v24 = vmul.f32 1.4142135, %v4243_v42  ;;  %vm3988_vm7 = vcmp.ge.f32.partialorder %v3860_v33, 0.0  ;;  %v4116_v21 = vmul.f32 0.2, %v3860_v33  ;;  %v3861_v43 = vadd.f32 %v5942_v8, %v3726_v36 }
 0x242   : > { %v3727_v45 = vadd.f32 %v6100_v31, %v3342_v13  ;;  %v3343_v44 = vadd.f32 %v3215_v17, %v2958_v34  ;;  %v6107_v47 = vmul.f32 0.5, %v3472_v39  ;;  %v3216_v51 = vmul.f32 1.5, %v3469_v5  ;;  %v3477_v34 = vld [vmem:[#allocation3 + $0x2a0] sm:$0xff] }
 0x243   : > { %4499 = vst.msk [vmem:[%s5656_s22 + $0x1f8] sm:$0xff] %vm189_vm0, %v4371_v24  ;;  %v4244_v50 = vsel %vm3988_vm7, %v3860_v33, %v4116_v21  ;;  %vm3989_vm8 = vcmp.ge.f32.partialorder %v3861_v43, 0.0  ;;  %v4117_v60 = vmul.f32 0.2, %v3861_v43  ;;  %v2960_v48 = vadd.f32 %v6037_v4, %v3213_v63  ;;  %v3476_v63 = vld [vmem:[#allocation3 + $0x298] sm:$0xff] }
 0x244   : > { %v4372_v2 = vmul.f32 1.4142135, %v4244_v50  ;;  %v3862_v53 = vadd.f32 %v5942_v8, %v3727_v45  ;;  %v3728_v56 = vadd.f32 %v6107_v47, %v3343_v44  ;;  %v3344_v55 = vadd.f32 %v3216_v51, %v2959_v41 }
 0x245   : > { %v4245_v57 = vsel %vm3989_vm8, %v3861_v43, %v4117_v60  ;;  %v6114_v52 = vmul.f32 0.5, %v3473_v54  ;;  %v3217_v38 = vmul.f32 1.5, %v3470_v19  ;;  %v2961_v62 = vadd.f32 %v6044_v23, %v3214_v37 }
 0x246   : > { %4500 = vst.msk [vmem:[%s5656_s22 + $0x200] sm:$0xff] %vm189_vm0, %v4372_v2  ;;  %v4373_v1 = vmul.f32 1.4142135, %v4245_v57  ;;  %vm3990_vm9 = vcmp.ge.f32.partialorder %v3862_v53, 0.0  ;;  %v4118_v0 = vmul.f32 0.2, %v3862_v53  ;;  %v3863_v4 = vadd.f32 %v5942_v8, %v3728_v56 }
 0x247   : > { %v3729_v61 = vadd.f32 %v6114_v52, %v3344_v55  ;;  %v3345_v5 = vadd.f32 %v3217_v38, %v2960_v48  ;;  %v6121_v11 = vmul.f32 0.5, %v3474_v58  ;;  %v3218_v20 = vmul.f32 1.5, %v3471_v25  ;;  %v3479_v48 = vld [vmem:[#allocation3 + $0x2b0] sm:$0xff] }
 0x248   : > { %4501 = vst.msk [vmem:[%s5656_s22 + $0x208] sm:$0xff] %vm189_vm0, %v4373_v1  ;;  %v4246_v7 = vsel %vm3990_vm9, %v3862_v53, %v4118_v0  ;;  %vm3991_vm10 = vcmp.ge.f32.partialorder %v3863_v4, 0.0  ;;  %v4119_v23 = vmul.f32 0.2, %v3863_v4  ;;  %v2962_v12 = vadd.f32 %v6051_v28, %v3215_v17  ;;  %v3478_v17 = vld [vmem:[#allocation3 + $0x2a8] sm:$0xff] }
 0x249   : > { %v4374_v59 = vmul.f32 1.4142135, %v4246_v7  ;;  %v3864_v14 = vadd.f32 %v5942_v8, %v3729_v61  ;;  %v3730_v19 = vadd.f32 %v6121_v11, %v3345_v5  ;;  %v3346_v18 = vadd.f32 %v3218_v20, %v2961_v62 }
 0x24a   : > { %v4247_v22 = vsel %vm3991_vm10, %v3863_v4, %v4119_v23  ;;  %v6128_v10 = vmul.f32 0.5, %v3475_v9  ;;  %v3219_v15 = vmul.f32 1.5, %v3472_v39  ;;  %v2963_v27 = vadd.f32 %v6058_v26, %v3216_v51 }
 0x24b   : > { %4502 = vst.msk [vmem:[%s5656_s22 + $0x210] sm:$0xff] %vm189_vm0, %v4374_v59  ;;  %v4375_v29 = vmul.f32 1.4142135, %v4247_v22  ;;  %vm3992_vm11 = vcmp.ge.f32.partialorder %v3864_v14, 0.0  ;;  %v4120_v16 = vmul.f32 0.2, %v3864_v14  ;;  %v3865_v28 = vadd.f32 %v5942_v8, %v3730_v19 }
 0x24c   : > { %v3731_v37 = vadd.f32 %v6128_v10, %v3346_v18  ;;  %v3347_v25 = vadd.f32 %v3219_v15, %v2962_v12  ;;  %v6135_v32 = vmul.f32 0.5, %v3476_v63  ;;  %v3220_v40 = vmul.f32 1.5, %v3473_v54  ;;  %v3481_v12 = vld [vmem:[#allocation3 + $0x2c0] sm:$0xff] }
 0x24d   : > { %4503 = vst.msk [vmem:[%s5656_s22 + $0x218] sm:$0xff] %vm189_vm0, %v4375_v29  ;;  %v4248_v35 = vsel %vm3992_vm11, %v3864_v14, %v4120_v16  ;;  %vm3993_vm12 = vcmp.ge.f32.partialorder %v3865_v28, 0.0  ;;  %v4121_v26 = vmul.f32 0.2, %v3865_v28  ;;  %v2964_v33 = vadd.f32 %v6065_v46, %v3217_v38  ;;  %v3480_v38 = vld [vmem:[#allocation3 + $0x2b8] sm:$0xff] }
 0x24e   : > { %v4376_v36 = vmul.f32 1.4142135, %v4248_v35  ;;  %v3866_v13 = vadd.f32 %v5942_v8, %v3731_v37  ;;  %v3732_v39 = vadd.f32 %v6135_v32, %v3347_v25  ;;  %v3348_v42 = vadd.f32 %v3220_v40, %v2963_v27 }
 0x24f   : > { %v4249_v41 = vsel %vm3993_vm12, %v3865_v28, %v4121_v26  ;;  %v6142_v24 = vmul.f32 0.5, %v3477_v34  ;;  %v3221_v21 = vmul.f32 1.5, %v3474_v58  ;;  %v2965_v43 = vadd.f32 %v6072_v49, %v3218_v20 }
 0x250   : > { %4504 = vst.msk [vmem:[%s5656_s22 + $0x220] sm:$0xff] %vm189_vm0, %v4376_v36  ;;  %v4377_v45 = vmul.f32 1.4142135, %v4249_v41  ;;  %vm3994_vm13 = vcmp.ge.f32.partialorder %v3866_v13, 0.0  ;;  %v4122_v44 = vmul.f32 0.2, %v3866_v13  ;;  %v3867_v46 = vadd.f32 %v5942_v8, %v3732_v39 }
 0x251   : > { %v3733_v51 = vadd.f32 %v6142_v24, %v3348_v42  ;;  %v3349_v54 = vadd.f32 %v3221_v21, %v2964_v33  ;;  %v6149_v50 = vmul.f32 0.5, %v3478_v17  ;;  %v3222_v60 = vmul.f32 1.5, %v3475_v9  ;;  %v3483_v33 = vld [vmem:[#allocation3 + $0x2d0] sm:$0xff] }
 0x252   : > { %4505 = vst.msk [vmem:[%s5656_s22 + $0x228] sm:$0xff] %vm189_vm0, %v4377_v45  ;;  %v4250_v2 = vsel %vm3994_vm13, %v3866_v13, %v4122_v44  ;;  %vm3995_vm14 = vcmp.ge.f32.partialorder %v3867_v46, 0.0  ;;  %v4123_v49 = vmul.f32 0.2, %v3867_v46  ;;  %v2966_v53 = vadd.f32 %v6079_v6, %v3219_v15  ;;  %v3482_v15 = vld [vmem:[#allocation3 + $0x2c8] sm:$0xff] }
 0x253   : > { %v4378_v56 = vmul.f32 1.4142135, %v4250_v2  ;;  %v3868_v55 = vadd.f32 %v5942_v8, %v3733_v51  ;;  %v3734_v58 = vadd.f32 %v6149_v50, %v3349_v54  ;;  %v3350_v57 = vadd.f32 %v3222_v60, %v2965_v43 }
 0x254   : > { %v4251_v62 = vsel %vm3995_vm14, %v3867_v46, %v4123_v49  ;;  %v6156_v1 = vmul.f32 0.5, %v3479_v48  ;;  %v3223_v0 = vmul.f32 1.5, %v3476_v63  ;;  %v2967_v4 = vadd.f32 %v6086_v3, %v3220_v40 }
 0x255   : > { %4506 = vst.msk [vmem:[%s5656_s22 + $0x230] sm:$0xff] %vm189_vm0, %v4378_v56  ;;  %v4379_v61 = vmul.f32 1.4142135, %v4251_v62  ;;  %vm3996_vm15 = vcmp.ge.f32.partialorder %v3868_v55, 0.0  ;;  %v4124_v5 = vmul.f32 0.2, %v3868_v55  ;;  %v3869_v6 = vadd.f32 %v5942_v8, %v3734_v58 }
 0x256   : > { %v3735_v20 = vadd.f32 %v6156_v1, %v3350_v57  ;;  %v3351_v9 = vadd.f32 %v3223_v0, %v2966_v53  ;;  %v6163_v7 = vmul.f32 0.5, %v3480_v38  ;;  %v3224_v23 = vmul.f32 1.5, %v3477_v34  ;;  %v3485_v53 = vld [vmem:[#allocation3 + $0x2e0] sm:$0xff] }
 0x257   : > { %4507 = vst.msk [vmem:[%s5656_s22 + $0x238] sm:$0xff] %vm189_vm0, %v4379_v61  ;;  %v4252_v59 = vsel %vm3996_vm15, %v3868_v55, %v4124_v5  ;;  %vm3997_vm1 = vcmp.ge.f32.partialorder %v3869_v6, 0.0  ;;  %v4125_v3 = vmul.f32 0.2, %v3869_v6  ;;  %v2968_v14 = vadd.f32 %v6093_v30, %v3221_v21  ;;  %v3484_v21 = vld [vmem:[#allocation3 + $0x2d8] sm:$0xff] }
 0x258   : > { %v4380_v19 = vmul.f32 1.4142135, %v4252_v59  ;;  %v3870_v18 = vadd.f32 %v5942_v8, %v3735_v20  ;;  %v3736_v63 = vadd.f32 %v6163_v7, %v3351_v9  ;;  %v3352_v22 = vadd.f32 %v3224_v23, %v2967_v4 }
 0x259   : > { %v4253_v27 = vsel %vm3997_vm1, %v3869_v6, %v4125_v3  ;;  %v6170_v29 = vmul.f32 0.5, %v3481_v12  ;;  %v3225_v16 = vmul.f32 1.5, %v3478_v17  ;;  %v2969_v28 = vadd.f32 %v6100_v31, %v3222_v60 }
 0x25a   : > { %4508 = vst.msk [vmem:[%s5656_s22 + $0x240] sm:$0xff] %vm189_vm0, %v4380_v19  ;;  %v4381_v37 = vmul.f32 1.4142135, %v4253_v27  ;;  %vm3998_vm2 = vcmp.ge.f32.partialorder %v3870_v18, 0.0  ;;  %v4126_v25 = vmul.f32 0.2, %v3870_v18  ;;  %v3871_v30 = vadd.f32 %v5942_v8, %v3736_v63 }
 0x25b   : > { %v3737_v40 = vadd.f32 %v6170_v29, %v3352_v22  ;;  %v3353_v34 = vadd.f32 %v3225_v16, %v2968_v14  ;;  %v6177_v35 = vmul.f32 0.5, %v3482_v15  ;;  %v3226_v26 = vmul.f32 1.5, %v3479_v48  ;;  %v3487_v14 = vld [vmem:[#allocation3 + $0x2f0] sm:$0xff] }
 0x25c   : > { %4509 = vst.msk [vmem:[%s5656_s22 + $0x248] sm:$0xff] %vm189_vm0, %v4381_v37  ;;  %v4254_v36 = vsel %vm3998_vm2, %v3870_v18, %v4126_v25  ;;  %vm3999_vm3 = vcmp.ge.f32.partialorder %v3871_v30, 0.0  ;;  %v4127_v31 = vmul.f32 0.2, %v3871_v30  ;;  %v2970_v13 = vadd.f32 %v6107_v47, %v3223_v0  ;;  %v3486_v0 = vld [vmem:[#allocation3 + $0x2e8] sm:$0xff] }
 0x25d   : > { %v4382_v39 = vmul.f32 1.4142135, %v4254_v36  ;;  %v3872_v42 = vadd.f32 %v5942_v8, %v3737_v40  ;;  %v3738_v17 = vadd.f32 %v6177_v35, %v3353_v34  ;;  %v3354_v41 = vadd.f32 %v3226_v26, %v2969_v28 }
 0x25e   : > { %v4255_v43 = vsel %vm3999_vm3, %v3871_v30, %v4127_v31  ;;  %v6184_v45 = vmul.f32 0.5, %v3483_v33  ;;  %v3227_v44 = vmul.f32 1.5, %v3480_v38  ;;  %v2971_v46 = vadd.f32 %v6114_v52, %v3224_v23 }
 0x25f   : > { %4510 = vst.msk [vmem:[%s5656_s22 + $0x250] sm:$0xff] %vm189_vm0, %v4382_v39  ;;  %v4383_v51 = vmul.f32 1.4142135, %v4255_v43  ;;  %vm4000_vm4 = vcmp.ge.f32.partialorder %v3872_v42, 0.0  ;;  %v4128_v54 = vmul.f32 0.2, %v3872_v42  ;;  %v3873_v47 = vadd.f32 %v5942_v8, %v3738_v17 }
 0x260   : > { %v3739_v60 = vadd.f32 %v6184_v45, %v3354_v41  ;;  %v3355_v48 = vadd.f32 %v3227_v44, %v2970_v13  ;;  %v6191_v2 = vmul.f32 0.5, %v3484_v21  ;;  %v3228_v49 = vmul.f32 1.5, %v3481_v12  ;;  %v3489_v13 = vld [vmem:[#allocation3 + $0x300] sm:$0xff] }
 0x261   : > { %4511 = vst.msk [vmem:[%s5656_s22 + $0x258] sm:$0xff] %vm189_vm0, %v4383_v51  ;;  %v4256_v56 = vsel %vm4000_vm4, %v3872_v42, %v4128_v54  ;;  %vm4001_vm5 = vcmp.ge.f32.partialorder %v3873_v47, 0.0  ;;  %v4129_v52 = vmul.f32 0.2, %v3873_v47  ;;  %v2972_v55 = vadd.f32 %v6121_v11, %v3225_v16  ;;  %v3488_v16 = vld [vmem:[#allocation3 + $0x2f8] sm:$0xff] }
 0x262   : > { %v4384_v58 = vmul.f32 1.4142135, %v4256_v56  ;;  %v3874_v57 = vadd.f32 %v5942_v8, %v3739_v60  ;;  %v3740_v38 = vadd.f32 %v6191_v2, %v3355_v48  ;;  %v3356_v62 = vadd.f32 %v3228_v49, %v2971_v46 }
 0x263   : > { %v4257_v4 = vsel %vm4001_vm5, %v3873_v47, %v4129_v52  ;;  %v6198_v61 = vmul.f32 0.5, %v3485_v53  ;;  %v3229_v5 = vmul.f32 1.5, %v3482_v15  ;;  %v2973_v6 = vadd.f32 %v6128_v10, %v3226_v26 }
 0x264   : > { %4512 = vst.msk [vmem:[%s5656_s22 + $0x260] sm:$0xff] %vm189_vm0, %v4384_v58  ;;  %v4385_v20 = vmul.f32 1.4142135, %v4257_v4  ;;  %vm4002_vm6 = vcmp.ge.f32.partialorder %v3874_v57, 0.0  ;;  %v4130_v9 = vmul.f32 0.2, %v3874_v57  ;;  %v3875_v11 = vadd.f32 %v5942_v8, %v3740_v38 }
 0x265   : > { %v3741_v23 = vadd.f32 %v6198_v61, %v3356_v62  ;;  %v3357_v12 = vadd.f32 %v3229_v5, %v2972_v55  ;;  %v6205_v59 = vmul.f32 0.5, %v3486_v0  ;;  %v3230_v3 = vmul.f32 1.5, %v3483_v33  ;;  %v3491_v55 = vld [vmem:[#allocation3 + $0x310] sm:$0xff] }
 0x266   : > { %4513 = vst.msk [vmem:[%s5656_s22 + $0x268] sm:$0xff] %vm189_vm0, %v4385_v20  ;;  %v4258_v19 = vsel %vm4002_vm6, %v3874_v57, %v4130_v9  ;;  %vm4003_vm7 = vcmp.ge.f32.partialorder %v3875_v11, 0.0  ;;  %v4131_v10 = vmul.f32 0.2, %v3875_v11  ;;  %v2974_v18 = vadd.f32 %v6135_v32, %v3227_v44  ;;  %v3490_v44 = vld [vmem:[#allocation3 + $0x308] sm:$0xff] }
 0x267   : > { %v4386_v63 = vmul.f32 1.4142135, %v4258_v19  ;;  %v3876_v22 = vadd.f32 %v5942_v8, %v3741_v23  ;;  %v3742_v15 = vadd.f32 %v6205_v59, %v3357_v12  ;;  %v3358_v27 = vadd.f32 %v3230_v3, %v2973_v6 }
 0x268   : > { %v4259_v28 = vsel %vm4003_vm7, %v3875_v11, %v4131_v10  ;;  %v6212_v37 = vmul.f32 0.5, %v3487_v14  ;;  %v3231_v25 = vmul.f32 1.5, %v3484_v21  ;;  %v2975_v30 = vadd.f32 %v6142_v24, %v3228_v49 }
 0x269   : > { %4514 = vst.msk [vmem:[%s5656_s22 + $0x270] sm:$0xff] %vm189_vm0, %v4386_v63  ;;  %v4387_v40 = vmul.f32 1.4142135, %v4259_v28  ;;  %vm4004_vm8 = vcmp.ge.f32.partialorder %v3876_v22, 0.0  ;;  %v4132_v34 = vmul.f32 0.2, %v3876_v22  ;;  %v3877_v32 = vadd.f32 %v5942_v8, %v3742_v15 }
 0x26a   : > { %v3743_v26 = vadd.f32 %v6212_v37, %v3358_v27  ;;  %v3359_v33 = vadd.f32 %v3231_v25, %v2974_v18  ;;  %v6219_v36 = vmul.f32 0.5, %v3488_v16  ;;  %v3232_v31 = vmul.f32 1.5, %v3485_v53 }
 0x26b   : > { %4515 = vst.msk [vmem:[%s5656_s22 + $0x278] sm:$0xff] %vm189_vm0, %v4387_v40  ;;  %v4260_v39 = vsel %vm4004_vm8, %v3876_v22, %v4132_v34  ;;  %vm4005_vm9 = vcmp.ge.f32.partialorder %v3877_v32, 0.0  ;;  %v4133_v24 = vmul.f32 0.2, %v3877_v32  ;;  %v2976_v42 = vadd.f32 %v6149_v50, %v3229_v5  ;;  %v3492_v5 = vld [vmem:[#allocation3 + $0x318] sm:$0xff] }
 0x26c   : > { %v4388_v17 = vmul.f32 1.4142135, %v4260_v39  ;;  %v3878_v41 = vadd.f32 %v5942_v8, %v3743_v26  ;;  %v3744_v21 = vadd.f32 %v6219_v36, %v3359_v33  ;;  %v3360_v43 = vadd.f32 %v3232_v31, %v2975_v30 }
 0x26d   : > { %v4261_v46 = vsel %vm4005_vm9, %v3877_v32, %v4133_v24  ;;  %v6226_v51 = vmul.f32 0.5, %v3489_v13  ;;  %v3233_v54 = vmul.f32 1.5, %v3486_v0  ;;  %v2977_v47 = vadd.f32 %v6156_v1, %v3230_v3 }
 0x26e   : > { %4516 = vst.msk [vmem:[%s5656_s22 + $0x280] sm:$0xff] %vm189_vm0, %v4388_v17  ;;  %v4389_v60 = vmul.f32 1.4142135, %v4261_v46  ;;  %vm4006_vm10 = vcmp.ge.f32.partialorder %v3878_v41, 0.0  ;;  %v4134_v48 = vmul.f32 0.2, %v3878_v41  ;;  %v3879_v50 = vadd.f32 %v5942_v8, %v3744_v21 }
 0x26f   : > { %v3745_v49 = vadd.f32 %v6226_v51, %v3360_v43  ;;  %v3361_v53 = vadd.f32 %v3233_v54, %v2976_v42  ;;  %v6233_v56 = vmul.f32 0.5, %v3490_v44  ;;  %v3234_v52 = vmul.f32 1.5, %v3487_v14  ;;  %v3495_v42 = vld [vmem:[#allocation3 + $0x330] sm:$0xff] }
 0x270   : > { %4517 = vst.msk [vmem:[%s5656_s22 + $0x288] sm:$0xff] %vm189_vm0, %v4389_v60  ;;  %v4262_v58 = vsel %vm4006_vm10, %v3878_v41, %v4134_v48  ;;  %vm4007_vm11 = vcmp.ge.f32.partialorder %v3879_v50, 0.0  ;;  %v4135_v1 = vmul.f32 0.2, %v3879_v50  ;;  %v2978_v57 = vadd.f32 %v6163_v7, %v3231_v25  ;;  %v3494_v25 = vld [vmem:[#allocation3 + $0x328] sm:$0xff] }
 0x271   : > { %v4390_v38 = vmul.f32 1.4142135, %v4262_v58  ;;  %v3880_v62 = vadd.f32 %v5942_v8, %v3745_v49  ;;  %v3746_v0 = vadd.f32 %v6233_v56, %v3361_v53  ;;  %v3362_v4 = vadd.f32 %v3234_v52, %v2977_v47  ;;  %v6248_v8 = vld [vmem:[%s6520_s1] ss:$0 sm:$0xff] }
 0x272   : > { %v4263_v6 = vsel %vm4007_vm11, %v3879_v50, %v4135_v1  ;;  %v6240_v20 = vmul.f32 0.5, %v3491_v55  ;;  %v3235_v9 = vmul.f32 1.5, %v3488_v16  ;;  %v2979_v11 = vadd.f32 %v6170_v29, %v3232_v31  ;;  %v3493_v29 = vld [vmem:[#allocation3 + $0x320] sm:$0xff] }
 0x273   : > { %4518 = vst.msk [vmem:[%s5656_s22 + $0x290] sm:$0xff] %vm189_vm0, %v4390_v38  ;;  %v4391_v23 = vmul.f32 1.4142135, %v4263_v6  ;;  %vm4008_vm12 = vcmp.ge.f32.partialorder %v3880_v62, 0.0  ;;  %v4136_v12 = vmul.f32 0.2, %v3880_v62  ;;  %v3881_v7 = vadd.f32 %v6248_v8, %v3746_v0 }
 0x274   : > { %v3747_v3 = vadd.f32 %v6240_v20, %v3362_v4  ;;  %v3363_v14 = vadd.f32 %v3235_v9, %v2978_v57  ;;  %v6252_v19 = vmul.f32 0.5, %v3492_v5  ;;  %v3236_v10 = vmul.f32 1.5, %v3489_v13  ;;  %v3497_v57 = vld [vmem:[#allocation3 + $0x340] sm:$0xff] }
 0x275   : > { %4519 = vst.msk [vmem:[%s5656_s22 + $0x298] sm:$0xff] %vm189_vm0, %v4391_v23  ;;  %v4264_v18 = vsel %vm4008_vm12, %v3880_v62, %v4136_v12  ;;  %vm4009_vm13 = vcmp.ge.f32.partialorder %v3881_v7, 0.0  ;;  %v4137_v63 = vmul.f32 0.2, %v3881_v7  ;;  %v2980_v22 = vadd.f32 %v6177_v35, %v3233_v54  ;;  %v3496_v54 = vld [vmem:[#allocation3 + $0x338] sm:$0xff] }
 0x276   : > { %v4392_v15 = vmul.f32 1.4142135, %v4264_v18  ;;  %v3882_v27 = vadd.f32 %v6248_v8, %v3747_v3  ;;  %v3748_v16 = vadd.f32 %v6252_v19, %v3363_v14  ;;  %v3364_v28 = vadd.f32 %v3236_v10, %v2979_v11 }
 0x277   : > { %v4265_v30 = vsel %vm4009_vm13, %v3881_v7, %v4137_v63  ;;  %v6259_v40 = vmul.f32 0.5, %v3493_v29  ;;  %v3237_v34 = vmul.f32 1.5, %v3490_v44  ;;  %v2981_v32 = vadd.f32 %v6184_v45, %v3234_v52 }
 0x278   : > { %4520 = vst.msk [vmem:[%s5656_s22 + $0x2a0] sm:$0xff] %vm189_vm0, %v4392_v15  ;;  %v4393_v26 = vmul.f32 1.4142135, %v4265_v30  ;;  %vm4010_vm14 = vcmp.ge.f32.partialorder %v3882_v27, 0.0  ;;  %v4138_v33 = vmul.f32 0.2, %v3882_v27  ;;  %v3883_v35 = vadd.f32 %v6248_v8, %v3748_v16 }
 0x279   : > { %v3749_v31 = vadd.f32 %v6259_v40, %v3364_v28  ;;  %v3365_v13 = vadd.f32 %v3237_v34, %v2980_v22  ;;  %v6266_v39 = vmul.f32 0.5, %v3494_v25  ;;  %v3238_v24 = vmul.f32 1.5, %v3491_v55  ;;  %v3499_v22 = vld [vmem:[#allocation3 + $0x350] sm:$0xff] }
 0x27a   : > { %4521 = vst.msk [vmem:[%s5656_s22 + $0x2a8] sm:$0xff] %vm189_vm0, %v4393_v26  ;;  %v4266_v17 = vsel %vm4010_vm14, %v3882_v27, %v4138_v33  ;;  %vm4011_vm15 = vcmp.ge.f32.partialorder %v3883_v35, 0.0  ;;  %v4139_v45 = vmul.f32 0.2, %v3883_v35  ;;  %v2982_v41 = vadd.f32 %v6191_v2, %v3235_v9  ;;  %v3498_v9 = vld [vmem:[#allocation3 + $0x348] sm:$0xff] }
 0x27b   : > { %v4394_v21 = vmul.f32 1.4142135, %v4266_v17  ;;  %v3884_v43 = vadd.f32 %v6248_v8, %v3749_v31  ;;  %v3750_v44 = vadd.f32 %v6266_v39, %v3365_v13  ;;  %v3366_v46 = vadd.f32 %v3238_v24, %v2981_v32 }
 0x27c   : > { %v4267_v47 = vsel %vm4011_vm15, %v3883_v35, %v4139_v45  ;;  %v6273_v60 = vmul.f32 0.5, %v3495_v42  ;;  %v3239_v48 = vmul.f32 1.5, %v3492_v5  ;;  %v2983_v50 = vadd.f32 %v6198_v61, %v3236_v10 }
 0x27d   : > { %4522 = vst.msk [vmem:[%s5656_s22 + $0x2b0] sm:$0xff] %vm189_vm0, %v4394_v21  ;;  %v4395_v49 = vmul.f32 1.4142135, %v4267_v47  ;;  %vm4012_vm1 = vcmp.ge.f32.partialorder %v3884_v43, 0.0  ;;  %v4140_v53 = vmul.f32 0.2, %v3884_v43  ;;  %v3885_v2 = vadd.f32 %v6248_v8, %v3750_v44 }
 0x27e   : > { %v3751_v52 = vadd.f32 %v6273_v60, %v3366_v46  ;;  %v3367_v55 = vadd.f32 %v3239_v48, %v2982_v41  ;;  %v6280_v58 = vmul.f32 0.5, %v3496_v54  ;;  %v3240_v1 = vmul.f32 1.5, %v3493_v29  ;;  %v3501_v41 = vld [vmem:[#allocation3 + $0x360] sm:$0xff] }
 0x27f   : > { %4523 = vst.msk [vmem:[%s5656_s22 + $0x2b8] sm:$0xff] %vm189_vm0, %v4395_v49  ;;  %v4268_v38 = vsel %vm4012_vm1, %v3884_v43, %v4140_v53  ;;  %vm4013_vm2 = vcmp.ge.f32.partialorder %v3885_v2, 0.0  ;;  %v4141_v61 = vmul.f32 0.2, %v3885_v2  ;;  %v2984_v62 = vadd.f32 %v6205_v59, %v3237_v34  ;;  %v3500_v34 = vld [vmem:[#allocation3 + $0x358] sm:$0xff] }
 0x280   : > { %v4396_v0 = vmul.f32 1.4142135, %v4268_v38  ;;  %v3886_v4 = vadd.f32 %v6248_v8, %v3751_v52  ;;  %v3752_v5 = vadd.f32 %v6280_v58, %v3367_v55  ;;  %v3368_v6 = vadd.f32 %v3240_v1, %v2983_v50 }
 0x281   : > { %v4269_v11 = vsel %vm4013_vm2, %v3885_v2, %v4141_v61  ;;  %v6287_v23 = vmul.f32 0.5, %v3497_v57  ;;  %v3241_v12 = vmul.f32 1.5, %v3494_v25  ;;  %v2985_v7 = vadd.f32 %v6212_v37, %v3238_v24 }
 0x282   : > { %4524 = vst.msk [vmem:[%s5656_s22 + $0x2c0] sm:$0xff] %vm189_vm0, %v4396_v0  ;;  %v4397_v3 = vmul.f32 1.4142135, %v4269_v11  ;;  %vm4014_vm3 = vcmp.ge.f32.partialorder %v3886_v4, 0.0  ;;  %v4142_v14 = vmul.f32 0.2, %v3886_v4  ;;  %v3887_v59 = vadd.f32 %v6248_v8, %v3752_v5 }
 0x283   : > { %v3753_v10 = vadd.f32 %v6287_v23, %v3368_v6  ;;  %v3369_v29 = vadd.f32 %v3241_v12, %v2984_v62  ;;  %v6294_v18 = vmul.f32 0.5, %v3498_v9  ;;  %v3242_v63 = vmul.f32 1.5, %v3495_v42  ;;  %v3503_v62 = vld [vmem:[#allocation3 + $0x370] sm:$0xff] }
 0x284   : > { %4525 = vst.msk [vmem:[%s5656_s22 + $0x2c8] sm:$0xff] %vm189_vm0, %v4397_v3  ;;  %v4270_v15 = vsel %vm4014_vm3, %v3886_v4, %v4142_v14  ;;  %vm4015_vm4 = vcmp.ge.f32.partialorder %v3887_v59, 0.0  ;;  %v4143_v37 = vmul.f32 0.2, %v3887_v59  ;;  %v2986_v27 = vadd.f32 %v6219_v36, %v3239_v48  ;;  %v3502_v48 = vld [vmem:[#allocation3 + $0x368] sm:$0xff] }
 0x285   : > { %v4398_v16 = vmul.f32 1.4142135, %v4270_v15  ;;  %v3888_v28 = vadd.f32 %v6248_v8, %v3753_v10  ;;  %v3754_v25 = vadd.f32 %v6294_v18, %v3369_v29  ;;  %v3370_v30 = vadd.f32 %v3242_v63, %v2985_v7 }
 0x286   : > { %v4271_v32 = vsel %vm4015_vm4, %v3887_v59, %v4143_v37  ;;  %v6301_v26 = vmul.f32 0.5, %v3499_v22  ;;  %v3243_v33 = vmul.f32 1.5, %v3496_v54  ;;  %v2987_v35 = vadd.f32 %v6226_v51, %v3240_v1 }
 0x287   : > { %4526 = vst.msk [vmem:[%s5656_s22 + $0x2d0] sm:$0xff] %vm189_vm0, %v4398_v16  ;;  %v4399_v31 = vmul.f32 1.4142135, %v4271_v32  ;;  %vm4016_vm5 = vcmp.ge.f32.partialorder %v3888_v28, 0.0  ;;  %v4144_v13 = vmul.f32 0.2, %v3888_v28  ;;  %v3889_v36 = vadd.f32 %v6248_v8, %v3754_v25 }
 0x288   : > { %v3755_v24 = vadd.f32 %v6301_v26, %v3370_v30  ;;  %v3371_v42 = vadd.f32 %v3243_v33, %v2986_v27  ;;  %v6308_v17 = vmul.f32 0.5, %v3500_v34  ;;  %v3244_v45 = vmul.f32 1.5, %v3497_v57  ;;  %v3505_v27 = vld [vmem:[#allocation3 + $0x380] sm:$0xff] }
 0x289   : > { %4527 = vst.msk [vmem:[%s5656_s22 + $0x2d8] sm:$0xff] %vm189_vm0, %v4399_v31  ;;  %v4272_v21 = vsel %vm4016_vm5, %v3888_v28, %v4144_v13  ;;  %vm4017_vm6 = vcmp.ge.f32.partialorder %v3889_v36, 0.0  ;;  %v4145_v51 = vmul.f32 0.2, %v3889_v36  ;;  %v2988_v43 = vadd.f32 %v6233_v56, %v3241_v12  ;;  %v3504_v12 = vld [vmem:[#allocation3 + $0x378] sm:$0xff] }
 0x28a   : > { %v4400_v44 = vmul.f32 1.4142135, %v4272_v21  ;;  %v3890_v46 = vadd.f32 %v6248_v8, %v3755_v24  ;;  %v3756_v54 = vadd.f32 %v6308_v17, %v3371_v42  ;;  %v3372_v47 = vadd.f32 %v3244_v45, %v2987_v35 }
 0x28b   : > { %v4273_v50 = vsel %vm4017_vm6, %v3889_v36, %v4145_v51  ;;  %v6315_v49 = vmul.f32 0.5, %v3501_v41  ;;  %v3245_v53 = vmul.f32 1.5, %v3498_v9  ;;  %v2989_v2 = vadd.f32 %v6240_v20, %v3242_v63 }
 0x28c   : > { %4528 = vst.msk [vmem:[%s5656_s22 + $0x2e0] sm:$0xff] %vm189_vm0, %v4400_v44  ;;  %v4401_v52 = vmul.f32 1.4142135, %v4273_v50  ;;  %vm4018_vm7 = vcmp.ge.f32.partialorder %v3890_v46, 0.0  ;;  %v4146_v55 = vmul.f32 0.2, %v3890_v46  ;;  %v3891_v56 = vadd.f32 %v6248_v8, %v3756_v54 }
 0x28d   : > { %v3757_v1 = vadd.f32 %v6315_v49, %v3372_v47  ;;  %v3373_v57 = vadd.f32 %v3245_v53, %v2988_v43  ;;  %v6322_v38 = vmul.f32 0.5, %v3502_v48  ;;  %v3246_v61 = vmul.f32 1.5, %v3499_v22  ;;  %v3507_v43 = vld [vmem:[#allocation3 + $0x390] sm:$0xff] }
 0x28e   : > { %4529 = vst.msk [vmem:[%s5656_s22 + $0x2e8] sm:$0xff] %vm189_vm0, %v4401_v52  ;;  %v4274_v0 = vsel %vm4018_vm7, %v3890_v46, %v4146_v55  ;;  %vm4019_vm8 = vcmp.ge.f32.partialorder %v3891_v56, 0.0  ;;  %v4147_v20 = vmul.f32 0.2, %v3891_v56  ;;  %v2990_v4 = vadd.f32 %v6252_v19, %v3243_v33  ;;  %v3506_v33 = vld [vmem:[#allocation3 + $0x388] sm:$0xff] }
 0x28f   : > { %v4402_v5 = vmul.f32 1.4142135, %v4274_v0  ;;  %v3892_v6 = vadd.f32 %v6248_v8, %v3757_v1  ;;  %v3758_v9 = vadd.f32 %v6322_v38, %v3373_v57  ;;  %v3374_v11 = vadd.f32 %v3246_v61, %v2989_v2 }
 0x290   : > { %v4275_v7 = vsel %vm4019_vm8, %v3891_v56, %v4147_v20  ;;  %v6329_v3 = vmul.f32 0.5, %v3503_v62  ;;  %v3247_v14 = vmul.f32 1.5, %v3500_v34  ;;  %v2991_v59 = vadd.f32 %v6259_v40, %v3244_v45 }
 0x291   : > { %4530 = vst.msk [vmem:[%s5656_s22 + $0x2f0] sm:$0xff] %vm189_vm0, %v4402_v5  ;;  %v4403_v10 = vmul.f32 1.4142135, %v4275_v7  ;;  %vm4020_vm9 = vcmp.ge.f32.partialorder %v3892_v6, 0.0  ;;  %v4148_v29 = vmul.f32 0.2, %v3892_v6  ;;  %v3893_v19 = vadd.f32 %v6248_v8, %v3758_v9 }
 0x292   : > { %v3759_v63 = vadd.f32 %v6329_v3, %v3374_v11  ;;  %v3375_v22 = vadd.f32 %v3247_v14, %v2990_v4  ;;  %v6336_v15 = vmul.f32 0.5, %v3504_v12  ;;  %v3248_v37 = vmul.f32 1.5, %v3501_v41  ;;  %v3509_v4 = vld [vmem:[#allocation3 + $0x3a0] sm:$0xff] }
 0x293   : > { %4531 = vst.msk [vmem:[%s5656_s22 + $0x2f8] sm:$0xff] %vm189_vm0, %v4403_v10  ;;  %v4276_v16 = vsel %vm4020_vm9, %v3892_v6, %v4148_v29  ;;  %vm4021_vm10 = vcmp.ge.f32.partialorder %v3893_v19, 0.0  ;;  %v4149_v40 = vmul.f32 0.2, %v3893_v19  ;;  %v2992_v28 = vadd.f32 %v6266_v39, %v3245_v53  ;;  %v3508_v53 = vld [vmem:[#allocation3 + $0x398] sm:$0xff] }
 0x294   : > { %v4404_v25 = vmul.f32 1.4142135, %v4276_v16  ;;  %v3894_v30 = vadd.f32 %v6248_v8, %v3759_v63  ;;  %v3760_v34 = vadd.f32 %v6336_v15, %v3375_v22  ;;  %v3376_v32 = vadd.f32 %v3248_v37, %v2991_v59 }
 0x295   : > { %v4277_v35 = vsel %vm4021_vm10, %v3893_v19, %v4149_v40  ;;  %v6343_v31 = vmul.f32 0.5, %v3505_v27  ;;  %v3249_v13 = vmul.f32 1.5, %v3502_v48  ;;  %v2993_v36 = vadd.f32 %v6273_v60, %v3246_v61 }
 0x296   : > { %4532 = vst.msk [vmem:[%s5656_s22 + $0x300] sm:$0xff] %vm189_vm0, %v4404_v25  ;;  %v4405_v24 = vmul.f32 1.4142135, %v4277_v35  ;;  %vm4022_vm11 = vcmp.ge.f32.partialorder %v3894_v30, 0.0  ;;  %v4150_v42 = vmul.f32 0.2, %v3894_v30  ;;  %v3895_v39 = vadd.f32 %v6248_v8, %v3760_v34 }
 0x297   : > { %v3761_v45 = vadd.f32 %v6343_v31, %v3376_v32  ;;  %v3377_v41 = vadd.f32 %v3249_v13, %v2992_v28  ;;  %v6350_v21 = vmul.f32 0.5, %v3506_v33  ;;  %v3250_v51 = vmul.f32 1.5, %v3503_v62  ;;  %v3511_v28 = vld [vmem:[#allocation3 + $0x3b0] sm:$0xff] }
 0x298   : > { %4533 = vst.msk [vmem:[%s5656_s22 + $0x308] sm:$0xff] %vm189_vm0, %v4405_v24  ;;  %v4278_v44 = vsel %vm4022_vm11, %v3894_v30, %v4150_v42  ;;  %vm4023_vm12 = vcmp.ge.f32.partialorder %v3895_v39, 0.0  ;;  %v4151_v60 = vmul.f32 0.2, %v3895_v39  ;;  %v2994_v46 = vadd.f32 %v6280_v58, %v3247_v14  ;;  %v3510_v14 = vld [vmem:[#allocation3 + $0x3a8] sm:$0xff] }
 0x299   : > { %v4406_v54 = vmul.f32 1.4142135, %v4278_v44  ;;  %v3896_v47 = vadd.f32 %v6248_v8, %v3761_v45  ;;  %v3762_v48 = vadd.f32 %v6350_v21, %v3377_v41  ;;  %v3378_v50 = vadd.f32 %v3250_v51, %v2993_v36 }
 0x29a   : > { %v4279_v2 = vsel %vm4023_vm12, %v3895_v39, %v4151_v60  ;;  %v6357_v52 = vmul.f32 0.5, %v3507_v43  ;;  %v3251_v55 = vmul.f32 1.5, %v3504_v12  ;;  %v2995_v56 = vadd.f32 %v6287_v23, %v3248_v37 }
 0x29b   : > { %4534 = vst.msk [vmem:[%s5656_s22 + $0x310] sm:$0xff] %vm189_vm0, %v4406_v54  ;;  %v4407_v1 = vmul.f32 1.4142135, %v4279_v2  ;;  %vm4024_vm13 = vcmp.ge.f32.partialorder %v3896_v47, 0.0  ;;  %v4152_v57 = vmul.f32 0.2, %v3896_v47  ;;  %v3897_v58 = vadd.f32 %v6248_v8, %v3762_v48 }
 0x29c   : > { %v3763_v61 = vadd.f32 %v6357_v52, %v3378_v50  ;;  %v3379_v62 = vadd.f32 %v3251_v55, %v2994_v46  ;;  %v6364_v0 = vmul.f32 0.5, %v3508_v53  ;;  %v3252_v20 = vmul.f32 1.5, %v3505_v27  ;;  %v3513_v46 = vld [vmem:[#allocation3 + $0x3c0] sm:$0xff] }
 0x29d   : > { %4535 = vst.msk [vmem:[%s5656_s22 + $0x318] sm:$0xff] %vm189_vm0, %v4407_v1  ;;  %v4280_v5 = vsel %vm4024_vm13, %v3896_v47, %v4152_v57  ;;  %vm4025_vm14 = vcmp.ge.f32.partialorder %v3897_v58, 0.0  ;;  %v4153_v23 = vmul.f32 0.2, %v3897_v58  ;;  %v2996_v6 = vadd.f32 %v6294_v18, %v3249_v13  ;;  %v3512_v13 = vld [vmem:[#allocation3 + $0x3b8] sm:$0xff] }
 0x29e   : > { %v4408_v9 = vmul.f32 1.4142135, %v4280_v5  ;;  %v3898_v11 = vadd.f32 %v6248_v8, %v3763_v61  ;;  %v3764_v12 = vadd.f32 %v6364_v0, %v3379_v62  ;;  %v3380_v7 = vadd.f32 %v3252_v20, %v2995_v56 }
 0x29f   : > { %v4281_v59 = vsel %vm4025_vm14, %v3897_v58, %v4153_v23  ;;  %v6371_v10 = vmul.f32 0.5, %v3509_v4  ;;  %v3253_v29 = vmul.f32 1.5, %v3506_v33  ;;  %v2997_v19 = vadd.f32 %v6301_v26, %v3250_v51 }
 0x2a0   : > { %4536 = vst.msk [vmem:[%s5656_s22 + $0x320] sm:$0xff] %vm189_vm0, %v4408_v9  ;;  %v4409_v63 = vmul.f32 1.4142135, %v4281_v59  ;;  %vm4026_vm15 = vcmp.ge.f32.partialorder %v3898_v11, 0.0  ;;  %v4154_v22 = vmul.f32 0.2, %v3898_v11  ;;  %v3899_v18 = vadd.f32 %v6248_v8, %v3764_v12 }
 0x2a1   : > { %v3765_v37 = vadd.f32 %v6371_v10, %v3380_v7  ;;  %v3381_v27 = vadd.f32 %v3253_v29, %v2996_v6  ;;  %v6378_v16 = vmul.f32 0.5, %v3510_v14  ;;  %v3254_v40 = vmul.f32 1.5, %v3507_v43  ;;  %v3515_v6 = vld [vmem:[#allocation3 + $0x3d0] sm:$0xff] }
 0x2a2   : > { %4537 = vst.msk [vmem:[%s5656_s22 + $0x328] sm:$0xff] %vm189_vm0, %v4409_v63  ;;  %v4282_v25 = vsel %vm4026_vm15, %v3898_v11, %v4154_v22  ;;  %vm4027_vm1 = vcmp.ge.f32.partialorder %v3899_v18, 0.0  ;;  %v4155_v26 = vmul.f32 0.2, %v3899_v18  ;;  %v2998_v30 = vadd.f32 %v6308_v17, %v3251_v55  ;;  %v3514_v55 = vld [vmem:[#allocation3 + $0x3c8] sm:$0xff] }
 0x2a3   : > { %v4410_v34 = vmul.f32 1.4142135, %v4282_v25  ;;  %v3900_v32 = vadd.f32 %v6248_v8, %v3765_v37  ;;  %v3766_v33 = vadd.f32 %v6378_v16, %v3381_v27  ;;  %v3382_v35 = vadd.f32 %v3254_v40, %v2997_v19 }
 0x2a4   : > { %v4283_v36 = vsel %vm4027_vm1, %v3899_v18, %v4155_v26  ;;  %v6385_v24 = vmul.f32 0.5, %v3511_v28  ;;  %v3255_v42 = vmul.f32 1.5, %v3508_v53  ;;  %v2999_v39 = vadd.f32 %v6315_v49, %v3252_v20 }
 0x2a5   : > { %4538 = vst.msk [vmem:[%s5656_s22 + $0x330] sm:$0xff] %vm189_vm0, %v4410_v34  ;;  %v4411_v45 = vmul.f32 1.4142135, %v4283_v36  ;;  %vm4028_vm2 = vcmp.ge.f32.partialorder %v3900_v32, 0.0  ;;  %v4156_v41 = vmul.f32 0.2, %v3900_v32  ;;  %v3901_v17 = vadd.f32 %v6248_v8, %v3766_v33 }
 0x2a6   : > { %v3767_v51 = vadd.f32 %v6385_v24, %v3382_v35  ;;  %v3383_v43 = vadd.f32 %v3255_v42, %v2998_v30  ;;  %v6392_v44 = vmul.f32 0.5, %v3512_v13  ;;  %v3256_v60 = vmul.f32 1.5, %v3509_v4  ;;  %v3517_v30 = vld [vmem:[#allocation3 + $0x3e0] sm:$0xff] }
 0x2a7   : > { %4539 = vst.msk [vmem:[%s5656_s22 + $0x338] sm:$0xff] %vm189_vm0, %v4411_v45  ;;  %v4284_v54 = vsel %vm4028_vm2, %v3900_v32, %v4156_v41  ;;  %vm4029_vm3 = vcmp.ge.f32.partialorder %v3901_v17, 0.0  ;;  %v4157_v49 = vmul.f32 0.2, %v3901_v17  ;;  %v3000_v47 = vadd.f32 %v6322_v38, %v3253_v29  ;;  %v3516_v29 = vld [vmem:[#allocation3 + $0x3d8] sm:$0xff] }
 0x2a8   : > { %v4412_v48 = vmul.f32 1.4142135, %v4284_v54  ;;  %v3902_v50 = vadd.f32 %v6248_v8, %v3767_v51  ;;  %v3768_v53 = vadd.f32 %v6392_v44, %v3383_v43  ;;  %v3384_v2 = vadd.f32 %v3256_v60, %v2999_v39 }
 0x2a9   : > { %v4285_v56 = vsel %vm4029_vm3, %v3901_v17, %v4157_v49  ;;  %v6399_v1 = vmul.f32 0.5, %v3513_v46  ;;  %v3257_v57 = vmul.f32 1.5, %v3510_v14  ;;  %v3001_v58 = vadd.f32 %v6329_v3, %v3254_v40 }
 0x2aa   : > { %4540 = vst.msk [vmem:[%s5656_s22 + $0x340] sm:$0xff] %vm189_vm0, %v4412_v48  ;;  %v4413_v61 = vmul.f32 1.4142135, %v4285_v56  ;;  %vm4030_vm4 = vcmp.ge.f32.partialorder %v3902_v50, 0.0  ;;  %v4158_v62 = vmul.f32 0.2, %v3902_v50  ;;  %v3903_v38 = vadd.f32 %v6248_v8, %v3768_v53 }
 0x2ab   : > { %v3769_v20 = vadd.f32 %v6399_v1, %v3384_v2  ;;  %v3385_v4 = vadd.f32 %v3257_v57, %v3000_v47  ;;  %v6406_v5 = vmul.f32 0.5, %v3514_v55  ;;  %v3258_v23 = vmul.f32 1.5, %v3511_v28  ;;  %v3519_v47 = vld [vmem:[#allocation3 + $0x3f0] sm:$0xff] }
 0x2ac   : > { %4541 = vst.msk [vmem:[%s5656_s22 + $0x348] sm:$0xff] %vm189_vm0, %v4413_v61  ;;  %v4286_v9 = vsel %vm4030_vm4, %v3902_v50, %v4158_v62  ;;  %vm4031_vm5 = vcmp.ge.f32.partialorder %v3903_v38, 0.0  ;;  %v4159_v3 = vmul.f32 0.2, %v3903_v38  ;;  %v3002_v11 = vadd.f32 %v6336_v15, %v3255_v42  ;;  %v3518_v42 = vld [vmem:[#allocation3 + $0x3e8] sm:$0xff] }
 0x2ad   : > { %v4414_v12 = vmul.f32 1.4142135, %v4286_v9  ;;  %v3904_v7 = vadd.f32 %v6248_v8, %v3769_v20  ;;  %v3770_v14 = vadd.f32 %v6406_v5, %v3385_v4  ;;  %v3386_v59 = vadd.f32 %v3258_v23, %v3001_v58 }
 0x2ae   : > { %v4287_v19 = vsel %vm4031_vm5, %v3903_v38, %v4159_v3  ;;  %v6413_v63 = vmul.f32 0.5, %v3515_v6  ;;  %v3259_v22 = vmul.f32 1.5, %v3512_v13  ;;  %v3003_v18 = vadd.f32 %v6343_v31, %v3256_v60 }
 0x2af   : > { %4542 = vst.msk [vmem:[%s5656_s22 + $0x350] sm:$0xff] %vm189_vm0, %v4414_v12  ;;  %v4415_v37 = vmul.f32 1.4142135, %v4287_v19  ;;  %vm4032_vm6 = vcmp.ge.f32.partialorder %v3904_v7, 0.0  ;;  %v4160_v27 = vmul.f32 0.2, %v3904_v7  ;;  %v3905_v15 = vadd.f32 %v6248_v8, %v3770_v14 }
 0x2b0   : > { %v3771_v40 = vadd.f32 %v6413_v63, %v3386_v59  ;;  %v3387_v28 = vadd.f32 %v3259_v22, %v3002_v11  ;;  %v6420_v25 = vmul.f32 0.5, %v3516_v29  ;;  %v3260_v26 = vmul.f32 1.5, %v3513_v46  ;;  %v3521_v11 = vld [vmem:[#allocation3 + $0x400] sm:$0xff] }
 0x2b1   : > { %4543 = vst.msk [vmem:[%s5656_s22 + $0x358] sm:$0xff] %vm189_vm0, %v4415_v37  ;;  %v4288_v34 = vsel %vm4032_vm6, %v3904_v7, %v4160_v27  ;;  %vm4033_vm7 = vcmp.ge.f32.partialorder %v3905_v15, 0.0  ;;  %v4161_v31 = vmul.f32 0.2, %v3905_v15  ;;  %v3004_v32 = vadd.f32 %v6350_v21, %v3257_v57  ;;  %v3520_v57 = vld [vmem:[#allocation3 + $0x3f8] sm:$0xff] }
 0x2b2   : > { %v4416_v33 = vmul.f32 1.4142135, %v4288_v34  ;;  %v3906_v35 = vadd.f32 %v6248_v8, %v3771_v40  ;;  %v3772_v13 = vadd.f32 %v6420_v25, %v3387_v28  ;;  %v3388_v36 = vadd.f32 %v3260_v26, %v3003_v18 }
 0x2b3   : > { %v4289_v39 = vsel %vm4033_vm7, %v3905_v15, %v4161_v31  ;;  %v6427_v45 = vmul.f32 0.5, %v3517_v30  ;;  %v3261_v41 = vmul.f32 1.5, %v3514_v55  ;;  %v3005_v17 = vadd.f32 %v6357_v52, %v3258_v23 }
 0x2b4   : > { %4544 = vst.msk [vmem:[%s5656_s22 + $0x360] sm:$0xff] %vm189_vm0, %v4416_v33  ;;  %v4417_v51 = vmul.f32 1.4142135, %v4289_v39  ;;  %vm4034_vm8 = vcmp.ge.f32.partialorder %v3906_v35, 0.0  ;;  %v4162_v43 = vmul.f32 0.2, %v3906_v35  ;;  %v3907_v21 = vadd.f32 %v6248_v8, %v3772_v13 }
 0x2b5   : > { %v3773_v60 = vadd.f32 %v6427_v45, %v3388_v36  ;;  %v3389_v46 = vadd.f32 %v3261_v41, %v3004_v32  ;;  %v6434_v54 = vmul.f32 0.5, %v3518_v42  ;;  %v3262_v49 = vmul.f32 1.5, %v3515_v6  ;;  %v3523_v32 = vld [vmem:[#allocation3 + $0x410] sm:$0xff] }
 0x2b6   : > { %4545 = vst.msk [vmem:[%s5656_s22 + $0x368] sm:$0xff] %vm189_vm0, %v4417_v51  ;;  %v4290_v48 = vsel %vm4034_vm8, %v3906_v35, %v4162_v43  ;;  %vm4035_vm9 = vcmp.ge.f32.partialorder %v3907_v21, 0.0  ;;  %v4163_v52 = vmul.f32 0.2, %v3907_v21  ;;  %v3006_v50 = vadd.f32 %v6364_v0, %v3259_v22  ;;  %v3522_v22 = vld [vmem:[#allocation3 + $0x408] sm:$0xff] }
 0x2b7   : > { %v4418_v53 = vmul.f32 1.4142135, %v4290_v48  ;;  %v3908_v2 = vadd.f32 %v6248_v8, %v3773_v60  ;;  %v3774_v55 = vadd.f32 %v6434_v54, %v3389_v46  ;;  %v3390_v56 = vadd.f32 %v3262_v49, %v3005_v17 }
 0x2b8   : > { %v4291_v58 = vsel %vm4035_vm9, %v3907_v21, %v4163_v52  ;;  %v6441_v61 = vmul.f32 0.5, %v3519_v47  ;;  %v3263_v62 = vmul.f32 1.5, %v3516_v29  ;;  %v3007_v38 = vadd.f32 %v6371_v10, %v3260_v26 }
 0x2b9   : > { %4546 = vst.msk [vmem:[%s5656_s22 + $0x370] sm:$0xff] %vm189_vm0, %v4418_v53  ;;  %v4419_v20 = vmul.f32 1.4142135, %v4291_v58  ;;  %vm4036_vm10 = vcmp.ge.f32.partialorder %v3908_v2, 0.0  ;;  %v4164_v4 = vmul.f32 0.2, %v3908_v2  ;;  %v3909_v0 = vadd.f32 %v6248_v8, %v3774_v55 }
 0x2ba   : > { %v3775_v23 = vadd.f32 %v6441_v61, %v3390_v56  ;;  %v3391_v6 = vadd.f32 %v3263_v62, %v3006_v50  ;;  %v6448_v9 = vmul.f32 0.5, %v3520_v57  ;;  %v3264_v3 = vmul.f32 1.5, %v3517_v30  ;;  %v3525_v50 = vld [vmem:[#allocation3 + $0x420] sm:$0xff] }
 0x2bb   : > { %4547 = vst.msk [vmem:[%s5656_s22 + $0x378] sm:$0xff] %vm189_vm0, %v4419_v20  ;;  %v4292_v12 = vsel %vm4036_vm10, %v3908_v2, %v4164_v4  ;;  %vm4037_vm11 = vcmp.ge.f32.partialorder %v3909_v0, 0.0  ;;  %v4165_v10 = vmul.f32 0.2, %v3909_v0  ;;  %v3008_v7 = vadd.f32 %v6378_v16, %v3261_v41  ;;  %v3524_v41 = vld [vmem:[#allocation3 + $0x418] sm:$0xff] }
 0x2bc   : > { %v4420_v14 = vmul.f32 1.4142135, %v4292_v12  ;;  %v3910_v59 = vadd.f32 %v6248_v8, %v3775_v23  ;;  %v3776_v29 = vadd.f32 %v6448_v9, %v3391_v6  ;;  %v3392_v19 = vadd.f32 %v3264_v3, %v3007_v38 }
 0x2bd   : > { %v4293_v18 = vsel %vm4037_vm11, %v3909_v0, %v4165_v10  ;;  %v3649_v37 = vmul.f32 0.5, %v3521_v11  ;;  %v3265_v27 = vmul.f32 1.5, %v3518_v42  ;;  %v3009_v15 = vadd.f32 %v6385_v24, %v3262_v49 }
 0x2be   : > { %4548 = vst.msk [vmem:[%s5656_s22 + $0x380] sm:$0xff] %vm189_vm0, %v4420_v14  ;;  %v4421_v40 = vmul.f32 1.4142135, %v4293_v18  ;;  %vm4038_vm12 = vcmp.ge.f32.partialorder %v3910_v59, 0.0  ;;  %v4166_v28 = vmul.f32 0.2, %v3910_v59  ;;  %v3911_v16 = vadd.f32 %v6248_v8, %v3776_v29 }
 0x2bf   : > { %v3777_v26 = vadd.f32 %v3649_v37, %v3392_v19  ;;  %v3393_v30 = vadd.f32 %v3265_v27, %v3008_v7  ;;  %v3650_v34 = vmul.f32 0.5, %v3522_v22  ;;  %v3266_v31 = vmul.f32 1.5, %v3519_v47  ;;  %v3527_v7 = vld [vmem:[#allocation3 + $0x430] sm:$0xff]  ;;  %v3528_v37 = vld [vmem:[#allocation3 + $0x438] sm:$0xff] }
 0x2c0   : > { %4549 = vst.msk [vmem:[%s5656_s22 + $0x388] sm:$0xff] %vm189_vm0, %v4421_v40  ;;  %v4294_v33 = vsel %vm4038_vm12, %v3910_v59, %v4166_v28  ;;  %vm4039_vm13 = vcmp.ge.f32.partialorder %v3911_v16, 0.0  ;;  %v4167_v35 = vmul.f32 0.2, %v3911_v16  ;;  %v3010_v24 = vadd.f32 %v6392_v44, %v3263_v62  ;;  %v3526_v62 = vld [vmem:[#allocation3 + $0x428] sm:$0xff] }
 0x2c1   : > { %v4422_v13 = vmul.f32 1.4142135, %v4294_v33  ;;  %v3912_v36 = vadd.f32 %v6248_v8, %v3777_v26  ;;  %v3778_v42 = vadd.f32 %v3650_v34, %v3393_v30  ;;  %v3394_v39 = vadd.f32 %v3266_v31, %v3009_v15  ;;  %v3529_v33 = vld [vmem:[#allocation3 + $0x440] sm:$0xff] }
 0x2c2   : > { %v4295_v17 = vsel %vm4039_vm13, %v3911_v16, %v4167_v35  ;;  %v3651_v51 = vmul.f32 0.5, %v3523_v32  ;;  %v3267_v43 = vmul.f32 1.5, %v3520_v57  ;;  %v3011_v21 = vadd.f32 %v6399_v1, %v3264_v3 }
 0x2c3   : > { %4550 = vst.msk [vmem:[%s5656_s22 + $0x390] sm:$0xff] %vm189_vm0, %v4422_v13  ;;  %v4423_v60 = vmul.f32 1.4142135, %v4295_v17  ;;  %vm4040_vm14 = vcmp.ge.f32.partialorder %v3912_v36, 0.0  ;;  %v4168_v46 = vmul.f32 0.2, %v3912_v36  ;;  %v3913_v49 = vadd.f32 %v6248_v8, %v3778_v42 }
 0x2c4   : > { %v3779_v44 = vadd.f32 %v3651_v51, %v3394_v39  ;;  %v3395_v47 = vadd.f32 %v3267_v43, %v3010_v24  ;;  %v3652_v48 = vmul.f32 0.5, %v3524_v41  ;;  %v3268_v52 = vmul.f32 1.5, %v3521_v11 }
 0x2c5   : > { %4551 = vst.msk [vmem:[%s5656_s22 + $0x398] sm:$0xff] %vm189_vm0, %v4423_v60  ;;  %v4296_v53 = vsel %vm4040_vm14, %v3912_v36, %v4168_v46  ;;  %vm4041_vm15 = vcmp.ge.f32.partialorder %v3913_v49, 0.0  ;;  %v4169_v2 = vmul.f32 0.2, %v3913_v49  ;;  %v3012_v1 = vadd.f32 %v6406_v5, %v3265_v27 }
 0x2c6   : > { %v4424_v55 = vmul.f32 1.4142135, %v4296_v53  ;;  %v3914_v56 = vadd.f32 %v6248_v8, %v3779_v44  ;;  %v3780_v57 = vadd.f32 %v3652_v48, %v3395_v47  ;;  %v3396_v58 = vadd.f32 %v3268_v52, %v3011_v21 }
 0x2c7   : > { %v4297_v38 = vsel %vm4041_vm15, %v3913_v49, %v4169_v2  ;;  %v3653_v20 = vmul.f32 0.5, %v3525_v50  ;;  %v3269_v4 = vmul.f32 1.5, %v3522_v22  ;;  %v3013_v0 = vadd.f32 %v6413_v63, %v3266_v31 }
 0x2c8   : > { %4552 = vst.msk [vmem:[%s5656_s22 + $0x3a0] sm:$0xff] %vm189_vm0, %v4424_v55  ;;  %v4425_v23 = vmul.f32 1.4142135, %v4297_v38  ;;  %vm4042_vm1 = vcmp.ge.f32.partialorder %v3914_v56, 0.0  ;;  %v4170_v6 = vmul.f32 0.2, %v3914_v56  ;;  %v3915_v3 = vadd.f32 %v6248_v8, %v3780_v57 }
 0x2c9   : > { %v3781_v5 = vadd.f32 %v3653_v20, %v3396_v58  ;;  %v3397_v11 = vadd.f32 %v3269_v4, %v3012_v1  ;;  %v3654_v12 = vmul.f32 0.5, %v3526_v62  ;;  %v3270_v10 = vmul.f32 1.5, %v3523_v32  ;;  %v3532_v57 = vld [vmem:[#allocation3 + $0x458] sm:$0xff] }
 0x2ca   : > { %4553 = vst.msk [vmem:[%s5656_s22 + $0x3a8] sm:$0xff] %vm189_vm0, %v4425_v23  ;;  %v4298_v14 = vsel %vm4042_vm1, %v3914_v56, %v4170_v6  ;;  %vm4043_vm2 = vcmp.ge.f32.partialorder %v3915_v3, 0.0  ;;  %v4171_v59 = vmul.f32 0.2, %v3915_v3  ;;  %v3014_v63 = vadd.f32 %v6420_v25, %v3267_v43 }
 0x2cb   : > { %v4426_v29 = vmul.f32 1.4142135, %v4298_v14  ;;  %v3916_v19 = vadd.f32 %v6248_v8, %v3781_v5  ;;  %v3782_v22 = vadd.f32 %v3654_v12, %v3397_v11  ;;  %v3398_v18 = vadd.f32 %v3270_v10, %v3013_v0 }
 0x2cc   : > { %v4299_v27 = vsel %vm4043_vm2, %v3915_v3, %v4171_v59  ;;  %v3655_v15 = vmul.f32 0.5, %v3527_v7  ;;  %v3271_v40 = vmul.f32 1.5, %v3524_v41  ;;  %v3015_v28 = vadd.f32 %v6427_v45, %v3268_v52  ;;  %v3530_v41 = vld [vmem:[#allocation3 + $0x448] sm:$0xff]  ;;  %v3531_v52 = vld [vmem:[#allocation3 + $0x450] sm:$0xff] }
 0x2cd   : > { %4554 = vst.msk [vmem:[%s5656_s22 + $0x3b0] sm:$0xff] %vm189_vm0, %v4426_v29  ;;  %v4427_v16 = vmul.f32 1.4142135, %v4299_v27  ;;  %vm4044_vm3 = vcmp.ge.f32.partialorder %v3916_v19, 0.0  ;;  %v4172_v26 = vmul.f32 0.2, %v3916_v19  ;;  %v3917_v30 = vadd.f32 %v6248_v8, %v3782_v22 }
 0x2ce   : > { %v3783_v25 = vadd.f32 %v3655_v15, %v3398_v18  ;;  %v3399_v34 = vadd.f32 %v3271_v40, %v3014_v63  ;;  %v3656_v31 = vmul.f32 0.5, %v3528_v37  ;;  %v3272_v32 = vmul.f32 1.5, %v3525_v50 }
 0x2cf   : > { %4555 = vst.msk [vmem:[%s5656_s22 + $0x3b8] sm:$0xff] %vm189_vm0, %v4427_v16  ;;  %v4300_v35 = vsel %vm4044_vm3, %v3916_v19, %v4172_v26  ;;  %vm4045_vm4 = vcmp.ge.f32.partialorder %v3917_v30, 0.0  ;;  %v4173_v24 = vmul.f32 0.2, %v3917_v30  ;;  %v3016_v45 = vadd.f32 %v6434_v54, %v3269_v4 }
 0x2d0   : > { %v4428_v13 = vmul.f32 1.4142135, %v4300_v35  ;;  %v3918_v36 = vadd.f32 %v6248_v8, %v3783_v25  ;;  %v3784_v42 = vadd.f32 %v3656_v31, %v3399_v34  ;;  %v3400_v39 = vadd.f32 %v3272_v32, %v3015_v28 }
 0x2d1   : > { %v4301_v17 = vsel %vm4045_vm4, %v3917_v30, %v4173_v24  ;;  %v3657_v51 = vmul.f32 0.5, %v3529_v33  ;;  %v3273_v43 = vmul.f32 1.5, %v3526_v62  ;;  %v3017_v21 = vadd.f32 %v6441_v61, %v3270_v10 }
 0x2d2   : > { %4556 = vst.msk [vmem:[%s5656_s22 + $0x3c0] sm:$0xff] %vm189_vm0, %v4428_v13  ;;  %v4429_v60 = vmul.f32 1.4142135, %v4301_v17  ;;  %vm4046_vm5 = vcmp.ge.f32.partialorder %v3918_v36, 0.0  ;;  %v4174_v46 = vmul.f32 0.2, %v3918_v36  ;;  %v3919_v49 = vadd.f32 %v6248_v8, %v3784_v42 }
 0x2d3   : > { %v3785_v54 = vadd.f32 %v3657_v51, %v3400_v39  ;;  %v3401_v44 = vadd.f32 %v3273_v43, %v3016_v45  ;;  %v3658_v47 = vmul.f32 0.5, %v3530_v41  ;;  %v3274_v48 = vmul.f32 1.5, %v3527_v7 }
 0x2d4   : > { %4557 = vst.msk [vmem:[%s5656_s22 + $0x3c8] sm:$0xff] %vm189_vm0, %v4429_v60  ;;  %v4302_v50 = vsel %vm4046_vm5, %v3918_v36, %v4174_v46  ;;  %vm4047_vm6 = vcmp.ge.f32.partialorder %v3919_v49, 0.0  ;;  %v4175_v53 = vmul.f32 0.2, %v3919_v49  ;;  %v3018_v61 = vadd.f32 %v6448_v9, %v3271_v40 }
 0x2d5   : > { %v4430_v2 = vmul.f32 1.4142135, %v4302_v50  ;;  %v3920_v1 = vadd.f32 %v6248_v8, %v3785_v54  ;;  %v3786_v55 = vadd.f32 %v3658_v47, %v3401_v44  ;;  %v3402_v56 = vadd.f32 %v3274_v48, %v3017_v21 }
 0x2d6   : > { %v4303_v58 = vsel %vm4047_vm6, %v3919_v49, %v4175_v53  ;;  %v3659_v62 = vmul.f32 0.5, %v3531_v52  ;;  %v3275_v38 = vmul.f32 1.5, %v3528_v37  ;;  %v3660_v6 = vmul.f32 0.5, %v3532_v57 }
 0x2d7   : > { %4558 = vst.msk [vmem:[%s5656_s22 + $0x3d0] sm:$0xff] %vm189_vm0, %v4430_v2  ;;  %v4431_v20 = vmul.f32 1.4142135, %v4303_v58  ;;  %vm4048_vm7 = vcmp.ge.f32.partialorder %v3920_v1, 0.0  ;;  %v4176_v4 = vmul.f32 0.2, %v3920_v1  ;;  %v3921_v0 = vadd.f32 %v6248_v8, %v3786_v55 }
 0x2d8   : > { %v3787_v23 = vadd.f32 %v3659_v62, %v3402_v56  ;;  %v3403_v9 = vadd.f32 %v3275_v38, %v3018_v61 }
 0x2d9   : > { %4559 = vst.msk [vmem:[%s5656_s22 + $0x3d8] sm:$0xff] %vm189_vm0, %v4431_v20  ;;  %v4304_v3 = vsel %vm4048_vm7, %v3920_v1, %v4176_v4  ;;  %vm4049_vm8 = vcmp.ge.f32.partialorder %v3921_v0, 0.0  ;;  %v4177_v5 = vmul.f32 0.2, %v3921_v0 }
 0x2da   : > { %v4432_v11 = vmul.f32 1.4142135, %v4304_v3  ;;  %v3922_v12 = vadd.f32 %v6248_v8, %v3787_v23  ;;  %v3788_v10 = vadd.f32 %v3660_v6, %v3403_v9 }
 0x2db   : > { %v4305_v7 = vsel %vm4049_vm8, %v3921_v0, %v4177_v5 }
 0x2dc   : > { %4560 = vst.msk [vmem:[%s5656_s22 + $0x3e0] sm:$0xff] %vm189_vm0, %v4432_v11  ;;  %v4433_v14 = vmul.f32 1.4142135, %v4305_v7  ;;  %vm4050_vm9 = vcmp.ge.f32.partialorder %v3922_v12, 0.0  ;;  %v4178_v59 = vmul.f32 0.2, %v3922_v12  ;;  %v3923_v63 = vadd.f32 %v6248_v8, %v3788_v10 }
 0x2de   : > { %4561 = vst.msk [vmem:[%s5656_s22 + $0x3e8] sm:$0xff] %vm189_vm0, %v4433_v14  ;;  %v4306_v29 = vsel %vm4050_vm9, %v3922_v12, %v4178_v59  ;;  %vm4051_vm10 = vcmp.ge.f32.partialorder %v3923_v63, 0.0  ;;  %v4179_v19 = vmul.f32 0.2, %v3923_v63 }
 0x2df   : > { %v4434_v22 = vmul.f32 1.4142135, %v4306_v29 }
 0x2e0   : > { %v4307_v18 = vsel %vm4051_vm10, %v3923_v63, %v4179_v19 }
 0x2e1   : > { %4562 = vst.msk [vmem:[%s5656_s22 + $0x3f0] sm:$0xff] %vm189_vm0, %v4434_v22  ;;  %v4435_v37 = vmul.f32 1.4142135, %v4307_v18 }
 0x2e3   : > { %4563 = vst.msk [vmem:[%s5656_s22 + $0x3f8] sm:$0xff] %vm189_vm0, %v4435_v37 }
 0x2e4 PF: > { %s12_s11 = sadd.s32 1, %s4723_s11   ;;  %s6522_s9 = smov %s4719_s10 }
 0x2e5   : > { %p9_p5 = scmp.ge.s32.totalorder %s12_s11, 4   ;;  %s6523_s10 = smov %s6525_s12 }
 0x2e7   :  { %11 = sbr.rel (!%p9_p5) target bundleno = 2 (0x2), region = 65 }

</bundles_post_ra>
